<compile_context>
chip_gen: v7x
topology: tpu7x:2x2x1
jax: 0.10.0
libtpu: 0.0.40
codegen_flags: <defaults>
</compile_context>

<pallas_src>
import functools
from typing import Any, NamedTuple

import jax
import jax.numpy as jnp
from jax.experimental import pallas as pl
from jax.experimental.pallas import tpu as pltpu


# ---------------------------------------------------------------------------
# Host-side chip / feature probes (run once, cached)
# ---------------------------------------------------------------------------

def _vmem_capacity_bytes():
    try:
        return int(pltpu.get_tpu_info().vmem_capacity_bytes)
    except Exception:
        return 64 * 1024 * 1024          # conservative: v7x per-TensorCore VMEM


@functools.lru_cache(maxsize=None)
def _buffered_one_supported():
    """Probe whether pipeline_mode=pl.Buffered(1) (single buffer for a
    grid-invariant operand) is supported by this JAX / Mosaic build."""
    try:
        def _k(x_ref, o_ref):
            o_ref[...] = x_ref[...]

        f = pl.pallas_call(
            _k,
            out_shape=jax.ShapeDtypeStruct((8, 128), jnp.float32),
            grid=(1,),
            in_specs=[pl.BlockSpec((8, 128), lambda i: (0, 0),
                                   pipeline_mode=pl.Buffered(1))],
            out_specs=pl.BlockSpec((8, 128), lambda i: (0, 0)),
        )
        jax.block_until_ready(f(jnp.zeros((8, 128), jnp.float32)))
        return True
    except Exception:
        return False


def _round_up(x, m):
    return ((x + m - 1) // m) * m


# ---------------------------------------------------------------------------
# Planning (once per model config) and weight preparation (once at load time)
# ---------------------------------------------------------------------------

class MLPPlan(NamedTuple):
    ti: int                      # intermediate-axis grid tile
    tc: int                      # in-kernel epilogue chunk (columns of I)
    resident: bool               # weights fully VMEM-resident (n_i == 1 path)
    single_buffer_weights: bool  # use pl.Buffered(1) on the weight BlockSpecs
    compute_dtype: Any


def plan_mlp(hidden_size, intermediate_size, compute_dtype=jnp.bfloat16, *,
             force_resident=None, ti=None, tc=None):
    """Pick intermediate tiling for this chip (VMEM-aware)."""
    H, I = hidden_size, intermediate_size
    c_bytes = jnp.dtype(compute_dtype).itemsize
    vmem_cap = _vmem_capacity_bytes()
    w_bytes = 3 * H * I * c_bytes            # gate+up fused slab + down slab

    single_buf = False
    if force_resident is None:
        if 2 * w_bytes <= int(0.6 * vmem_cap):
            # Fits even double-buffered; still try to free the idle buffer.
            resident = True
            single_buf = _buffered_one_supported()
        elif w_bytes <= int(0.6 * vmem_cap) and _buffered_one_supported():
            # Only fits if the weight blocks are single-buffered.
            resident = True
            single_buf = True
        else:
            resident = False
    else:
        resident = bool(force_resident)
        if resident:
            single_buf = _buffered_one_supported()

    if ti is None:
        if resident:
            ti = I
        else:
            ti = None
            for cand in (4096, 2048, 1024, 512, 256, 128):
                # double-buffered (H,2*ti) + (ti,H) slabs <= ~35% of VMEM
                if I % cand == 0 and 6 * H * cand * c_bytes <= int(0.35 * vmem_cap):
                    ti = cand
                    break
            if ti is None:
                ti = 128 if I % 128 == 0 else I
    assert I % ti == 0, "intermediate_size must be divisible by ti"

    if tc is None:
        tc = ti
        for cand in (512, 256, 128):
            if ti % cand == 0:
                tc = cand
                break
    assert ti % tc == 0, "ti must be divisible by the epilogue chunk tc"

    return MLPPlan(ti=int(ti), tc=int(tc), resident=resident,
                   single_buffer_weights=(resident and single_buf),
                   compute_dtype=compute_dtype)


def prepare_mlp_weights(w_gate, w_up, w_down, plan):
    """One-time weight re-layout + cast (call at load time, NOT per forward).

    w_gate, w_up : (H, I)   -- transpose of PyTorch nn.Linear.weight
    w_down       : (I, H)

    Returns (w_gu, w_dn) where w_gu is (H, 2*I) laid out as consecutive
    [gate_chunk_c | up_chunk_c] blocks of `plan.tc` columns each.
    """
    H, I = w_gate.shape
    tc = plan.tc
    assert I % tc == 0
    n_c = I // tc
    wg3 = w_gate.reshape(H, n_c, tc)
    wu3 = w_up.reshape(H, n_c, tc)
    w_gu = jnp.concatenate([wg3, wu3], axis=2).reshape(H, 2 * I)
    w_gu = w_gu.astype(plan.compute_dtype)
    w_dn = w_down.astype(plan.compute_dtype)
    return w_gu, w_dn


def _pick_token_tile(num_tokens, resident):
    """Token tile: big enough to be MXU-bound when streaming weights, but
    clamped to the (padded) token count and capped so at least two token
    tiles exist when possible (feeds both v7x TensorCores)."""
    m_round = _round_up(max(int(num_tokens), 1), 256)
    desired = 512 if resident else 1024
    if m_round >= 512:
        desired = min(desired, max(256, _round_up(m_round // 2, 256)))
    return min(desired, m_round)


# ---------------------------------------------------------------------------
# Kernels
# ---------------------------------------------------------------------------

def _mlp_kernel_resident(x_ref, wgu_ref, wd_ref, o_ref, *, tc):
    """Weights fully VMEM-resident; single grid axis over token tiles.

    x_ref  : (tm, H)      activation tile (compute dtype)
    wgu_ref: (H, 2*I)     fused [gate|up] weights, chunk-interleaved by tc
    wd_ref : (I, H)       down_proj weights
    o_ref  : (tm, H)      output tile
    """
    x = x_ref[...]
    I = wd_ref.shape[0]
    n_chunks = I // tc

    acc = None
    for c in range(n_chunks):               # static unroll; acc carries the chain
        gu = jnp.dot(x, wgu_ref[:, pl.ds(2 * tc * c, 2 * tc)],
                     preferred_element_type=jnp.float32)
        g = gu[:, :tc]
        u = gu[:, tc:]
        # SiLU(g) * u in f32 (EUP sigmoid + VPU muls overlap the next chunk's
        # MXU dot; f32 keeps v5e's no-bf16 VPU/EUP path happy).
        h = (g * jax.nn.sigmoid(g)) * u
        part = jnp.dot(h.astype(wd_ref.dtype), wd_ref[pl.ds(tc * c, tc), :],
                       preferred_element_type=jnp.float32)
        acc = part if acc is None else acc + part

    o_ref[...] = acc.astype(o_ref.dtype)


def _mlp_kernel_tiled(x_ref, wgu_ref, wd_ref, o_ref, acc_ref, *, tc):
    """Intermediate axis tiled over grid axis j (reduction) with an f32
    VMEM accumulator.

    x_ref  : (tm, H)      activation tile
    wgu_ref: (H, 2*ti)    fused [gate|up] slab for this i-tile (tc-interleaved)
    wd_ref : (ti, H)      down_proj slab for this i-tile
    o_ref  : (tm, H)      output tile (written on the last i-tile)
    acc_ref: (tm, H) f32  accumulator scratch (persists across the j axis)
    """
    j = pl.program_id(1)

    @pl.when(j == 0)
    def _():
        acc_ref[...] = jnp.zeros_like(acc_ref)

    x = x_ref[...]
    ti = wd_ref.shape[0]
    n_chunks = ti // tc

    partial_sum = None
    for c in range(n_chunks):
        gu = jnp.dot(x, wgu_ref[:, pl.ds(2 * tc * c, 2 * tc)],
                     preferred_element_type=jnp.float32)
        g = gu[:, :tc]
        u = gu[:, tc:]
        h = (g * jax.nn.sigmoid(g)) * u
        part = jnp.dot(h.astype(wd_ref.dtype), wd_ref[pl.ds(tc * c, tc), :],
                       preferred_element_type=jnp.float32)
        partial_sum = part if partial_sum is None else partial_sum + part

    acc_ref[...] += partial_sum

    # NOTE: this writeback is only correct because the output block index is
    # constant over j (j is the inner/reduction axis of the grid).
    @pl.when(j == pl.num_programs(1) - 1)
    def _():
        o_ref[...] = acc_ref[...].astype(o_ref.dtype)


# ---------------------------------------------------------------------------
# Forward wrapper (per-call path: only padding + pallas_call, no weight work)
# ---------------------------------------------------------------------------

@functools.partial(jax.jit,
                   static_argnames=("ti", "tc", "resident", "single_buf", "tm"))
def _mlp_forward(x, w_gu, w_dn, *, ti, tc, resident, single_buf, tm):
    B, S, H = x.shape
    I = w_dn.shape[0]
    out_dtype = x.dtype
    compute_dtype = w_gu.dtype
    c_bytes = jnp.dtype(compute_dtype).itemsize
    o_bytes = jnp.dtype(out_dtype).itemsize

    # --- flatten tokens and pad to a multiple of the token tile ------------
    M = B * S
    n_m = -(-M // tm)
    M_pad = n_m * tm
    x2d = x.reshape(M, H).astype(compute_dtype)
    if M_pad != M:
        x2d = jnp.pad(x2d, ((0, M_pad - M), (0, 0)))

    # --- VMEM budget (includes in-kernel f32 temporaries + margin) ---------
    vmem_cap = _vmem_capacity_bytes()
    margin = 2 * 1024 * 1024
    tmp_bytes = (tm * 2 * tc * 4            # gu (f32)
                 + tm * tc * (4 + c_bytes)  # h (f32) + h cast
                 + tm * H * 4)              # accumulator (local or scratch)
    io_bytes = 2 * tm * H * c_bytes + 2 * tm * H * o_bytes

    cost = pl.CostEstimate(
        flops=6 * M_pad * H * I,
        transcendentals=M_pad * I,
        bytes_accessed=(M_pad * H * (c_bytes + o_bytes)
                        + 3 * H * I * c_bytes * (1 if resident else n_m)),
    )

    if resident:
        w_bufs = 1 if single_buf else 2
        footprint = w_bufs * 3 * H * I * c_bytes + io_bytes + tmp_bytes
        vmem_limit = int(min(max(footprint + margin, 32 * 1024 * 1024),
                             int(0.92 * vmem_cap)))

        if single_buf:
            wgu_spec = pl.BlockSpec((H, 2 * I), lambda i: (0, 0),
                                    pipeline_mode=pl.Buffered(1))
            wd_spec = pl.BlockSpec((I, H), lambda i: (0, 0),
                                   pipeline_mode=pl.Buffered(1))
        else:
            wgu_spec = pl.BlockSpec((H, 2 * I), lambda i: (0, 0))
            wd_spec = pl.BlockSpec((I, H), lambda i: (0, 0))

        out2d = pl.pallas_call(
            functools.partial(_mlp_kernel_resident, tc=tc),
            out_shape=jax.ShapeDtypeStruct((M_pad, H), out_dtype),
            grid=(n_m,),
            in_specs=[pl.BlockSpec((tm, H), lambda i: (i, 0)),
                      wgu_spec, wd_spec],
            out_specs=pl.BlockSpec((tm, H), lambda i: (i, 0)),
            compiler_params=pltpu.CompilerParams(
                dimension_semantics=("parallel",),
                vmem_limit_bytes=vmem_limit),
            cost_estimate=cost,
        )(x2d, w_gu, w_dn)
    else:
        n_i = I // ti
        footprint = 6 * H * ti * c_bytes + io_bytes + tmp_bytes
        vmem_limit = int(min(max(footprint + margin, 32 * 1024 * 1024),
                             int(0.92 * vmem_cap)))

        out2d = pl.pallas_call(
            functools.partial(_mlp_kernel_tiled, tc=tc),
            out_shape=jax.ShapeDtypeStruct((M_pad, H), out_dtype),
            grid=(n_m, n_i),
            in_specs=[
                pl.BlockSpec((tm, H), lambda i, j: (i, 0)),        # x tile
                pl.BlockSpec((H, 2 * ti), lambda i, j: (0, j)),    # [gate|up]
                pl.BlockSpec((ti, H), lambda i, j: (j, 0)),        # down_proj
            ],
            out_specs=pl.BlockSpec((tm, H), lambda i, j: (i, 0)),
            scratch_shapes=[pltpu.VMEM((tm, H), jnp.float32)],
            compiler_params=pltpu.CompilerParams(
                dimension_semantics=("parallel", "arbitrary"),
                vmem_limit_bytes=vmem_limit),
            cost_estimate=cost,
        )(x2d, w_gu, w_dn)

    return out2d[:M].reshape(B, S, H)


def brain_to_text_mlp(x, w_gu, w_dn, plan, *, tm=None):
    """SwiGLU MLP forward.  `w_gu`/`w_dn` come from `prepare_mlp_weights`."""
    B, S, _ = x.shape
    if tm is None:
        tm = _pick_token_tile(B * S, plan.resident)
    return _mlp_forward(x, w_gu, w_dn,
                        ti=plan.ti, tc=plan.tc, resident=plan.resident,
                        single_buf=plan.single_buffer_weights, tm=int(tm))


# ---------------------------------------------------------------------------
# Pure-JAX reference (mirrors the kernel's precision choices)
# ---------------------------------------------------------------------------

def _reference_mlp(x, w_gate, w_up, w_down, compute_dtype=jnp.bfloat16):
    f32 = jnp.float32
    xc = x.astype(compute_dtype).astype(f32)
    wg = w_gate.astype(compute_dtype).astype(f32)
    wu = w_up.astype(compute_dtype).astype(f32)
    wd = w_down.astype(compute_dtype).astype(f32)
    g = jnp.einsum("bsh,hi->bsi", xc, wg)
    u = jnp.einsum("bsh,hi->bsi", xc, wu)
    h = (jax.nn.silu(g) * u).astype(compute_dtype).astype(f32)
    return jnp.einsum("bsi,ih->bsh", h, wd).astype(x.dtype)


if __name__ == "__main__":
    # Small, TPU-tile-friendly config (hidden/intermediate multiples of 128).
    batch, seq = 2, 8
    hidden_size = 128          # config.hidden_size (scaled down)
    intermediate_size = 512    # config.intermediate_size (scaled down)
    initializer_range = 0.02

    key = jax.random.PRNGKey(0)
    kx, kg, ku, kd = jax.random.split(key, 4)

    x = jax.random.normal(kx, (batch, seq, hidden_size), dtype=jnp.float32)
    w_gate = initializer_range * jax.random.normal(
        kg, (hidden_size, intermediate_size), dtype=jnp.float32)
    w_up = initializer_range * jax.random.normal(
        ku, (hidden_size, intermediate_size), dtype=jnp.float32)
    w_down = initializer_range * jax.random.normal(
        kd, (intermediate_size, hidden_size), dtype=jnp.float32)

    ref = _reference_mlp(x, w_gate, w_up, w_down)

    # --- Path 1: chip-aware default plan (weights VMEM-resident here) -------
    plan = plan_mlp(hidden_size, intermediate_size)
    w_gu, w_dn = prepare_mlp_weights(w_gate, w_up, w_down, plan)   # load-time
    out = jax.block_until_ready(brain_to_text_mlp(x, w_gu, w_dn, plan))
    assert out.shape == (batch, seq, hidden_size)
    err = float(jnp.max(jnp.abs(out - ref)))
    assert jnp.allclose(out, ref, atol=2e-3, rtol=2e-2), \
        f"resident path mismatch vs reference (max abs err={err})"

    # --- Path 2: force the streaming / grid-reduction path ------------------
    # ti=256 -> two intermediate grid tiles (exercises the f32 accumulator),
    # tc=128 -> two epilogue chunks per tile, tm=256 exercises token padding.
    plan2 = plan_mlp(hidden_size, intermediate_size,
                     force_resident=False, ti=256, tc=128)
    w_gu2, w_dn2 = prepare_mlp_weights(w_gate, w_up, w_down, plan2)
    out2 = jax.block_until_ready(
        brain_to_text_mlp(x, w_gu2, w_dn2, plan2, tm=256))
    err2 = float(jnp.max(jnp.abs(out2 - ref)))
    assert jnp.allclose(out2, ref, atol=2e-3, rtol=2e-2), \
        f"tiled path mismatch vs reference (max abs err={err2})"

    print("KERNEL_OK")
</pallas_src>

<mosaic_0001>
module attributes {stable_mosaic.version = 11 : i64} {
  func.func @_k(%arg0: i32, %arg1: memref<8x128xf32, #tpu.memory_space<vmem>>, %arg2: memref<8x128xf32, #tpu.memory_space<vmem>>) attributes {dimension_semantics = [#tpu.dimension_semantics<arbitrary>], iteration_bounds = array<i64: 1>, scalar_prefetch = 0 : i64, scratch_operands = 0 : i64, tpu.core_type = #tpu.core_type<tc>, window_params = [{pipeline_mode = #tpu.pipeline_mode<synchronous>, transform_indices = @transform_0, window_bounds = array<i64: 8, 128>}, {pipeline_mode = #tpu.pipeline_mode<synchronous>, transform_indices = @transform_1, window_bounds = array<i64: 8, 128>}]} {
    %c0 = arith.constant 0 : index
    %c0_0 = arith.constant 0 : index
    %0 = vector.load %arg1[%c0, %c0_0] : memref<8x128xf32, #tpu.memory_space<vmem>>, vector<8x128xf32>
    %c0_1 = arith.constant 0 : index
    %c0_2 = arith.constant 0 : index
    %1 = vector.load %arg2[%c0_1, %c0_2] : memref<8x128xf32, #tpu.memory_space<vmem>>, vector<8x128xf32>
    tpu.vector_store %arg2[%c0_1, %c0_2], %0 {strides = array<i32>} : memref<8x128xf32, #tpu.memory_space<vmem>>, vector<8x128xf32>,
    return
  }
  func.func @transform_0(%arg0: i32) -> (i32, i32) {
    %c0_i32 = arith.constant 0 : i32
    %c0_i32_0 = arith.constant 0 : i32
    %c0_i32_1 = arith.constant 0 : i32
    return %c0_i32, %c0_i32_0 : i32, i32
  }
  func.func @transform_1(%arg0: i32) -> (i32, i32) {
    %c0_i32 = arith.constant 0 : i32
    %c0_i32_0 = arith.constant 0 : i32
    %c0_i32_1 = arith.constant 0 : i32
    return %c0_i32, %c0_i32_0 : i32, i32
  }
}

module attributes {stable_mosaic.version = 11 : i64} {
  func.func @_mlp_kernel_resident(%arg0: i32, %arg1: memref<256x128xbf16, #tpu.memory_space<vmem>>, %arg2: memref<128x1024xbf16, #tpu.memory_space<vmem>>, %arg3: memref<512x128xbf16, #tpu.memory_space<vmem>>, %arg4: memref<256x128xf32, #tpu.memory_space<vmem>>) attributes {dimension_semantics = [#tpu.dimension_semantics<parallel>], iteration_bounds = array<i64: 1>, scalar_prefetch = 0 : i64, scratch_operands = 0 : i64, tpu.core_type = #tpu.core_type<tc>, window_params = [{transform_indices = @transform_0, window_bounds = array<i64: 256, 128>}, {pipeline_mode = #tpu.pipeline_mode<synchronous>, transform_indices = @transform_1, window_bounds = array<i64: 128, 1024>}, {pipeline_mode = #tpu.pipeline_mode<synchronous>, transform_indices = @transform_2, window_bounds = array<i64: 512, 128>}, {transform_indices = @transform_3, window_bounds = array<i64: 256, 128>}]} {
    %c0 = arith.constant 0 : index
    %c0_0 = arith.constant 0 : index
    %0 = vector.load %arg1[%c0, %c0_0] : memref<256x128xbf16, #tpu.memory_space<vmem>>, vector<256x128xbf16>
    %c0_1 = arith.constant 0 : index
    %c0_2 = arith.constant 0 : index
    %1 = vector.load %arg2[%c0_1, %c0_2] : memref<128x1024xbf16, #tpu.memory_space<vmem>>, vector<128x1024xbf16>
    %cst = arith.constant dense<0.000000e+00> : vector<256x1024xf32>
    %2 = tpu.matmul %0, %1, %cst {dimension_numbers = #tpu.dot_dimension_numbers<[1], [0], [0], [1], [0, 0, 1, 1], [], []>} : vector<256x128xbf16>, vector<128x1024xbf16>, vector<256x1024xf32> -> vector<256x1024xf32>
    %3 = vector.extract_strided_slice %2 {offsets = [0, 0], sizes = [256, 512], strides = [1, 1]} : vector<256x1024xf32> to vector<256x512xf32>
    %4 = vector.extract_strided_slice %2 {offsets = [0, 512], sizes = [256, 512], strides = [1, 1]} : vector<256x1024xf32> to vector<256x512xf32>
    %5 = arith.negf %3 : vector<256x512xf32>
    %6 = math.exp %5 : vector<256x512xf32>
    %cst_3 = arith.constant 1.000000e+00 : f32
    %7 = vector.broadcast %cst_3 : f32 to vector<256x512xf32>
    %8 = arith.addf %7, %6 : vector<256x512xf32>
    %9 = arith.divf %7, %8 : vector<256x512xf32>
    %10 = arith.mulf %3, %9 : vector<256x512xf32>
    %11 = arith.mulf %10, %4 : vector<256x512xf32>
    %12 = arith.truncf %11 : vector<256x512xf32> to vector<256x512xbf16>
    %c0_4 = arith.constant 0 : index
    %c0_5 = arith.constant 0 : index
    %13 = vector.load %arg3[%c0_4, %c0_5] : memref<512x128xbf16, #tpu.memory_space<vmem>>, vector<512x128xbf16>
    %cst_6 = arith.constant dense<0.000000e+00> : vector<256x128xf32>
    %14 = tpu.matmul %12, %13, %cst_6 {dimension_numbers = #tpu.dot_dimension_numbers<[1], [0], [0], [1], [0, 0, 1, 1], [], []>} : vector<256x512xbf16>, vector<512x128xbf16>, vector<256x128xf32> -> vector<256x128xf32>
    %c0_7 = arith.constant 0 : index
    %c0_8 = arith.constant 0 : index
    %15 = vector.load %arg4[%c0_7, %c0_8] : memref<256x128xf32, #tpu.memory_space<vmem>>, vector<256x128xf32>
    tpu.vector_store %arg4[%c0_7, %c0_8], %14 {strides = array<i32>} : memref<256x128xf32, #tpu.memory_space<vmem>>, vector<256x128xf32>,
    return
  }
  func.func @transform_0(%arg0: i32) -> (i32, i32) {
    %c0_i32 = arith.constant 0 : i32
    %c0_i32_0 = arith.constant 0 : i32
    return %arg0, %c0_i32 : i32, i32
  }
  func.func @transform_1(%arg0: i32) -> (i32, i32) {
    %c0_i32 = arith.constant 0 : i32
    %c0_i32_0 = arith.constant 0 : i32
    %c0_i32_1 = arith.constant 0 : i32
    return %c0_i32, %c0_i32_0 : i32, i32
  }
  func.func @transform_2(%arg0: i32) -> (i32, i32) {
    %c0_i32 = arith.constant 0 : i32
    %c0_i32_0 = arith.constant 0 : i32
    %c0_i32_1 = arith.constant 0 : i32
    return %c0_i32, %c0_i32_0 : i32, i32
  }
  func.func @transform_3(%arg0: i32) -> (i32, i32) {
    %c0_i32 = arith.constant 0 : i32
    %c0_i32_0 = arith.constant 0 : i32
    return %arg0, %c0_i32 : i32, i32
  }
}

</mosaic_0001>

<bundles_post_ra>
// kernel: tpu_custom_call.1
= control target key start
LH: loop header
LB: loop body
LE: loop exit
PB: predicated region body
PF: predicated region fallthrough
CT: control target
= control target key end

     0   :  { %6 = vsyncpa [#allocation3], 0  ;;  %s124_s0 = inlined_call_operand.hbm [shape: f32[8,128], index: 0, kind: input, shape index: {}]   ;;  %s125_s1 = inlined_call_operand.hbm [shape: f32[8,128], index: 1, kind: output, shape index: {}]  }
   0x1   :  { %7 = vsyncpa [#allocation4], 0  ;;  %s88_s6 = smov [#allocation2]   ;;  %s40_s10 = scalar_lea.hbm %s124_s0, 128 }
   0x2   :  { %s14_s7 = sshll.u32 %s88_s6, 4  ;;  %p41_p0 = scmp.ne.s32.totalorder %s124_s0, %s40_s10  ;;  %s15_s7 = int_to_ptr.vmem [resolvable:$true] %s14_s7 }
   0x3   :  { %p44_p1 = scmp.lt.u32.totalorder %s40_s10, %s124_s0 }
   0x5   :  { %p46_p2 = pnand %p44_p1, %p41_p0 }
   0x7   :  { %49 = shalt.err (!%p46_p2)
}
   0x8   :  { %s50_s15 = scalar_lea.vmem %s15_s7, 128  ;;  %p55_p4 = scmp.lt.s32.totalorder %s15_s7, %s15_s7 }
   0x9   :  { %p51_p3 = scmp.ne.s32.totalorder %s15_s7, %s50_s15  ;;  %p56_p5 = scmp.lt.s32.totalorder %s50_s15, %s50_s15 }
   0xb   :  { %p57_p6 = por %p56_p5, %p55_p4 }
   0xd   :  { %p58_p7 = pnand %p57_p6, %p51_p3 }
   0xf   :  { %61 = shalt.err (!%p58_p7)
}
  0x10   :  { %17 = dma.hbm_to_vmem [thread:$0]  %s124_s0, 128, %s15_s7, [#allocation3]  }
  0x11   :  { %84 = dma.done.wait [#allocation3], 128  }
  0x12   :  { %85 = vsyncadd [#allocation3], 4294967168  ;;  %s89_s18 = smov [#allocation5]   ;;  %v21_v0 = vld [vmem:[#allocation2] sm:$0xff] }
  0x13   :  { %s29_s19 = sshll.u32 %s89_s18, 4  ;;  %22 = vst [vmem:[#allocation5] sm:$0xff] %v21_v0  ;;  %s30_s19 = int_to_ptr.vmem [resolvable:$true] %s29_s19 }
  0x14   :  { %s62_s20 = scalar_lea.vmem %s30_s19, 128  ;;  %p67_p9 = scmp.lt.s32.totalorder %s30_s19, %s30_s19 }
  0x15   :  { %p63_p8 = scmp.ne.s32.totalorder %s30_s19, %s62_s20  ;;  %p68_p10 = scmp.lt.s32.totalorder %s62_s20, %s62_s20 }
  0x17   :  { %p69_p11 = por %p68_p10, %p67_p9 }
  0x19   :  { %p70_p12 = pnand %p69_p11, %p63_p8 }
  0x1b   :  { %73 = shalt.err (!%p70_p12)
}
  0x1c   :  { %s74_s23 = scalar_lea.hbm %s125_s1, 128 }
  0x1d   :  { %p75_p13 = scmp.ne.s32.totalorder %s125_s1, %s74_s23  ;;  %p78_p0 = scmp.lt.u32.totalorder %s74_s23, %s125_s1 }
  0x1f   :  { %p80_p1 = pnand %p78_p0, %p75_p13 }
  0x21   :  { %83 = shalt.err (!%p80_p1)
}
  0x22   :  { %32 = dma.vmem_to_hbm [thread:$0]  %s30_s19, 128, %s125_s1, [#allocation4]  }
  0x23   :  { %86 = dma.done.wait [#allocation4], 128  }
  0x24   :  { %87 = vsyncadd [#allocation4], 4294967168 }
  0x25   :  { %36 = vsyncpa [#allocation3], 1 }
  0x26   :  { %37 = vsyncpa [#allocation4], 1 }

// kernel: _mlp_forward.1
= control target key start
LH: loop header
LB: loop body
LE: loop exit
PB: predicated region body
PF: predicated region fallthrough
CT: control target
= control target key end

     0   :  { %8 = vsyncpa [#allocation3], 0  ;;  %s5583_s0 = inlined_call_operand.vmem [shape: bf16[256,128], index: 0, kind: input, shape index: {}]   ;;  %s5584_s1 = inlined_call_operand.hbm [shape: bf16[128,1024], index: 1, kind: input, shape index: {}]   ;;  %s5585_s2 = inlined_call_operand.hbm [shape: bf16[512,128], index: 2, kind: input, shape index: {}]   ;;  %s5586_s3 = inlined_call_operand.vmem [shape: f32[256,128], index: 3, kind: output, shape index: {}]  }
   0x1   :  { %9 = vsyncpa [#allocation5], 0  ;;  %s4110_s12 = smov [#allocation2]   ;;  %s4062_s16 = scalar_lea.hbm %s5584_s1, 8192 }
   0x2   :  { %s17_s13 = sshll.u32 %s4110_s12, 4  ;;  %p4063_p0 = scmp.ne.s32.totalorder %s5584_s1, %s4062_s16  ;;  %s18_s13 = int_to_ptr.vmem [resolvable:$true] %s17_s13 }
   0x3   :  { %p4066_p1 = scmp.lt.u32.totalorder %s4062_s16, %s5584_s1 }
   0x5   :  { %p4068_p2 = pnand %p4066_p1, %p4063_p0 }
   0x7   :  { %4071 = shalt.err (!%p4068_p2)
}
   0x8   :  { %s4072_s21 = scalar_lea.vmem %s18_s13, 8192  ;;  %p4077_p4 = scmp.lt.s32.totalorder %s18_s13, %s18_s13 }
   0x9   :  { %p4073_p3 = scmp.ne.s32.totalorder %s18_s13, %s4072_s21  ;;  %p4078_p5 = scmp.lt.s32.totalorder %s4072_s21, %s4072_s21 }
   0xb   :  { %p4079_p6 = por %p4078_p5, %p4077_p4 }
   0xd   :  { %p4080_p7 = pnand %p4079_p6, %p4073_p3 }
   0xf   :  { %4083 = shalt.err (!%p4080_p7)
}
  0x10   :  { %s4111_s22 = smov 512   ;;  %s4112_s23 = smov 32  }
  0x11   :  { %23 = dma.hbm_to_vmem [thread:$0]  %s5584_s1, 8192, %s18_s13, [#allocation3], %s4111_s22, %s4111_s22, %s4112_s23  }
  0x12   :  { %s4113_s26 = smov [#allocation4]   ;;  %s4084_s30 = scalar_lea.hbm %s5585_s2, 4096 }
  0x13   :  { %s29_s27 = sshll.u32 %s4113_s26, 4  ;;  %p4085_p8 = scmp.ne.s32.totalorder %s5585_s2, %s4084_s30  ;;  %s30_s27 = int_to_ptr.vmem [resolvable:$true] %s29_s27 }
  0x14   :  { %p4088_p9 = scmp.lt.u32.totalorder %s4084_s30, %s5585_s2 }
  0x16   :  { %p4090_p10 = pnand %p4088_p9, %p4085_p8 }
  0x18   :  { %4093 = shalt.err (!%p4090_p10)
}
  0x19   :  { %s4094_s8 = scalar_lea.vmem %s30_s27, 4096  ;;  %p4099_p12 = scmp.lt.s32.totalorder %s30_s27, %s30_s27 }
  0x1a   :  { %p4095_p11 = scmp.ne.s32.totalorder %s30_s27, %s4094_s8  ;;  %p4100_p13 = scmp.lt.s32.totalorder %s4094_s8, %s4094_s8 }
  0x1c   :  { %p4101_p0 = por %p4100_p13, %p4099_p12 }
  0x1e   :  { %p4102_p1 = pnand %p4101_p0, %p4095_p11 }
  0x20   :  { %4105 = shalt.err (!%p4102_p1)
}
  0x21   :  { %s4114_s1 = smov 64   ;;  %s4115_s9 = smov 4  }
  0x22   :  { %35 = dma.hbm_to_vmem [thread:$0]  %s5585_s2, 4096, %s30_s27, [#allocation5], %s4114_s1, %s4114_s1, %s4115_s9  }
  0x23   :  { %4106 = dma.done.wait [#allocation3], 8192  }
  0x24   :  { %4107 = vsyncadd [#allocation3], 4294959104 }
  0x25   :  { %4108 = dma.done.wait [#allocation5], 4096  }
  0x26   :  { %4109 = vsyncadd [#allocation5], 4294963200  ;;  %v4116_v0 = vmov 0   ;;  %v75_v1 = vld [vmem:[#allocation2] sm:$0xff]  ;;  %v76_v3 = vld [vmem:[#allocation2 + $0x8] sm:$0xff] }
  0x27   :  { %587 = vmatprep.mubr.bf16.mxu0 %v4116_v0  ;;  %780 = vmatprep.mubr.bf16.mxu1 %v4116_v0  ;;  %v79_v2 = vld [vmem:[#allocation2 + $0x20] sm:$0xff]  ;;  %v80_v5 = vld [vmem:[#allocation2 + $0x28] sm:$0xff]  ;;  %v77_v62 = vld [vmem:[#allocation2 + $0x10] sm:$0xff] }
  0x28   :  { %v3048_v4 = vcombine.high %v75_v1, %v79_v2  ;;  %v3047_v6 = vcombine.low %v75_v1, %v79_v2  ;;  %v83_v7 = vld [vmem:[#allocation2 + $0x40] sm:$0xff]  ;;  %v3050_v9 = vcombine.high %v76_v3, %v80_v5  ;;  %v3049_v10 = vcombine.low %v76_v3, %v80_v5  ;;  %v84_v12 = vld [vmem:[#allocation2 + $0x48] sm:$0xff]  ;;  %v81_v63 = vld [vmem:[#allocation2 + $0x30] sm:$0xff] }
  0x29   :  { %v87_v8 = vld [vmem:[#allocation2 + $0x60] sm:$0xff]  ;;  %v88_v13 = vld [vmem:[#allocation2 + $0x68] sm:$0xff]  ;;  %v78_v2 = vld [vmem:[#allocation2 + $0x18] sm:$0xff] }
  0x2a   :  { %v3056_v11 = vcombine.high %v83_v7, %v87_v8  ;;  %v91_v14 = vld [vmem:[#allocation2 + $0x80] sm:$0xff]  ;;  %555 = vmatprep.subr.bf16.mxu0 %v3048_v4  ;;  %v3058_v15 = vcombine.high %v84_v12, %v88_v13  ;;  %v92_v17 = vld [vmem:[#allocation2 + $0x88] sm:$0xff]  ;;  %748 = vmatprep.subr.bf16.mxu1 %v3050_v9  ;;  %v3055_v19 = vcombine.low %v83_v7, %v87_v8  ;;  %v82_v3 = vld [vmem:[#allocation2 + $0x38] sm:$0xff] }
  0x2b   :  { %v95_v16 = vld [vmem:[#allocation2 + $0xa0] sm:$0xff]  ;;  %v96_v18 = vld [vmem:[#allocation2 + $0xa8] sm:$0xff]  ;;  %556 = vmatpush1.bf16.msra.mxu0 %v3047_v6  ;;  %749 = vmatpush1.bf16.msra.mxu1 %v3049_v10  ;;  %v3057_v20 = vcombine.low %v84_v12, %v88_v13  ;;  %v3052_v6 = vcombine.high %v77_v62, %v81_v63  ;;  %v3054_v8 = vcombine.high %v78_v2, %v82_v3  ;;  %v85_v9 = vld [vmem:[#allocation2 + $0x50] sm:$0xff] }
  0x2c   :  { %557 = vmatprep.subr.bf16.mxu0 %v3056_v11  ;;  %v3064_v21 = vcombine.high %v91_v14, %v95_v16  ;;  %750 = vmatprep.subr.bf16.mxu1 %v3058_v15  ;;  %v3066_v22 = vcombine.high %v92_v17, %v96_v18  ;;  %v99_v23 = vld [vmem:[#allocation2 + $0xc0] sm:$0xff]  ;;  %v100_v25 = vld [vmem:[#allocation2 + $0xc8] sm:$0xff]  ;;  %v3063_v27 = vcombine.low %v91_v14, %v95_v16  ;;  %v89_v10 = vld [vmem:[#allocation2 + $0x70] sm:$0xff] }
  0x2d   :  { %v103_v24 = vld [vmem:[#allocation2 + $0xe0] sm:$0xff]  ;;  %v104_v26 = vld [vmem:[#allocation2 + $0xe8] sm:$0xff]  ;;  %v3065_v28 = vcombine.low %v92_v17, %v96_v18  ;;  %v3051_v11 = vcombine.low %v77_v62, %v81_v63  ;;  %v86_v12 = vld [vmem:[#allocation2 + $0x58] sm:$0xff]  ;;  %v3053_v14 = vcombine.low %v78_v2, %v82_v3  ;;  %v3060_v16 = vcombine.high %v85_v9, %v89_v10 }
  0x2e   :  { %v3072_v29 = vcombine.high %v99_v23, %v103_v24  ;;  %v3074_v30 = vcombine.high %v100_v25, %v104_v26  ;;  %v107_v31 = vld [vmem:[#allocation2 + $0x100] sm:$0xff]  ;;  %v108_v33 = vld [vmem:[#allocation2 + $0x108] sm:$0xff]  ;;  %v3071_v35 = vcombine.low %v99_v23, %v103_v24  ;;  %v3073_v36 = vcombine.low %v100_v25, %v104_v26  ;;  %v90_v13 = vld [vmem:[#allocation2 + $0x78] sm:$0xff] }
  0x2f   :  { %558 = vmatpush1.bf16.msra.mxu0 %v3055_v19  ;;  %751 = vmatpush1.bf16.msra.mxu1 %v3057_v20  ;;  %v111_v32 = vld [vmem:[#allocation2 + $0x120] sm:$0xff]  ;;  %v112_v34 = vld [vmem:[#allocation2 + $0x128] sm:$0xff]  ;;  %v93_v15 = vld [vmem:[#allocation2 + $0x90] sm:$0xff]  ;;  %v3062_v18 = vcombine.high %v86_v12, %v90_v13  ;;  %v3061_v23 = vcombine.low %v86_v12, %v90_v13 }
  0x30   :  { %559 = vmatprep.subr.bf16.mxu0 %v3064_v21  ;;  %752 = vmatprep.subr.bf16.mxu1 %v3066_v22  ;;  %v3080_v37 = vcombine.high %v107_v31, %v111_v32  ;;  %v115_v38 = vld [vmem:[#allocation2 + $0x140] sm:$0xff]  ;;  %v3082_v39 = vcombine.high %v108_v33, %v112_v34  ;;  %v116_v41 = vld [vmem:[#allocation2 + $0x148] sm:$0xff]  ;;  %v3079_v43 = vcombine.low %v107_v31, %v111_v32  ;;  %v97_v17 = vld [vmem:[#allocation2 + $0xb0] sm:$0xff] }
  0x31   :  { %v119_v40 = vld [vmem:[#allocation2 + $0x160] sm:$0xff]  ;;  %v120_v42 = vld [vmem:[#allocation2 + $0x168] sm:$0xff]  ;;  %v3081_v44 = vcombine.low %v108_v33, %v112_v34  ;;  %v94_v19 = vld [vmem:[#allocation2 + $0x98] sm:$0xff]  ;;  %v3059_v21 = vcombine.low %v85_v9, %v89_v10  ;;  %v3068_v24 = vcombine.high %v93_v15, %v97_v17 }
  0x32   :  { %v3088_v45 = vcombine.high %v115_v38, %v119_v40  ;;  %v3090_v46 = vcombine.high %v116_v41, %v120_v42  ;;  %v123_v47 = vld [vmem:[#allocation2 + $0x180] sm:$0xff]  ;;  %v124_v49 = vld [vmem:[#allocation2 + $0x188] sm:$0xff]  ;;  %v3087_v51 = vcombine.low %v115_v38, %v119_v40  ;;  %v3089_v52 = vcombine.low %v116_v41, %v120_v42  ;;  %v98_v20 = vld [vmem:[#allocation2 + $0xb8] sm:$0xff] }
  0x33   :  { %560 = vmatpush1.bf16.msra.mxu0 %v3063_v27  ;;  %753 = vmatpush1.bf16.msra.mxu1 %v3065_v28  ;;  %v127_v48 = vld [vmem:[#allocation2 + $0x1a0] sm:$0xff]  ;;  %v128_v50 = vld [vmem:[#allocation2 + $0x1a8] sm:$0xff]  ;;  %v101_v25 = vld [vmem:[#allocation2 + $0xd0] sm:$0xff]  ;;  %v3070_v27 = vcombine.high %v94_v19, %v98_v20  ;;  %v3069_v33 = vcombine.low %v94_v19, %v98_v20 }
  0x34   :  { %561 = vmatprep.subr.bf16.mxu0 %v3072_v29  ;;  %754 = vmatprep.subr.bf16.mxu1 %v3074_v30  ;;  %v3096_v53 = vcombine.high %v123_v47, %v127_v48  ;;  %v3098_v54 = vcombine.high %v124_v49, %v128_v50  ;;  %v131_v55 = vld [vmem:[#allocation2 + $0x1c0] sm:$0xff]  ;;  %v132_v57 = vld [vmem:[#allocation2 + $0x1c8] sm:$0xff]  ;;  %v3095_v59 = vcombine.low %v123_v47, %v127_v48  ;;  %v105_v26 = vld [vmem:[#allocation2 + $0xf0] sm:$0xff] }
  0x35   :  { %v135_v56 = vld [vmem:[#allocation2 + $0x1e0] sm:$0xff]  ;;  %v136_v58 = vld [vmem:[#allocation2 + $0x1e8] sm:$0xff]  ;;  %v3097_v60 = vcombine.low %v124_v49, %v128_v50  ;;  %v102_v28 = vld [vmem:[#allocation2 + $0xd8] sm:$0xff]  ;;  %v3067_v30 = vcombine.low %v93_v15, %v97_v17  ;;  %v3076_v34 = vcombine.high %v101_v25, %v105_v26 }
  0x36   :  { %v3104_v61 = vcombine.high %v131_v55, %v135_v56  ;;  %v3106_v1 = vcombine.high %v132_v57, %v136_v58  ;;  %v3103_v4 = vcombine.low %v131_v55, %v135_v56  ;;  %v3105_v5 = vcombine.low %v132_v57, %v136_v58  ;;  %v4166_v7 = vld [vmem:[%s5583_s0] sm:$0xff]   ;;  %v4174_v22 = vld [vmem:[%s5583_s0 + $0x8] sm:$0xff]   ;;  %v106_v29 = vld [vmem:[#allocation2 + $0xf8] sm:$0xff] }
  0x37   :  { %562 = vmatpush1.bf16.msra.mxu0 %v3071_v35  ;;  %755 = vmatpush1.bf16.msra.mxu1 %v3073_v36  ;;  %v109_v31 = vld [vmem:[#allocation2 + $0x110] sm:$0xff]  ;;  %v110_v35 = vld [vmem:[#allocation2 + $0x118] sm:$0xff]  ;;  %v3077_v42 = vcombine.low %v102_v28, %v106_v29  ;;  %v4211_v9 = vld [vmem:[%s5583_s0 + $0x28] sm:$0xff]  }
  0x38   :  { %563 = vmatprep.subr.bf16.mxu0 %v3080_v37  ;;  %756 = vmatprep.subr.bf16.mxu1 %v3082_v39  ;;  %v113_v32 = vld [vmem:[#allocation2 + $0x130] sm:$0xff]  ;;  %v114_v36 = vld [vmem:[#allocation2 + $0x138] sm:$0xff]  ;;  %v3078_v37 = vcombine.high %v102_v28, %v106_v29  ;;  %v3075_v39 = vcombine.low %v101_v25, %v105_v26  ;;  %v4238_v12 = vld [vmem:[%s5583_s0 + $0x40] sm:$0xff]  }
  0x39   :  { %v4184_v38 = vld [vmem:[%s5583_s0 + $0x10] sm:$0xff]   ;;  %v3083_v47 = vcombine.low %v109_v31, %v113_v32  ;;  %v3085_v50 = vcombine.low %v110_v35, %v114_v36  ;;  %v4193_v55 = vld [vmem:[%s5583_s0 + $0x18] sm:$0xff]   ;;  %v4247_v13 = vld [vmem:[%s5583_s0 + $0x48] sm:$0xff]  }
  0x3a   :  { %v117_v40 = vld [vmem:[#allocation2 + $0x150] sm:$0xff]  ;;  %v138_v62 = vld [vmem:[#allocation2 + $0x1f8] sm:$0xff]  ;;  %v4283_v17 = vld [vmem:[%s5583_s0 + $0x68] sm:$0xff]  }
  0x3b   :  { %564 = vmatpush1.bf16.msra.mxu0 %v3079_v43  ;;  %757 = vmatpush1.bf16.msra.mxu1 %v3081_v44  ;;  %v121_v41 = vld [vmem:[#allocation2 + $0x170] sm:$0xff]  ;;  %v3084_v43 = vcombine.high %v109_v31, %v113_v32  ;;  %v118_v44 = vld [vmem:[#allocation2 + $0x158] sm:$0xff]  ;;  %v3518_v20 = vld [vmem:[#allocation4 + $0x40] sm:$0xff]  }
  0x3c   :  { %565 = vmatprep.subr.bf16.mxu0 %v3088_v45  ;;  %758 = vmatprep.subr.bf16.mxu1 %v3090_v46  ;;  %v122_v45 = vld [vmem:[#allocation2 + $0x178] sm:$0xff]  ;;  %v3086_v46 = vcombine.high %v110_v35, %v114_v36  ;;  %v125_v48 = vld [vmem:[#allocation2 + $0x190] sm:$0xff]  ;;  %v3091_v56 = vcombine.low %v117_v40, %v121_v41  ;;  %v3524_v25 = vld [vmem:[#allocation4 + $0x8] sm:$0xff]  }
  0x3d   :  { %v129_v49 = vld [vmem:[#allocation2 + $0x1b0] sm:$0xff]  ;;  %v4265_v15 = vld [vmem:[%s5583_s0 + $0x58] sm:$0xff]   ;;  %v3525_v26 = vld [vmem:[#allocation4 + $0x88] sm:$0xff]  }
  0x3e   :  { %v133_v57 = vld [vmem:[#allocation2 + $0x1d0] sm:$0xff]  ;;  %v4301_v19 = vld [vmem:[%s5583_s0 + $0x78] sm:$0xff]  }
  0x3f   :  { %566 = vmatpush1.bf16.msra.mxu0 %v3087_v51  ;;  %759 = vmatpush1.bf16.msra.mxu1 %v3089_v52  ;;  %v3092_v51 = vcombine.high %v117_v40, %v121_v41  ;;  %v126_v52 = vld [vmem:[#allocation2 + $0x198] sm:$0xff]  ;;  %v137_v58 = vld [vmem:[#allocation2 + $0x1f0] sm:$0xff] }
  0x40   :  { %567 = vmatprep.subr.bf16.mxu0 %v3096_v53  ;;  %760 = vmatprep.subr.bf16.mxu1 %v3098_v54  ;;  %v130_v53 = vld [vmem:[#allocation2 + $0x1b8] sm:$0xff]  ;;  %v3094_v54 = vcombine.high %v118_v44, %v122_v45  ;;  %v3108_v3 = vcombine.high %v133_v57, %v137_v58  ;;  %v4220_v10 = vld [vmem:[%s5583_s0 + $0x30] sm:$0xff]  }
  0x41   :  { %v3102_v63 = vcombine.high %v126_v52, %v130_v53  ;;  %v3101_v2 = vcombine.low %v126_v52, %v130_v53  ;;  %v3527_v28 = vld [vmem:[#allocation4 + $0xd0] sm:$0xff]  }
  0x42   :  { %v3528_v29 = vld [vmem:[#allocation4 + $0x10] sm:$0xff]  }
  0x43   :  { %568 = vmatpush1.bf16.msra.mxu0 %v3095_v59  ;;  %761 = vmatpush1.bf16.msra.mxu1 %v3097_v60  ;;  %v3093_v59 = vcombine.low %v118_v44, %v122_v45  ;;  %v3100_v60 = vcombine.high %v125_v48, %v129_v49 }
  0x44   :  { %569 = vmatprep.subr.bf16.mxu0 %v3104_v61  ;;  %762 = vmatprep.subr.bf16.mxu1 %v3106_v1  ;;  %v134_v61 = vld [vmem:[#allocation2 + $0x1d8] sm:$0xff]  ;;  %v3099_v1 = vcombine.low %v125_v48, %v129_v49 }
  0x47   :  { %570 = vmatpush1.bf16.msra.mxu0 %v3103_v4  ;;  %763 = vmatpush1.bf16.msra.mxu1 %v3105_v5  ;;  %v3110_v4 = vcombine.high %v134_v61, %v138_v62  ;;  %v3107_v5 = vcombine.low %v133_v57, %v137_v58 }
  0x48   :  { %941 = vmatprep.subr.bf16.mxu0 %v3052_v6  ;;  %1134 = vmatprep.subr.bf16.mxu1 %v3054_v8  ;;  %v3109_v6 = vcombine.low %v134_v61, %v138_v62  ;;  %v4202_v8 = vld [vmem:[%s5583_s0 + $0x20] sm:$0xff]   ;;  %v3531_v62 = vld [vmem:[#allocation4 + $0xd8] sm:$0xff]  }
  0x4a   :  { %588 = vmatmul.mubr.bf16.vlgmr.msra.gmra.mrb[0].mxu0 %v4166_v7  ;;  %781 = vmatmul.mubr.bf16.vlgmr.msra.gmra.mrb[0].mxu1 %v4166_v7 }
  0x4b   :  { %942 = vmatpush1.bf16.msra.mxu0 %v3051_v11  ;;  %1135 = vmatpush1.bf16.msra.mxu1 %v3053_v14  ;;  %v4229_v11 = vld [vmem:[%s5583_s0 + $0x38] sm:$0xff]   ;;  %v4256_v14 = vld [vmem:[%s5583_s0 + $0x50] sm:$0xff]  }
  0x4c   :  { %597 = vmatprep.mubr.bf16.mxu0 %v4116_v0  ;;  %790 = vmatprep.mubr.bf16.mxu1 %v4116_v0 }
  0x4d   :  { %943 = vmatprep.subr.bf16.mxu0 %v3060_v16  ;;  %1136 = vmatprep.subr.bf16.mxu1 %v3062_v18  ;;  %v4274_v16 = vld [vmem:[%s5583_s0 + $0x60] sm:$0xff]   ;;  %v4292_v18 = vld [vmem:[%s5583_s0 + $0x70] sm:$0xff]  }
  0x4f   :  { %944 = vmatpush1.bf16.msra.mxu0 %v3059_v21  ;;  %1137 = vmatpush1.bf16.msra.mxu1 %v3061_v23  ;;  %v3519_v21 = vld [vmem:[#allocation4 + $0xc0] sm:$0xff]  }
  0x50   :  { %945 = vmatprep.subr.bf16.mxu0 %v3068_v24  ;;  %1138 = vmatprep.subr.bf16.mxu1 %v3070_v27  ;;  %v3520_v23 = vld [vmem:[#allocation4] sm:$0xff]   ;;  %v3526_v27 = vld [vmem:[#allocation4 + $0x50] sm:$0xff]  }
  0x51   :  { %v3521_v24 = vld [vmem:[#allocation4 + $0x80] sm:$0xff]  }
  0x52   :  { %598 = vmatmul.mubr.bf16.gmra.mrb[4].mxu0 %v4174_v22  ;;  %791 = vmatmul.mubr.bf16.gmra.mrb[4].mxu1 %v4174_v22 }
  0x53   :  { %607 = vmatprep.mubr.bf16.mxu0 %v4116_v0  ;;  %800 = vmatprep.mubr.bf16.mxu1 %v4116_v0 }
  0x54   :  { %946 = vmatpush1.bf16.msra.mxu0 %v3067_v30  ;;  %1139 = vmatpush1.bf16.msra.mxu1 %v3069_v33  ;;  %v3529_v30 = vld [vmem:[#allocation4 + $0x90] sm:$0xff]  }
  0x55   :  { %947 = vmatprep.subr.bf16.mxu0 %v3076_v34  ;;  %1140 = vmatprep.subr.bf16.mxu1 %v3078_v37 }
  0x58   :  { %948 = vmatpush1.bf16.msra.mxu0 %v3075_v39  ;;  %1141 = vmatpush1.bf16.msra.mxu1 %v3077_v42 }
  0x59   :  { %949 = vmatprep.subr.bf16.mxu0 %v3084_v43  ;;  %1142 = vmatprep.subr.bf16.mxu1 %v3086_v46 }
  0x5a   :  { %608 = vmatmul.mubr.bf16.gmra.mrb[8].mxu0 %v4184_v38  ;;  %801 = vmatmul.mubr.bf16.gmra.mrb[8].mxu1 %v4184_v38 }
  0x5b   :  { %617 = vmatprep.mubr.bf16.mxu0 %v4116_v0  ;;  %810 = vmatprep.mubr.bf16.mxu1 %v4116_v0 }
  0x5c   :  { %950 = vmatpush1.bf16.msra.mxu0 %v3083_v47  ;;  %1143 = vmatpush1.bf16.msra.mxu1 %v3085_v50 }
  0x5d   :  { %951 = vmatprep.subr.bf16.mxu0 %v3092_v51  ;;  %1144 = vmatprep.subr.bf16.mxu1 %v3094_v54 }
  0x60   :  { %952 = vmatpush1.bf16.msra.mxu0 %v3091_v56  ;;  %1145 = vmatpush1.bf16.msra.mxu1 %v3093_v59 }
  0x61   :  { %953 = vmatprep.subr.bf16.mxu0 %v3100_v60  ;;  %1146 = vmatprep.subr.bf16.mxu1 %v3102_v63  ;;  %v3530_v60 = vld [vmem:[#allocation4 + $0x58] sm:$0xff]  }
  0x62   :  { %618 = vmatmul.mubr.bf16.gmra.mrb[12].mxu0 %v4193_v55  ;;  %811 = vmatmul.mubr.bf16.gmra.mrb[12].mxu1 %v4193_v55  ;;  %v3532_v63 = vld [vmem:[#allocation4 + $0x18] sm:$0xff]  }
  0x63   :  { %627 = vmatprep.mubr.bf16.mxu0 %v4116_v0  ;;  %820 = vmatprep.mubr.bf16.mxu1 %v4116_v0 }
  0x64   :  { %954 = vmatpush1.bf16.msra.mxu0 %v3099_v1  ;;  %1147 = vmatpush1.bf16.msra.mxu1 %v3101_v2  ;;  %v3533_v1 = vld [vmem:[#allocation4 + $0x98] sm:$0xff]  }
  0x65   :  { %955 = vmatprep.subr.bf16.mxu0 %v3108_v3  ;;  %1148 = vmatprep.subr.bf16.mxu1 %v3110_v4 }
  0x68   :  { %956 = vmatpush1.bf16.msra.mxu0 %v3107_v5  ;;  %1149 = vmatpush1.bf16.msra.mxu1 %v3109_v6 }
  0x69   :  { %3271 = vmatprep.subr.bf16.mxu0 %v3518_v20  ;;  %3383 = vmatprep.subr.bf16.mxu1 %v3519_v21 }
  0x6a   :  { %628 = vmatmul.mubr.bf16.gmra.mrb[16].mxu0 %v4202_v8  ;;  %821 = vmatmul.mubr.bf16.gmra.mrb[16].mxu1 %v4202_v8 }
  0x6b   :  { %637 = vmatprep.mubr.bf16.mxu0 %v4116_v0  ;;  %830 = vmatprep.mubr.bf16.mxu1 %v4116_v0 }
  0x72   :  { %638 = vmatmul.mubr.bf16.gmra.mrb[20].mxu0 %v4211_v9  ;;  %831 = vmatmul.mubr.bf16.gmra.mrb[20].mxu1 %v4211_v9 }
  0x73   :  { %647 = vmatprep.mubr.bf16.mxu0 %v4116_v0  ;;  %840 = vmatprep.mubr.bf16.mxu1 %v4116_v0 }
  0x7a   :  { %648 = vmatmul.mubr.bf16.gmra.mrb[24].mxu0 %v4220_v10  ;;  %841 = vmatmul.mubr.bf16.gmra.mrb[24].mxu1 %v4220_v10 }
  0x7b   :  { %657 = vmatprep.mubr.bf16.mxu0 %v4116_v0  ;;  %850 = vmatprep.mubr.bf16.mxu1 %v4116_v0 }
  0x82   :  { %658 = vmatmul.mubr.bf16.gmra.mrb[28].mxu0 %v4229_v11  ;;  %851 = vmatmul.mubr.bf16.gmra.mrb[28].mxu1 %v4229_v11 }
  0x83   :  { %667 = vmatprep.mubr.bf16.mxu0 %v4116_v0  ;;  %860 = vmatprep.mubr.bf16.mxu1 %v4116_v0 }
  0x8a   :  { %668 = vmatmul.mubr.bf16.gmra.mrb[32].mxu0 %v4238_v12  ;;  %861 = vmatmul.mubr.bf16.gmra.mrb[32].mxu1 %v4238_v12 }
  0x8b   :  { %677 = vmatprep.mubr.bf16.mxu0 %v4116_v0  ;;  %870 = vmatprep.mubr.bf16.mxu1 %v4116_v0 }
  0x92   :  { %678 = vmatmul.mubr.bf16.gmra.mrb[36].mxu0 %v4247_v13  ;;  %871 = vmatmul.mubr.bf16.gmra.mrb[36].mxu1 %v4247_v13 }
  0x93   :  { %687 = vmatprep.mubr.bf16.mxu0 %v4116_v0  ;;  %880 = vmatprep.mubr.bf16.mxu1 %v4116_v0 }
  0x9a   :  { %688 = vmatmul.mubr.bf16.gmra.mrb[40].mxu0 %v4256_v14  ;;  %881 = vmatmul.mubr.bf16.gmra.mrb[40].mxu1 %v4256_v14 }
  0x9b   :  { %697 = vmatprep.mubr.bf16.mxu0 %v4116_v0  ;;  %890 = vmatprep.mubr.bf16.mxu1 %v4116_v0 }
  0xa2   :  { %698 = vmatmul.mubr.bf16.gmra.mrb[44].mxu0 %v4265_v15  ;;  %891 = vmatmul.mubr.bf16.gmra.mrb[44].mxu1 %v4265_v15 }
  0xa3   :  { %707 = vmatprep.mubr.bf16.mxu0 %v4116_v0  ;;  %900 = vmatprep.mubr.bf16.mxu1 %v4116_v0 }
  0xaa   :  { %708 = vmatmul.mubr.bf16.gmra.mrb[48].mxu0 %v4274_v16  ;;  %901 = vmatmul.mubr.bf16.gmra.mrb[48].mxu1 %v4274_v16 }
  0xab   :  { %717 = vmatprep.mubr.bf16.mxu0 %v4116_v0  ;;  %910 = vmatprep.mubr.bf16.mxu1 %v4116_v0 }
  0xb2   :  { %718 = vmatmul.mubr.bf16.gmra.mrb[52].mxu0 %v4283_v17  ;;  %911 = vmatmul.mubr.bf16.gmra.mrb[52].mxu1 %v4283_v17 }
  0xb3   :  { %727 = vmatprep.mubr.bf16.mxu0 %v4116_v0  ;;  %920 = vmatprep.mubr.bf16.mxu1 %v4116_v0 }
  0xba   :  { %728 = vmatmul.mubr.bf16.gmra.mrb[56].mxu0 %v4292_v18  ;;  %921 = vmatmul.mubr.bf16.gmra.mrb[56].mxu1 %v4292_v18 }
  0xbb   :  { %737 = vmatprep.mubr.bf16.mxu0 %v4116_v0  ;;  %930 = vmatprep.mubr.bf16.mxu1 %v4116_v0 }
  0xc2   :  { %738 = vmatmul.mubr.bf16.gmra.mrb[60].mxu0 %v4301_v19  ;;  %931 = vmatmul.mubr.bf16.gmra.mrb[60].mxu1 %v4301_v19 }
  0xc3   :  { %973 = vmatprep.mubr.bf16.mxu0 %v4116_v0  ;;  %1166 = vmatprep.mubr.bf16.mxu1 %v4116_v0 }
  0xca   :  { %974 = vmatmul.mubr.bf16.vlgmr.msra.gmra.mrb[64].mxu0 %v4166_v7  ;;  %1167 = vmatmul.mubr.bf16.vlgmr.msra.gmra.mrb[64].mxu1 %v4166_v7  ;;  %v3522_v7 = vld [vmem:[#allocation4 + $0x48] sm:$0xff]  }
  0xcb   :  { %983 = vmatprep.mubr.bf16.mxu0 %v4116_v0  ;;  %1176 = vmatprep.mubr.bf16.mxu1 %v4116_v0 }
  0xcc   :  { %3272 = vmatpush3.bf16.msra.mxu0 %v3520_v23  ;;  %3384 = vmatpush3.bf16.msra.mxu1 %v3521_v24 }
  0xcd   :  { %3273 = vmatprep.subr.bf16.mxu0 %v3522_v7 }
  0xd0   :  { %3274 = vmatpush3.bf16.msra.mxu0 %v3524_v25 }
  0xd1   :  { %3275 = vmatprep.subr.bf16.mxu0 %v3526_v27 }
  0xd2   :  { %984 = vmatmul.mubr.bf16.gmra.mrb[68].mxu0 %v4174_v22  ;;  %1177 = vmatmul.mubr.bf16.gmra.mrb[68].mxu1 %v4174_v22  ;;  %v3523_v22 = vld [vmem:[#allocation4 + $0xc8] sm:$0xff]  }
  0xd3   :  { %993 = vmatprep.mubr.bf16.mxu0 %v4116_v0  ;;  %1186 = vmatprep.mubr.bf16.mxu1 %v4116_v0 }
  0xd4   :  { %3385 = vmatprep.subr.bf16.mxu1 %v3523_v22  ;;  %3276 = vmatpush3.bf16.msra.mxu0 %v3528_v29 }
  0xd5   :  { %3386 = vmatpush3.bf16.msra.mxu1 %v3525_v26  ;;  %3277 = vmatprep.subr.bf16.mxu0 %v3530_v60 }
  0xd6   :  { %3387 = vmatprep.subr.bf16.mxu1 %v3527_v28 }
  0xd8   :  { %3278 = vmatpush3.bf16.msra.mxu0 %v3532_v63 }
  0xd9   :  { %3388 = vmatpush3.bf16.msra.mxu1 %v3529_v30 }
  0xda   :  { %994 = vmatmul.mubr.bf16.gmra.mrb[72].mxu0 %v4184_v38  ;;  %1187 = vmatmul.mubr.bf16.gmra.mrb[72].mxu1 %v4184_v38 }
  0xdb   :  { %1003 = vmatprep.mubr.bf16.mxu0 %v4116_v0  ;;  %1196 = vmatprep.mubr.bf16.mxu1 %v4116_v0 }
  0xdc   :  { %3389 = vmatprep.subr.bf16.mxu1 %v3531_v62 }
  0xdd   :  { %3390 = vmatpush3.bf16.msra.mxu1 %v3533_v1 }
  0xe2   :  { %1004 = vmatmul.mubr.bf16.gmra.mrb[76].mxu0 %v4193_v55  ;;  %1197 = vmatmul.mubr.bf16.gmra.mrb[76].mxu1 %v4193_v55 }
  0xe3   :  { %1013 = vmatprep.mubr.bf16.mxu0 %v4116_v0  ;;  %1206 = vmatprep.mubr.bf16.mxu1 %v4116_v0 }
  0xea   :  { %1014 = vmatmul.mubr.bf16.gmra.mrb[80].mxu0 %v4202_v8  ;;  %1207 = vmatmul.mubr.bf16.gmra.mrb[80].mxu1 %v4202_v8 }
  0xeb   :  { %1023 = vmatprep.mubr.bf16.mxu0 %v4116_v0  ;;  %1216 = vmatprep.mubr.bf16.mxu1 %v4116_v0 }
  0xf2   :  { %1024 = vmatmul.mubr.bf16.gmra.mrb[84].mxu0 %v4211_v9  ;;  %1217 = vmatmul.mubr.bf16.gmra.mrb[84].mxu1 %v4211_v9 }
  0xf3   :  { %1033 = vmatprep.mubr.bf16.mxu0 %v4116_v0  ;;  %1226 = vmatprep.mubr.bf16.mxu1 %v4116_v0 }
  0xfa   :  { %1034 = vmatmul.mubr.bf16.gmra.mrb[88].mxu0 %v4220_v10  ;;  %1227 = vmatmul.mubr.bf16.gmra.mrb[88].mxu1 %v4220_v10 }
  0xfb   :  { %1043 = vmatprep.mubr.bf16.mxu0 %v4116_v0  ;;  %1236 = vmatprep.mubr.bf16.mxu1 %v4116_v0 }
 0x102   :  { %1044 = vmatmul.mubr.bf16.gmra.mrb[92].mxu0 %v4229_v11  ;;  %1237 = vmatmul.mubr.bf16.gmra.mrb[92].mxu1 %v4229_v11 }
 0x103   :  { %1053 = vmatprep.mubr.bf16.mxu0 %v4116_v0  ;;  %1246 = vmatprep.mubr.bf16.mxu1 %v4116_v0 }
 0x10a   :  { %1054 = vmatmul.mubr.bf16.gmra.mrb[96].mxu0 %v4238_v12  ;;  %1247 = vmatmul.mubr.bf16.gmra.mrb[96].mxu1 %v4238_v12 }
 0x10b   :  { %1063 = vmatprep.mubr.bf16.mxu0 %v4116_v0  ;;  %1256 = vmatprep.mubr.bf16.mxu1 %v4116_v0 }
 0x112   :  { %1064 = vmatmul.mubr.bf16.gmra.mrb[100].mxu0 %v4247_v13  ;;  %1257 = vmatmul.mubr.bf16.gmra.mrb[100].mxu1 %v4247_v13 }
 0x113   :  { %1073 = vmatprep.mubr.bf16.mxu0 %v4116_v0  ;;  %1266 = vmatprep.mubr.bf16.mxu1 %v4116_v0 }
 0x11a   :  { %1074 = vmatmul.mubr.bf16.gmra.mrb[104].mxu0 %v4256_v14  ;;  %1267 = vmatmul.mubr.bf16.gmra.mrb[104].mxu1 %v4256_v14 }
 0x11b   :  { %1083 = vmatprep.mubr.bf16.mxu0 %v4116_v0  ;;  %1276 = vmatprep.mubr.bf16.mxu1 %v4116_v0 }
 0x11d   :  { %v4351_v31 = vpop.f32.mrb[0].mxu0  ;;  %v4354_v33 = vpop.f32.mrb[0].mxu1 }
 0x11e   :  { %v3111_v32 = vmul.f32 -1.442695, %v4351_v31  ;;  %v4356_v34 = vpop.f32.mrb[1].mxu0  ;;  %v3113_v35 = vmul.f32 -1.442695, %v4354_v33  ;;  %v4360_v37 = vpop.f32.mrb[1].mxu1 }
 0x11f   :  { %v3112_v36 = vmul.f32 -1.442695, %v4356_v34  ;;  %v4362_v38 = vpop.f32.mrb[2].mxu0  ;;  %v3114_v39 = vmul.f32 -1.442695, %v4360_v37  ;;  %v4366_v41 = vpop.f32.mrb[2].mxu1 }
 0x120   :  { %3550 = vpow2.f32 %v3111_v32  ;;  %v3115_v40 = vmul.f32 -1.442695, %v4362_v38  ;;  %v4368_v42 = vpop.f32.mrb[3].mxu0  ;;  %v3117_v43 = vmul.f32 -1.442695, %v4366_v41  ;;  %v4371_v44 = vpop.f32.mrb[3].mxu1 }
 0x121   :  { %3552 = vpow2.f32 %v3113_v35  ;;  %v3116_v45 = vmul.f32 -1.442695, %v4368_v42  ;;  %v3118_v46 = vmul.f32 -1.442695, %v4371_v44 }
 0x122   :  { %3554 = vpow2.f32 %v3112_v36  ;;  %1084 = vmatmul.mubr.bf16.gmra.mrb[108].mxu0 %v4265_v15  ;;  %1277 = vmatmul.mubr.bf16.gmra.mrb[108].mxu1 %v4265_v15 }
 0x123   :  { %3556 = vpow2.f32 %v3114_v39  ;;  %1093 = vmatprep.mubr.bf16.mxu0 %v4116_v0  ;;  %1286 = vmatprep.mubr.bf16.mxu1 %v4116_v0 }
 0x124   :  { %3558 = vpow2.f32 %v3115_v40 }
 0x125   :  { %3560 = vpow2.f32 %v3117_v43  ;;  %v4379_v47 = vpop.f32.mrb[4].mxu0  ;;  %v4382_v49 = vpop.f32.mrb[4].mxu1 }
 0x126   :  { %3562 = vpow2.f32 %v3116_v45  ;;  %v3119_v48 = vmul.f32 -1.442695, %v4379_v47  ;;  %v4384_v50 = vpop.f32.mrb[5].mxu0  ;;  %v3121_v51 = vmul.f32 -1.442695, %v4382_v49  ;;  %v4388_v53 = vpop.f32.mrb[5].mxu1 }
 0x127   :  { %3564 = vpow2.f32 %v3118_v46  ;;  %v3120_v52 = vmul.f32 -1.442695, %v4384_v50  ;;  %v4390_v54 = vpop.f32.mrb[6].mxu0  ;;  %v3122_v55 = vmul.f32 -1.442695, %v4388_v53  ;;  %v4394_v57 = vpop.f32.mrb[6].mxu1 }
 0x128   :  { %5703 = vst [vmem:[#allocation8_spill] sm:$0xff] %v4390_v54  ;;  %3566 = vpow2.f32 %v3119_v48  ;;  %v3123_v56 = vmul.f32 -1.442695, %v4390_v54  ;;  %5704 = vst [vmem:[#allocation9_spill] sm:$0xff] %v4394_v57  ;;  %v4396_v58 = vpop.f32.mrb[7].mxu0  ;;  %v4398_v59 = vpop.f32.mrb[7].mxu1 }
 0x129   :  { %5705 = vst [vmem:[#allocation10_spill] sm:$0xff] %v4396_v58  ;;  %3568 = vpow2.f32 %v3121_v51  ;;  %5706 = vst [vmem:[#allocation11_spill] sm:$0xff] %v4398_v59  ;;  %v3125_v46 = vmul.f32 -1.442695, %v4394_v57 }
 0x12a   :  { %v3551_v61 = vpop.eup %3550  ;;  %3570 = vpow2.f32 %v3120_v52  ;;  %1094 = vmatmul.mubr.bf16.gmra.mrb[112].mxu0 %v4274_v16  ;;  %1287 = vmatmul.mubr.bf16.gmra.mrb[112].mxu1 %v4274_v16 }
 0x12b   :  { %v3553_v2 = vpop.eup %3552  ;;  %v1711_v3 = vadd.f32 1.0, %v3551_v61  ;;  %3572 = vpow2.f32 %v3122_v55  ;;  %1103 = vmatprep.mubr.bf16.mxu0 %v4116_v0  ;;  %1296 = vmatprep.mubr.bf16.mxu1 %v4116_v0  ;;  %v3124_v55 = vmul.f32 -1.442695, %v4396_v58  ;;  %v3126_v61 = vmul.f32 -1.442695, %v4398_v59 }
 0x12c   :  { %v3555_v4 = vpop.eup %3554  ;;  %v1713_v5 = vadd.f32 1.0, %v3553_v2  ;;  %3574 = vpow2.f32 %v3123_v56 }
 0x12d   :  { %v3557_v6 = vpop.eup %3556  ;;  %3576 = vrcp.f32 %v1711_v3  ;;  %v1712_v8 = vadd.f32 1.0, %v3555_v4  ;;  %v4404_v9 = vpop.f32.mrb[8].mxu0 }
 0x12e   :  { %5707 = vst [vmem:[#allocation12_spill] sm:$0xff] %v4404_v9  ;;  %v3559_v10 = vpop.eup %3558  ;;  %3578 = vrcp.f32 %v1713_v5  ;;  %v1714_v11 = vadd.f32 1.0, %v3557_v6  ;;  %v4406_v12 = vpop.f32.mrb[8].mxu1  ;;  %v3127_v2 = vmul.f32 -1.442695, %v4404_v9 }
 0x12f   :  { %5708 = vst [vmem:[#allocation13_spill] sm:$0xff] %v4406_v12  ;;  %v4408_v13 = vpop.f32.mrb[9].mxu0  ;;  %v3561_v14 = vpop.eup %3560  ;;  %3580 = vrcp.f32 %v1712_v8  ;;  %v1715_v15 = vadd.f32 1.0, %v3559_v10  ;;  %v3129_v6 = vmul.f32 -1.442695, %v4406_v12 }
 0x130   :  { %5709 = vst [vmem:[#allocation14_spill] sm:$0xff] %v4408_v13  ;;  %v4410_v16 = vpop.f32.mrb[9].mxu1  ;;  %v3563_v20 = vpop.eup %3562  ;;  %3582 = vrcp.f32 %v1714_v11  ;;  %v1717_v21 = vadd.f32 1.0, %v3561_v14  ;;  %v3128_v10 = vmul.f32 -1.442695, %v4408_v13 }
 0x131   :  { %5710 = vst [vmem:[#allocation15_spill] sm:$0xff] %v4410_v16  ;;  %v4412_v23 = vpop.f32.mrb[10].mxu0  ;;  %v4414_v24 = vpop.f32.mrb[10].mxu1  ;;  %3584 = vrcp.f32 %v1715_v15  ;;  %v1716_v22 = vadd.f32 1.0, %v3563_v20  ;;  %v3130_v14 = vmul.f32 -1.442695, %v4410_v16 }
 0x132   :  { %5711 = vst [vmem:[#allocation16_spill] sm:$0xff] %v4412_v23  ;;  %5712 = vst [vmem:[#allocation17_spill] sm:$0xff] %v4414_v24  ;;  %v3565_v7 = vpop.eup %3564  ;;  %v4416_v25 = vpop.f32.mrb[11].mxu0  ;;  %3586 = vrcp.f32 %v1717_v21  ;;  %1104 = vmatmul.mubr.bf16.gmra.mrb[116].mxu0 %v4283_v17  ;;  %1297 = vmatmul.mubr.bf16.gmra.mrb[116].mxu1 %v4283_v17  ;;  %v3131_v20 = vmul.f32 -1.442695, %v4412_v23 }
 0x133   :  { %5713 = vst [vmem:[#allocation18_spill] sm:$0xff] %v4416_v25  ;;  %v3567_v26 = vpop.eup %3566  ;;  %v1718_v27 = vadd.f32 1.0, %v3565_v7  ;;  %v4418_v28 = vpop.f32.mrb[11].mxu1  ;;  %3588 = vrcp.f32 %v1716_v22  ;;  %1113 = vmatprep.mubr.bf16.mxu0 %v4116_v0  ;;  %1306 = vmatprep.mubr.bf16.mxu1 %v4116_v0 }
 0x134   :  { %5714 = vst [vmem:[#allocation19_spill] sm:$0xff] %v4418_v28  ;;  %v3569_v29 = vpop.eup %3568  ;;  %v1719_v30 = vadd.f32 1.0, %v3567_v26 }
 0x135   :  { %v3571_v32 = vpop.eup %3570  ;;  %3590 = vrcp.f32 %v1718_v27  ;;  %v1721_v35 = vadd.f32 1.0, %v3569_v29  ;;  %v4424_v40 = vpop.f32.mrb[12].mxu0 }
 0x136   :  { %v3573_v36 = vpop.eup %3572  ;;  %3592 = vrcp.f32 %v1719_v30  ;;  %v1720_v39 = vadd.f32 1.0, %v3571_v32  ;;  %5715 = vst [vmem:[#allocation20_spill] sm:$0xff] %v4424_v40  ;;  %v4427_v48 = vpop.f32.mrb[12].mxu1 }
 0x137   :  { %v3575_v43 = vpop.eup %3574  ;;  %3594 = vrcp.f32 %v1721_v35  ;;  %v1722_v45 = vadd.f32 1.0, %v3573_v36  ;;  %5716 = vst [vmem:[#allocation21_spill] sm:$0xff] %v4427_v48  ;;  %v4429_v17 = vpop.f32.mrb[13].mxu0  ;;  %v3134_v35 = vmul.f32 -1.442695, %v4418_v28 }
 0x138   :  { %5717 = vst [vmem:[#allocation22_spill] sm:$0xff] %v4429_v17  ;;  %v4431_v51 = vpop.eup %3576  ;;  %3596 = vrcp.f32 %v1720_v39  ;;  %v1723_v52 = vadd.f32 1.0, %v3575_v43  ;;  %v4434_v56 = vpop.f32.mrb[13].mxu1 }
 0x139   :  { %5718 = vst [vmem:[#allocation23_spill] sm:$0xff] %v4434_v56  ;;  %v4436_v60 = vpop.eup %3578  ;;  %3598 = vrcp.f32 %v1722_v45  ;;  %v4439_v62 = vpop.f32.mrb[14].mxu0  ;;  %v3135_v45 = vmul.f32 -1.442695, %v4424_v40 }
 0x13a   :  { %5719 = vst [vmem:[#allocation24_spill] sm:$0xff] %v4439_v62  ;;  %v4441_v63 = vpop.f32.mrb[14].mxu1  ;;  %v4443_v1 = vpop.eup %3580  ;;  %3600 = vrcp.f32 %v1723_v52  ;;  %1114 = vmatmul.mubr.bf16.gmra.mrb[120].mxu0 %v4292_v18  ;;  %1307 = vmatmul.mubr.bf16.gmra.mrb[120].mxu1 %v4292_v18  ;;  %v3133_v18 = vmul.f32 -1.442695, %v4414_v24 }
 0x13b   :  { %5720 = vst [vmem:[#allocation25_spill] sm:$0xff] %v4441_v63  ;;  %v4446_v3 = vpop.f32.mrb[15].mxu0  ;;  %v4448_v4 = vpop.f32.mrb[15].mxu1  ;;  %3602 = vpow2.f32 %v3125_v46  ;;  %1123 = vmatprep.mubr.bf16.mxu0 %v4116_v0  ;;  %1316 = vmatprep.mubr.bf16.mxu1 %v4116_v0  ;;  %v3132_v0 = vmul.f32 -1.442695, %v4416_v25 }
 0x13c   :  { %5721 = vst [vmem:[#allocation26_spill] sm:$0xff] %v4446_v3  ;;  %5722 = vst [vmem:[#allocation27_spill] sm:$0xff] %v4448_v4  ;;  %v4450_v5 = vpop.eup %3582  ;;  %3604 = vpow2.f32 %v3124_v55  ;;  %v3137_v55 = vmul.f32 -1.442695, %v4427_v48 }
 0x13d   :  { %v4454_v8 = vpop.eup %3584  ;;  %3606 = vpow2.f32 %v3126_v61  ;;  %v4466_v21 = vpop.f32.mrb[16].mxu0 }
 0x13e   :  { %v4459_v11 = vpop.eup %3586  ;;  %3608 = vpow2.f32 %v3127_v2  ;;  %5723 = vst [vmem:[#allocation28_spill] sm:$0xff] %v4466_v21  ;;  %v4471_v22 = vpop.f32.mrb[16].mxu1 }
 0x13f   :  { %v4463_v15 = vpop.eup %3588  ;;  %3610 = vpow2.f32 %v3129_v6  ;;  %5724 = vst [vmem:[#allocation29_spill] sm:$0xff] %v4471_v22  ;;  %v4473_v26 = vpop.f32.mrb[17].mxu0  ;;  %v3534_v6 = vld [vmem:[#allocation4 + $0x60] sm:$0xff]  }
 0x140   :  { %v4468_v7 = vpop.eup %3590  ;;  %5725 = vst [vmem:[#allocation30_spill] sm:$0xff] %v4473_v26  ;;  %3612 = vpow2.f32 %v3128_v10  ;;  %v4478_v29 = vpop.f32.mrb[17].mxu1  ;;  %v3535_v10 = vld [vmem:[#allocation4 + $0xe0] sm:$0xff]   ;;  %3279 = vmatprep.subr.bf16.mxu0 %v3534_v6 }
 0x141   :  { %v4475_v27 = vpop.eup %3592  ;;  %5726 = vst [vmem:[#allocation31_spill] sm:$0xff] %v4478_v29  ;;  %v4480_v30 = vpop.f32.mrb[18].mxu0  ;;  %3614 = vpow2.f32 %v3130_v14  ;;  %3391 = vmatprep.subr.bf16.mxu1 %v3535_v10 }
 0x142   :  { %5727 = vst [vmem:[#allocation32_spill] sm:$0xff] %v4480_v30  ;;  %v4482_v32 = vpop.eup %3594  ;;  %v4485_v36 = vpop.f32.mrb[18].mxu1  ;;  %3616 = vpow2.f32 %v3131_v20  ;;  %1124 = vmatmul.mubr.bf16.gmra.mrb[124].mxu0 %v4301_v19  ;;  %1317 = vmatmul.mubr.bf16.gmra.mrb[124].mxu1 %v4301_v19 }
 0x143   :  { %5728 = vst [vmem:[#allocation33_spill] sm:$0xff] %v4485_v36  ;;  %v4487_v39 = vpop.f32.mrb[19].mxu0  ;;  %v4489_v43 = vpop.eup %3596  ;;  %3618 = vpow2.f32 %v3133_v18 }
 0x144   :  { %5729 = vst [vmem:[#allocation34_spill] sm:$0xff] %v4487_v39  ;;  %v4492_v46 = vpop.f32.mrb[19].mxu1  ;;  %v4494_v52 = vpop.eup %3598  ;;  %3620 = vpow2.f32 %v3132_v0  ;;  %v3536_v0 = vld [vmem:[#allocation4 + $0x20] sm:$0xff]  }
 0x145   :  { %5730 = vst [vmem:[#allocation35_spill] sm:$0xff] %v4492_v46  ;;  %5731 = vst [vmem:[#allocation36_spill] sm:$0xff] %v4494_v52  ;;  %v4498_v61 = vpop.eup %3600  ;;  %3622 = vpow2.f32 %v3134_v35  ;;  %v4501_v40 = vpop.f32.mrb[20].mxu0  ;;  %3280 = vmatpush3.bf16.msra.mxu0 %v3536_v0 }
 0x146   :  { %5732 = vst [vmem:[#allocation37_spill] sm:$0xff] %v4498_v61  ;;  %v3603_v2 = vpop.eup %3602  ;;  %3624 = vpow2.f32 %v3135_v45  ;;  %5733 = vst [vmem:[#allocation38_spill] sm:$0xff] %v4501_v40  ;;  %v4503_v48 = vpop.f32.mrb[20].mxu1  ;;  %v3138_v61 = vmul.f32 -1.442695, %v4434_v56 }
 0x147   :  { %v3605_v14 = vpop.eup %3604  ;;  %v1725_v20 = vadd.f32 1.0, %v3603_v2  ;;  %3626 = vpow2.f32 %v3137_v55  ;;  %5734 = vst [vmem:[#allocation39_spill] sm:$0xff] %v4503_v48  ;;  %v4505_v25 = vpop.f32.mrb[21].mxu0  ;;  %v3537_v55 = vld [vmem:[#allocation4 + $0xa0] sm:$0xff]   ;;  %v3142_v56 = vmul.f32 -1.442695, %v4448_v4 }
 0x148   :  { %v3607_v28 = vpop.eup %3606  ;;  %v1724_v18 = vadd.f32 1.0, %v3605_v14  ;;  %5735 = vst [vmem:[#allocation40_spill] sm:$0xff] %v4505_v25  ;;  %v4507_v24 = vpop.f32.mrb[21].mxu1  ;;  %3392 = vmatpush3.bf16.msra.mxu1 %v3537_v55 }
 0x149   :  { %v3609_v19 = vpop.eup %3608  ;;  %3628 = vrcp.f32 %v1725_v20  ;;  %v1726_v35 = vadd.f32 1.0, %v3607_v28  ;;  %5736 = vst [vmem:[#allocation41_spill] sm:$0xff] %v4507_v24  ;;  %v4509_v2 = vpop.f32.mrb[22].mxu0 }
 0x14a   :  { %v3611_v23 = vpop.eup %3610  ;;  %3630 = vrcp.f32 %v1724_v18  ;;  %v1727_v45 = vadd.f32 1.0, %v3609_v19  ;;  %5737 = vst [vmem:[#allocation42_spill] sm:$0xff] %v4509_v2  ;;  %v4511_v16 = vpop.f32.mrb[22].mxu1 }
 0x14b   :  { %5738 = vst [vmem:[#allocation43_spill] sm:$0xff] %v4511_v16  ;;  %v3613_v14 = vpop.eup %3612  ;;  %3632 = vrcp.f32 %v1726_v35  ;;  %v1729_v13 = vadd.f32 1.0, %v3611_v23  ;;  %v4513_v6 = vpop.f32.mrb[23].mxu0 }
 0x14c   :  { %5739 = vst [vmem:[#allocation44_spill] sm:$0xff] %v4513_v6  ;;  %v3615_v10 = vpop.eup %3614  ;;  %3634 = vrcp.f32 %v1727_v45  ;;  %v1728_v20 = vadd.f32 1.0, %v3613_v14  ;;  %v4515_v28 = vpop.f32.mrb[23].mxu1 }
 0x14d   :  { %5740 = vst [vmem:[#allocation45_spill] sm:$0xff] %v4515_v28  ;;  %v3617_v12 = vpop.eup %3616  ;;  %3636 = vrcp.f32 %v1729_v13  ;;  %v1730_v18 = vadd.f32 1.0, %v3615_v10  ;;  %v4517_v58 = vpop.f32.mrb[24].mxu0 }
 0x14e   :  { %v3619_v19 = vpop.eup %3618  ;;  %3638 = vrcp.f32 %v1728_v20  ;;  %v1731_v9 = vadd.f32 1.0, %v3617_v12  ;;  %5741 = vst [vmem:[#allocation46_spill] sm:$0xff] %v4517_v58  ;;  %v4519_v57 = vpop.f32.mrb[24].mxu1  ;;  %v3136_v20 = vmul.f32 -1.442695, %v4429_v17 }
 0x14f   :  { %v3621_v59 = vpop.eup %3620  ;;  %3640 = vrcp.f32 %v1730_v18  ;;  %v1733_v0 = vadd.f32 1.0, %v3619_v19  ;;  %5742 = vst [vmem:[#allocation47_spill] sm:$0xff] %v4519_v57  ;;  %v4521_v45 = vpop.f32.mrb[25].mxu0  ;;  %v3141_v17 = vmul.f32 -1.442695, %v4441_v63 }
 0x150   :  { %v3623_v23 = vpop.eup %3622  ;;  %3642 = vrcp.f32 %v1731_v9  ;;  %v1732_v35 = vadd.f32 1.0, %v3621_v59  ;;  %5743 = vst [vmem:[#allocation48_spill] sm:$0xff] %v4521_v45  ;;  %v4523_v13 = vpop.f32.mrb[25].mxu1 }
 0x151   :  { %v3625_v14 = vpop.eup %3624  ;;  %3644 = vrcp.f32 %v1733_v0  ;;  %v1734_v55 = vadd.f32 1.0, %v3623_v23  ;;  %5744 = vst [vmem:[#allocation49_spill] sm:$0xff] %v4523_v13  ;;  %v4526_v18 = vpop.f32.mrb[26].mxu0  ;;  %v3139_v23 = vmul.f32 -1.442695, %v4439_v62 }
 0x152   :  { %v3627_v10 = vpop.eup %3626  ;;  %3646 = vrcp.f32 %v1732_v35  ;;  %v1735_v12 = vadd.f32 1.0, %v3625_v14  ;;  %5745 = vst [vmem:[#allocation50_spill] sm:$0xff] %v4526_v18  ;;  %v4528_v19 = vpop.f32.mrb[26].mxu1 }
 0x153   :  { %5746 = vst [vmem:[#allocation51_spill] sm:$0xff] %v4528_v19  ;;  %v4530_v9 = vpop.eup %3628  ;;  %3648 = vrcp.f32 %v1734_v55  ;;  %v1737_v59 = vadd.f32 1.0, %v3627_v10  ;;  %v4533_v54 = vpop.f32.mrb[27].mxu0  ;;  %v3140_v55 = vmul.f32 -1.442695, %v4446_v3 }
 0x154   :  { %5747 = vst [vmem:[#allocation52_spill] sm:$0xff] %v4533_v54  ;;  %v4535_v0 = vpop.eup %3630  ;;  %3650 = vrcp.f32 %v1735_v12  ;;  %v4538_v35 = vpop.f32.mrb[27].mxu1 }
 0x155   :  { %5748 = vst [vmem:[#allocation53_spill] sm:$0xff] %v4538_v35  ;;  %v4540_v14 = vpop.eup %3632  ;;  %3652 = vrcp.f32 %v1737_v59  ;;  %v4549_v12 = vpop.f32.mrb[28].mxu0 }
 0x156   :  { %5749 = vst [vmem:[#allocation54_spill] sm:$0xff] %v4540_v14  ;;  %v4543_v52 = vpop.eup %3634  ;;  %3654 = vpow2.f32 %v3136_v20  ;;  %5752 = vst [vmem:[#allocation57_spill] sm:$0xff] %v4549_v12  ;;  %v3143_v14 = vmul.f32 -1.442695, %v4466_v21  ;;  %v4554_v59 = vpop.f32.mrb[28].mxu1 }
 0x157   :  { %5750 = vst [vmem:[#allocation55_spill] sm:$0xff] %v4543_v52  ;;  %v4546_v10 = vpop.eup %3636  ;;  %3656 = vpow2.f32 %v3138_v61  ;;  %5754 = vst [vmem:[#allocation59_spill] sm:$0xff] %v4554_v59  ;;  %v4556_v63 = vpop.f32.mrb[29].mxu0  ;;  %v3145_v20 = vmul.f32 -1.442695, %v4471_v22 }
 0x158   :  { %5751 = vst [vmem:[#allocation56_spill] sm:$0xff] %v4546_v10  ;;  %v4551_v62 = vpop.eup %3638  ;;  %3658 = vpow2.f32 %v3139_v23  ;;  %5755 = vst [vmem:[#allocation60_spill] sm:$0xff] %v4556_v63  ;;  %v4561_v3 = vpop.f32.mrb[29].mxu1  ;;  %v3144_v23 = vmul.f32 -1.442695, %v4473_v26 }
 0x159   :  { %5753 = vst [vmem:[#allocation58_spill] sm:$0xff] %v4551_v62  ;;  %v4558_v52 = vpop.eup %3640  ;;  %3660 = vpow2.f32 %v3141_v17  ;;  %5757 = vst [vmem:[#allocation62_spill] sm:$0xff] %v4561_v3  ;;  %v4563_v61 = vpop.f32.mrb[30].mxu0  ;;  %v3146_v17 = vmul.f32 -1.442695, %v4478_v29 }
 0x15a   :  { %5756 = vst [vmem:[#allocation61_spill] sm:$0xff] %v4558_v52  ;;  %5758 = vst [vmem:[#allocation63_spill] sm:$0xff] %v4563_v61  ;;  %v4565_v4 = vpop.eup %3642  ;;  %3662 = vpow2.f32 %v3140_v55  ;;  %v4568_v62 = vpop.f32.mrb[30].mxu1  ;;  %v3147_v61 = vmul.f32 -1.442695, %v4480_v30 }
 0x15b   :  { %5759 = vst [vmem:[#allocation64_spill] sm:$0xff] %v4565_v4  ;;  %5760 = vst [vmem:[#allocation65_spill] sm:$0xff] %v4568_v62  ;;  %v4570_v21 = vpop.f32.mrb[31].mxu0  ;;  %v4572_v10 = vpop.eup %3644  ;;  %3664 = vpow2.f32 %v3142_v56  ;;  %v3149_v55 = vmul.f32 -1.442695, %v4485_v36 }
 0x15c   :  { %5761 = vst [vmem:[#allocation66_spill] sm:$0xff] %v4570_v21  ;;  %v4575_v52 = vpop.f32.mrb[31].mxu1  ;;  %v4577_v22 = vpop.eup %3646  ;;  %3666 = vpow2.f32 %v3143_v14  ;;  %v3148_v21 = vmul.f32 -1.442695, %v4487_v39 }
 0x15d   :  { %5762 = vst [vmem:[#allocation67_spill] sm:$0xff] %v4575_v52  ;;  %5763 = vst [vmem:[#allocation68_spill] sm:$0xff] %v4577_v22  ;;  %v4580_v4 = vpop.eup %3648  ;;  %3668 = vpow2.f32 %v3145_v20  ;;  %v4588_v29 = vpop.f32.mrb[32].mxu0 }
 0x15e   :  { %5764 = vst [vmem:[#allocation69_spill] sm:$0xff] %v4580_v4  ;;  %v4583_v26 = vpop.eup %3650  ;;  %3670 = vpow2.f32 %v3144_v23  ;;  %5767 = vst [vmem:[#allocation72_spill] sm:$0xff] %v4588_v29  ;;  %v4590_v14 = vpop.f32.mrb[32].mxu1 }
 0x15f   :  { %5765 = vst [vmem:[#allocation70_spill] sm:$0xff] %v4583_v26  ;;  %v4586_v56 = vpop.eup %3652  ;;  %3672 = vpow2.f32 %v3146_v17  ;;  %5768 = vst [vmem:[#allocation73_spill] sm:$0xff] %v4590_v14  ;;  %v4592_v30 = vpop.f32.mrb[33].mxu0 }
 0x160   :  { %5766 = vst [vmem:[#allocation71_spill] sm:$0xff] %v4586_v56  ;;  %v3655_v52 = vpop.eup %3654  ;;  %3674 = vpow2.f32 %v3147_v61  ;;  %5769 = vst [vmem:[#allocation74_spill] sm:$0xff] %v4592_v30  ;;  %v4594_v36 = vpop.f32.mrb[33].mxu1 }
 0x161   :  { %v3657_v4 = vpop.eup %3656  ;;  %v1736_v20 = vadd.f32 1.0, %v3655_v52  ;;  %3676 = vpow2.f32 %v3149_v55  ;;  %5770 = vst [vmem:[#allocation75_spill] sm:$0xff] %v4594_v36  ;;  %v4596_v39 = vpop.f32.mrb[34].mxu0 }
 0x162   :  { %v3659_v26 = vpop.eup %3658  ;;  %v1738_v23 = vadd.f32 1.0, %v3657_v4  ;;  %3678 = vpow2.f32 %v3148_v21  ;;  %5771 = vst [vmem:[#allocation76_spill] sm:$0xff] %v4596_v39  ;;  %v4598_v56 = vpop.f32.mrb[34].mxu1 }
 0x163   :  { %5772 = vst [vmem:[#allocation77_spill] sm:$0xff] %v4598_v56  ;;  %v3661_v17 = vpop.eup %3660  ;;  %3680 = vrcp.f32 %v1736_v20  ;;  %v1739_v29 = vadd.f32 1.0, %v3659_v26  ;;  %v4600_v61 = vpop.f32.mrb[35].mxu0 }
 0x164   :  { %5773 = vst [vmem:[#allocation78_spill] sm:$0xff] %v4600_v61  ;;  %v3663_v14 = vpop.eup %3662  ;;  %3682 = vrcp.f32 %v1738_v23  ;;  %v1741_v30 = vadd.f32 1.0, %v3661_v17  ;;  %v4602_v22 = vpop.f32.mrb[35].mxu1 }
 0x165   :  { %5774 = vst [vmem:[#allocation79_spill] sm:$0xff] %v4602_v22  ;;  %v3665_v52 = vpop.eup %3664  ;;  %3684 = vrcp.f32 %v1739_v29  ;;  %v1740_v55 = vadd.f32 1.0, %v3663_v14  ;;  %v4604_v56 = vpop.f32.mrb[36].mxu0 }
 0x166   :  { %v3667_v36 = vpop.eup %3666  ;;  %3686 = vrcp.f32 %v1741_v30  ;;  %v1742_v4 = vadd.f32 1.0, %v3665_v52  ;;  %5775 = vst [vmem:[#allocation80_spill] sm:$0xff] %v4604_v56  ;;  %v4606_v61 = vpop.f32.mrb[36].mxu1 }
 0x167   :  { %v3669_v21 = vpop.eup %3668  ;;  %3688 = vrcp.f32 %v1740_v55  ;;  %v1743_v39 = vadd.f32 1.0, %v3667_v36  ;;  %5776 = vst [vmem:[#allocation81_spill] sm:$0xff] %v4606_v61  ;;  %v4608_v23 = vpop.f32.mrb[37].mxu0 }
 0x168   :  { %v3671_v20 = vpop.eup %3670  ;;  %3690 = vrcp.f32 %v1742_v4  ;;  %v1745_v26 = vadd.f32 1.0, %v3669_v21  ;;  %5777 = vst [vmem:[#allocation82_spill] sm:$0xff] %v4608_v23  ;;  %v4610_v29 = vpop.f32.mrb[37].mxu1 }
 0x169   :  { %v3673_v17 = vpop.eup %3672  ;;  %3692 = vrcp.f32 %v1743_v39  ;;  %v1744_v22 = vadd.f32 1.0, %v3671_v20  ;;  %5778 = vst [vmem:[#allocation83_spill] sm:$0xff] %v4610_v29  ;;  %v4612_v52 = vpop.f32.mrb[38].mxu0  ;;  %v3150_v39 = vmul.f32 -1.442695, %v4492_v46 }
 0x16a   :  { %v3675_v14 = vpop.eup %3674  ;;  %3694 = vrcp.f32 %v1745_v26  ;;  %v1746_v30 = vadd.f32 1.0, %v3673_v17  ;;  %5779 = vst [vmem:[#allocation84_spill] sm:$0xff] %v4612_v52  ;;  %v4614_v36 = vpop.f32.mrb[38].mxu1  ;;  %v3151_v17 = vmul.f32 -1.442695, %v4501_v40 }
 0x16b   :  { %5780 = vst [vmem:[#allocation85_spill] sm:$0xff] %v4614_v36  ;;  %v3677_v55 = vpop.eup %3676  ;;  %3696 = vrcp.f32 %v1744_v22  ;;  %v1747_v4 = vadd.f32 1.0, %v3675_v14  ;;  %v4616_v21 = vpop.f32.mrb[39].mxu0  ;;  %v3153_v22 = vmul.f32 -1.442695, %v4503_v48 }
 0x16c   :  { %5781 = vst [vmem:[#allocation86_spill] sm:$0xff] %v4616_v21  ;;  %v3679_v61 = vpop.eup %3678  ;;  %3698 = vrcp.f32 %v1746_v30  ;;  %v1749_v23 = vadd.f32 1.0, %v3677_v55  ;;  %v4619_v20 = vpop.f32.mrb[39].mxu1  ;;  %v3152_v30 = vmul.f32 -1.442695, %v4505_v25 }
 0x16d   :  { %5782 = vst [vmem:[#allocation87_spill] sm:$0xff] %v4619_v20  ;;  %v4621_v29 = vpop.eup %3680  ;;  %3700 = vrcp.f32 %v1747_v4  ;;  %v1748_v26 = vadd.f32 1.0, %v3679_v61  ;;  %v4630_v55 = vpop.f32.mrb[40].mxu0  ;;  %v3154_v4 = vmul.f32 -1.442695, %v4507_v24 }
 0x16e   :  { %5783 = vst [vmem:[#allocation88_spill] sm:$0xff] %v4621_v29  ;;  %v4624_v52 = vpop.eup %3682  ;;  %3702 = vrcp.f32 %v1749_v23  ;;  %5785 = vst [vmem:[#allocation90_spill] sm:$0xff] %v4630_v55  ;;  %v4635_v61 = vpop.f32.mrb[40].mxu1  ;;  %v3539_v23 = vld [vmem:[#allocation4 + $0xe8] sm:$0xff]  }
 0x16f   :  { %5784 = vst [vmem:[#allocation89_spill] sm:$0xff] %v4624_v52  ;;  %v4627_v14 = vpop.eup %3684  ;;  %3704 = vrcp.f32 %v1748_v26  ;;  %5786 = vst [vmem:[#allocation91_spill] sm:$0xff] %v4635_v61  ;;  %v4637_v40 = vpop.f32.mrb[41].mxu0  ;;  %v3538_v52 = vld [vmem:[#allocation4 + $0x68] sm:$0xff]   ;;  %v3155_v26 = vmul.f32 -1.442695, %v4509_v2  ;;  %3393 = vmatprep.subr.bf16.mxu1 %v3539_v23 }
 0x170   :  { %v4632_v46 = vpop.eup %3686  ;;  %3706 = vpow2.f32 %v3150_v39  ;;  %5787 = vst [vmem:[#allocation92_spill] sm:$0xff] %v4637_v40  ;;  %v4642_v48 = vpop.f32.mrb[41].mxu1  ;;  %v3157_v39 = vmul.f32 -1.442695, %v4511_v16  ;;  %3281 = vmatprep.subr.bf16.mxu0 %v3538_v52  ;;  %v3541_v16 = vld [vmem:[#allocation4 + $0xa8] sm:$0xff]  }
 0x171   :  { %v4639_v29 = vpop.eup %3688  ;;  %3708 = vpow2.f32 %v3151_v17  ;;  %5788 = vst [vmem:[#allocation93_spill] sm:$0xff] %v4642_v48  ;;  %v4644_v25 = vpop.f32.mrb[42].mxu0  ;;  %v3156_v17 = vmul.f32 -1.442695, %v4513_v6  ;;  %v3540_v48 = vld [vmem:[#allocation4 + $0x28] sm:$0xff]   ;;  %3394 = vmatpush3.bf16.msra.mxu1 %v3541_v16 }
 0x172   :  { %5789 = vst [vmem:[#allocation94_spill] sm:$0xff] %v4644_v25  ;;  %v4646_v55 = vpop.eup %3690  ;;  %3710 = vpow2.f32 %v3153_v22  ;;  %v4649_v24 = vpop.f32.mrb[42].mxu1  ;;  %v3158_v22 = vmul.f32 -1.442695, %v4515_v28  ;;  %v3159_v52 = vmul.f32 -1.442695, %v4517_v58  ;;  %3282 = vmatpush3.bf16.msra.mxu0 %v3540_v48 }
 0x173   :  { %5790 = vst [vmem:[#allocation95_spill] sm:$0xff] %v4646_v55  ;;  %5791 = vst [vmem:[#allocation96_spill] sm:$0xff] %v4649_v24  ;;  %v4651_v61 = vpop.f32.mrb[43].mxu0  ;;  %v4653_v40 = vpop.eup %3692  ;;  %3712 = vpow2.f32 %v3152_v30  ;;  %v3161_v30 = vmul.f32 -1.442695, %v4519_v57 }
 0x174   :  { %5792 = vst [vmem:[#allocation97_spill] sm:$0xff] %v4651_v61  ;;  %v4656_v2 = vpop.f32.mrb[43].mxu1  ;;  %v4658_v25 = vpop.eup %3694  ;;  %3714 = vpow2.f32 %v3154_v4  ;;  %v3160_v4 = vmul.f32 -1.442695, %v4521_v45 }
 0x175   :  { %5793 = vst [vmem:[#allocation98_spill] sm:$0xff] %v4656_v2  ;;  %5794 = vst [vmem:[#allocation99_spill] sm:$0xff] %v4658_v25  ;;  %v4661_v55 = vpop.eup %3696  ;;  %3716 = vpow2.f32 %v3155_v26  ;;  %v4670_v25 = vpop.f32.mrb[44].mxu0  ;;  %v3162_v26 = vmul.f32 -1.442695, %v4523_v13 }
 0x176   :  { %v4664_v23 = vpop.eup %3698  ;;  %3718 = vpow2.f32 %v3157_v39  ;;  %5796 = vst [vmem:[#allocation101_spill] sm:$0xff] %v4670_v25  ;;  %v4675_v58 = vpop.f32.mrb[44].mxu1 }
 0x177   :  { %v4667_v6 = vpop.eup %3700  ;;  %3720 = vpow2.f32 %v3156_v17  ;;  %5798 = vst [vmem:[#allocation103_spill] sm:$0xff] %v4675_v58  ;;  %v4677_v48 = vpop.f32.mrb[45].mxu0 }
 0x178   :  { %5795 = vst [vmem:[#allocation100_spill] sm:$0xff] %v4667_v6  ;;  %v4672_v28 = vpop.eup %3702  ;;  %3722 = vpow2.f32 %v3158_v22  ;;  %5799 = vst [vmem:[#allocation104_spill] sm:$0xff] %v4677_v48  ;;  %v4681_v16 = vpop.f32.mrb[45].mxu1 }
 0x179   :  { %5797 = vst [vmem:[#allocation102_spill] sm:$0xff] %v4672_v28  ;;  %v4679_v39 = vpop.eup %3704  ;;  %3724 = vpow2.f32 %v3159_v52  ;;  %5801 = vst [vmem:[#allocation106_spill] sm:$0xff] %v4681_v16  ;;  %v4683_v57 = vpop.f32.mrb[46].mxu0 }
 0x17a   :  { %5800 = vst [vmem:[#allocation105_spill] sm:$0xff] %v4679_v39  ;;  %5802 = vst [vmem:[#allocation107_spill] sm:$0xff] %v4683_v57  ;;  %v3707_v17 = vpop.eup %3706  ;;  %3726 = vpow2.f32 %v3161_v30  ;;  %v4685_v45 = vpop.f32.mrb[46].mxu1 }
 0x17b   :  { %5803 = vst [vmem:[#allocation108_spill] sm:$0xff] %v4685_v45  ;;  %v4687_v25 = vpop.f32.mrb[47].mxu0  ;;  %v3709_v22 = vpop.eup %3708  ;;  %v1750_v28 = vadd.f32 1.0, %v3707_v17  ;;  %3728 = vpow2.f32 %v3160_v4 }
 0x17c   :  { %5804 = vst [vmem:[#allocation109_spill] sm:$0xff] %v4687_v25  ;;  %v4689_v13 = vpop.f32.mrb[47].mxu1  ;;  %v3711_v58 = vpop.eup %3710  ;;  %v1751_v48 = vadd.f32 1.0, %v3709_v22  ;;  %3730 = vpow2.f32 %v3162_v26 }
 0x17d   :  { %5805 = vst [vmem:[#allocation110_spill] sm:$0xff] %v4689_v13  ;;  %v3713_v39 = vpop.eup %3712  ;;  %3732 = vrcp.f32 %v1750_v28  ;;  %v1753_v52 = vadd.f32 1.0, %v3711_v58  ;;  %v4691_v45 = vpop.f32.mrb[48].mxu0 }
 0x17e   :  { %v3715_v16 = vpop.eup %3714  ;;  %3734 = vrcp.f32 %v1751_v48  ;;  %v1752_v57 = vadd.f32 1.0, %v3713_v39  ;;  %5806 = vst [vmem:[#allocation111_spill] sm:$0xff] %v4691_v45  ;;  %v4693_v4 = vpop.f32.mrb[48].mxu1 }
 0x17f   :  { %v3717_v6 = vpop.eup %3716  ;;  %3736 = vrcp.f32 %v1753_v52  ;;  %v1754_v30 = vadd.f32 1.0, %v3715_v16  ;;  %5807 = vst [vmem:[#allocation112_spill] sm:$0xff] %v4693_v4  ;;  %v4695_v13 = vpop.f32.mrb[49].mxu0 }
 0x180   :  { %v3719_v25 = vpop.eup %3718  ;;  %3738 = vrcp.f32 %v1752_v57  ;;  %v1755_v17 = vadd.f32 1.0, %v3717_v6  ;;  %5808 = vst [vmem:[#allocation113_spill] sm:$0xff] %v4695_v13  ;;  %v4697_v28 = vpop.f32.mrb[49].mxu1  ;;  %v4707_v13 = vmul.f32 %v4431_v51, %v4351_v31  ;;  %v4721_v31 = vmul.f32 %v4450_v5, %v4360_v37 }
 0x181   :  { %v3721_v22 = vpop.eup %3720  ;;  %3740 = vrcp.f32 %v1754_v30  ;;  %v1757_v26 = vadd.f32 1.0, %v3719_v25  ;;  %5809 = vst [vmem:[#allocation114_spill] sm:$0xff] %v4697_v28  ;;  %v4699_v39 = vpop.f32.mrb[50].mxu0  ;;  %v4737_v37 = vmul.f32 %v4459_v11, %v4366_v41  ;;  %v4741_v5 = vmul.f32 %v4463_v15, %v4368_v42 }
 0x182   :  { %v3723_v58 = vpop.eup %3722  ;;  %3742 = vrcp.f32 %v1755_v17  ;;  %v1756_v48 = vadd.f32 1.0, %v3721_v22  ;;  %5810 = vst [vmem:[#allocation115_spill] sm:$0xff] %v4699_v39  ;;  %v4701_v16 = vpop.f32.mrb[50].mxu1  ;;  %v4713_v22 = vmul.f32 %v4436_v60, %v4354_v33  ;;  %v4728_v33 = vmul.f32 %v4454_v8, %v4362_v38 }
 0x183   :  { %5811 = vst [vmem:[#allocation116_spill] sm:$0xff] %v4701_v16  ;;  %v3725_v52 = vpop.eup %3724  ;;  %3744 = vrcp.f32 %v1757_v26  ;;  %v1758_v57 = vadd.f32 1.0, %v3723_v58  ;;  %v4703_v6 = vpop.f32.mrb[51].mxu0  ;;  %v4717_v26 = vmul.f32 %v4443_v1, %v4356_v34  ;;  %v3165_v60 = vmul.f32 -1.442695, %v4528_v19 }
 0x184   :  { %5812 = vst [vmem:[#allocation117_spill] sm:$0xff] %v4703_v6  ;;  %v3727_v4 = vpop.eup %3726  ;;  %3746 = vrcp.f32 %v1756_v48  ;;  %v1759_v25 = vadd.f32 1.0, %v3725_v52  ;;  %v4709_v30 = vpop.f32.mrb[51].mxu1  ;;  %v3163_v48 = vmul.f32 -1.442695, %v4526_v18  ;;  %v4756_v41 = vmul.f32 %v4475_v27, %v4379_v47  ;;  %v3544_v27 = vld [vmem:[#allocation4 + $0x30] sm:$0xff]  }
 0x185   :  { %5813 = vst [vmem:[#allocation118_spill] sm:$0xff] %v4709_v30  ;;  %v3729_v17 = vpop.eup %3728  ;;  %3748 = vrcp.f32 %v1758_v57  ;;  %v1761_v58 = vadd.f32 1.0, %v3727_v4  ;;  %v4731_v1 = vpop.f32.mrb[52].mxu0  ;;  %v3164_v38 = vmul.f32 -1.442695, %v4533_v54  ;;  %v4767_v54 = vmul.f32 %v4482_v32, %v4382_v49  ;;  %v5826_v49 = vld [vmem:[#allocation8_spill] sm:$0xff] }
 0x186   :  { %v3731_v6 = vpop.eup %3730  ;;  %3750 = vrcp.f32 %v1759_v25  ;;  %v1760_v51 = vadd.f32 1.0, %v3729_v17  ;;  %5815 = vst [vmem:[#allocation120_spill] sm:$0xff] %v4731_v1  ;;  %v4744_v8 = vpop.f32.mrb[52].mxu1  ;;  %v3543_v25 = vld [vmem:[#allocation4 + $0xf0] sm:$0xff]   ;;  %v3166_v42 = vmul.f32 -1.442695, %v4538_v35 }
 0x187   :  { %v4724_v52 = vpop.eup %3732  ;;  %3752 = vrcp.f32 %v1761_v58  ;;  %v1762_v34 = vadd.f32 1.0, %v3731_v6  ;;  %5817 = vst [vmem:[#allocation122_spill] sm:$0xff] %v4744_v8  ;;  %v4746_v57 = vpop.f32.mrb[53].mxu0  ;;  %v3542_v6 = vld [vmem:[#allocation4 + $0x70] sm:$0xff]   ;;  %v4752_v58 = vmul.f32 %v4468_v7, %v4371_v44  ;;  %v4771_v44 = vmul.f32 %v4489_v43, %v4384_v50  ;;  %3395 = vmatprep.subr.bf16.mxu1 %v3543_v25  ;;  %v5825_v35 = vld [vmem:[#allocation36_spill] sm:$0xff]  ;;  %v5827_v32 = vld [vmem:[#allocation37_spill] sm:$0xff] }
 0x188   :  { %5814 = vst [vmem:[#allocation119_spill] sm:$0xff] %v4724_v52  ;;  %v4733_v4 = vpop.eup %3734  ;;  %3754 = vrcp.f32 %v1760_v51  ;;  %5818 = vst [vmem:[#allocation123_spill] sm:$0xff] %v4746_v57  ;;  %v4759_v11 = vpop.f32.mrb[53].mxu1  ;;  %v3167_v47 = vmul.f32 -1.442695, %v4549_v12  ;;  %3283 = vmatprep.subr.bf16.mxu0 %v3542_v6  ;;  %v4780_v19 = vmul.f32 %v5825_v35, %v4388_v53  ;;  %v4784_v18 = vmul.f32 %v5827_v32, %v5826_v49  ;;  %v3545_v43 = vld [vmem:[#allocation4 + $0xb0] sm:$0xff]  }
 0x189   :  { %5816 = vst [vmem:[#allocation121_spill] sm:$0xff] %v4733_v4  ;;  %v4748_v17 = vpop.eup %3736  ;;  %3756 = vrcp.f32 %v1762_v34  ;;  %5820 = vst [vmem:[#allocation125_spill] sm:$0xff] %v4759_v11  ;;  %v4761_v15 = vpop.f32.mrb[54].mxu0  ;;  %v3169_v50 = vmul.f32 -1.442695, %v4554_v59  ;;  %v5831_v12 = vld [vmem:[#allocation9_spill] sm:$0xff]  ;;  %3284 = vmatpush3.bf16.msra.mxu0 %v3544_v27  ;;  %3396 = vmatpush3.bf16.msra.mxu1 %v3545_v43 }
 0x18a   :  { %5819 = vst [vmem:[#allocation124_spill] sm:$0xff] %v4748_v17  ;;  %5821 = vst [vmem:[#allocation126_spill] sm:$0xff] %v4761_v15  ;;  %v4763_v51 = vpop.eup %3738  ;;  %3758 = vpow2.f32 %v3163_v48  ;;  %v4774_v7 = vpop.f32.mrb[54].mxu1  ;;  %v5832_v53 = vld [vmem:[#allocation10_spill] sm:$0xff]  ;;  %v5834_v32 = vld [vmem:[#allocation11_spill] sm:$0xff] }
 0x18b   :  { %5822 = vst [vmem:[#allocation127_spill] sm:$0xff] %v4763_v51  ;;  %5823 = vst [vmem:[#allocation128_spill] sm:$0xff] %v4774_v7  ;;  %v4776_v34 = vpop.eup %3740  ;;  %3760 = vpow2.f32 %v3165_v60  ;;  %v4787_v48 = vpop.f32.mrb[55].mxu0  ;;  %v4799_v35 = vmul.f32 %v4535_v0, %v5832_v53  ;;  %v3168_v60 = vmul.f32 -1.442695, %v4556_v63  ;;  %v5835_v59 = vld [vmem:[#allocation54_spill] sm:$0xff] }
 0x18c   :  { %5824 = vst [vmem:[#allocation129_spill] sm:$0xff] %v4776_v34  ;;  %5828 = vst [vmem:[#allocation36_spill] sm:$0xff] %v4787_v48  ;;  %v4789_v6 = vpop.f32.mrb[55].mxu1  ;;  %v4791_v25 = vpop.eup %3742  ;;  %v4795_v34 = vmul.f32 %v4530_v9, %v5831_v12  ;;  %3762 = vpow2.f32 %v3164_v38  ;;  %v4806_v48 = vmul.f32 %v5835_v59, %v5834_v32  ;;  %v3170_v9 = vmul.f32 -1.442695, %v4561_v3  ;;  %v5839_v12 = vld [vmem:[#allocation13_spill] sm:$0xff] }
 0x18d   :  { %5829 = vst [vmem:[#allocation8_spill] sm:$0xff] %v4789_v6  ;;  %5830 = vst [vmem:[#allocation37_spill] sm:$0xff] %v4791_v25  ;;  %v4802_v49 = vpop.eup %3744  ;;  %v5836_v6 = vld [vmem:[#allocation12_spill] sm:$0xff]  ;;  %v5837_v25 = vld [vmem:[#allocation55_spill] sm:$0xff]  ;;  %3764 = vpow2.f32 %v3166_v42  ;;  %v4845_v51 = vpop.f32.mrb[56].mxu1 }
 0x18e   :  { %5833 = vst [vmem:[#allocation9_spill] sm:$0xff] %v4802_v49  ;;  %v4810_v7 = vmul.f32 %v5837_v25, %v5836_v6  ;;  %v4813_v0 = vpop.eup %3746  ;;  %v5840_v38 = vld [vmem:[#allocation56_spill] sm:$0xff]  ;;  %v5841_v27 = vld [vmem:[#allocation14_spill] sm:$0xff]  ;;  %3766 = vpow2.f32 %v3167_v47  ;;  %v5843_v59 = vld [vmem:[#allocation63_spill] sm:$0xff] }
 0x18f   :  { %5838 = vst [vmem:[#allocation10_spill] sm:$0xff] %v4813_v0  ;;  %v4817_v53 = vmul.f32 %v5840_v38, %v5839_v12  ;;  %v5842_v63 = vld [vmem:[#allocation58_spill] sm:$0xff]  ;;  %v3171_v32 = vmul.f32 -1.442695, %v5843_v59  ;;  %v4824_v15 = vpop.eup %3748  ;;  %v5845_v6 = vld [vmem:[#allocation15_spill] sm:$0xff]  ;;  %v5846_v42 = vld [vmem:[#allocation61_spill] sm:$0xff]  ;;  %3768 = vpow2.f32 %v3169_v50 }
 0x190   :  { %v4821_v49 = vmul.f32 %v5842_v63, %v5841_v27  ;;  %5844 = vst [vmem:[#allocation11_spill] sm:$0xff] %v4824_v15  ;;  %v4828_v25 = vmul.f32 %v5846_v42, %v5845_v6  ;;  %v5848_v43 = vld [vmem:[#allocation16_spill] sm:$0xff]  ;;  %v3173_v12 = vmul.f32 -1.442695, %v4568_v62  ;;  %v4835_v38 = vpop.f32.mrb[56].mxu0  ;;  %v4837_v63 = vpop.eup %3750  ;;  %v5853_v47 = vld [vmem:[#allocation17_spill] sm:$0xff]  ;;  %3770 = vpow2.f32 %v3168_v60 }
 0x191   :  { %v5849_v3 = vld [vmem:[#allocation64_spill] sm:$0xff]  ;;  %5851 = vst [vmem:[#allocation55_spill] sm:$0xff] %v4835_v38  ;;  %5852 = vst [vmem:[#allocation13_spill] sm:$0xff] %v4837_v63  ;;  %v4841_v27 = vmul.f32 %v4572_v10, %v5853_v47  ;;  %v5855_v59 = vld [vmem:[#allocation66_spill] sm:$0xff]  ;;  %v4849_v50 = vpop.eup %3752  ;;  %3772 = vpow2.f32 %v3170_v9  ;;  %v4859_v60 = vpop.f32.mrb[57].mxu1 }
 0x192   :  { %5847 = vst [vmem:[#allocation54_spill] sm:$0xff] %v4828_v25  ;;  %v4832_v0 = vmul.f32 %v5849_v3, %v5848_v43  ;;  %v3172_v15 = vmul.f32 -1.442695, %v5855_v59  ;;  %v5856_v6 = vld [vmem:[#allocation67_spill] sm:$0xff]  ;;  %5857 = vst [vmem:[#allocation14_spill] sm:$0xff] %v4845_v51  ;;  %v4847_v3 = vpop.f32.mrb[57].mxu0  ;;  %3774 = vpow2.f32 %v3171_v32 }
 0x193   :  { %5854 = vst [vmem:[#allocation56_spill] sm:$0xff] %v4841_v27  ;;  %v3174_v42 = vmul.f32 -1.442695, %v5856_v6  ;;  %5858 = vst [vmem:[#allocation58_spill] sm:$0xff] %v4847_v3  ;;  %v5860_v43 = vld [vmem:[#allocation18_spill] sm:$0xff]  ;;  %v5861_v62 = vld [vmem:[#allocation68_spill] sm:$0xff]  ;;  %v4863_v6 = vpop.eup %3754  ;;  %3776 = vpow2.f32 %v3173_v12 }
 0x194   :  { %5850 = vst [vmem:[#allocation12_spill] sm:$0xff] %v4832_v0  ;;  %5859 = vst [vmem:[#allocation15_spill] sm:$0xff] %v4849_v50  ;;  %v4853_v38 = vmul.f32 %v5861_v62, %v5860_v43  ;;  %v5863_v63 = vld [vmem:[#allocation72_spill] sm:$0xff]  ;;  %v5864_v10 = vld [vmem:[#allocation73_spill] sm:$0xff]  ;;  %v4861_v59 = vpop.f32.mrb[58].mxu0  ;;  %3778 = vpow2.f32 %v3172_v15 }
 0x195   :  { %v3175_v11 = vmul.f32 -1.442695, %v5863_v63  ;;  %v4857_v47 = vmul.f32 -1.442695, %v5864_v10  ;;  %5865 = vst [vmem:[#allocation16_spill] sm:$0xff] %v4859_v60  ;;  %5866 = vst [vmem:[#allocation64_spill] sm:$0xff] %v4861_v59  ;;  %v4879_v60 = vpop.eup %3756  ;;  %3780 = vpow2.f32 %v3174_v42 }
 0x196   :  { %5862 = vst [vmem:[#allocation61_spill] sm:$0xff] %v4853_v38  ;;  %5867 = vst [vmem:[#allocation17_spill] sm:$0xff] %v4863_v6  ;;  %v5868_v51 = vld [vmem:[#allocation19_spill] sm:$0xff]  ;;  %v5869_v3 = vld [vmem:[#allocation69_spill] sm:$0xff]  ;;  %v4875_v63 = vpop.f32.mrb[58].mxu1  ;;  %v4877_v10 = vpop.f32.mrb[59].mxu0 }
 0x197   :  { %v4867_v17 = vmul.f32 %v5869_v3, %v5868_v51  ;;  %v5871_v50 = vld [vmem:[#allocation74_spill] sm:$0xff]  ;;  %v5872_v9 = vld [vmem:[#allocation75_spill] sm:$0xff]  ;;  %5873 = vst [vmem:[#allocation68_spill] sm:$0xff] %v4875_v63  ;;  %5874 = vst [vmem:[#allocation19_spill] sm:$0xff] %v4877_v10  ;;  %v4891_v8 = vpop.f32.mrb[59].mxu1  ;;  %3782 = vpow2.f32 %v3175_v11 }
 0x198   :  { %v4870_v62 = vmul.f32 -1.442695, %v5871_v50  ;;  %v4873_v43 = vmul.f32 -1.442695, %v5872_v9  ;;  %5875 = vst [vmem:[#allocation69_spill] sm:$0xff] %v4879_v60  ;;  %v5876_v59 = vld [vmem:[#allocation20_spill] sm:$0xff]  ;;  %v3759_v9 = vpop.eup %3758 }
 0x199   :  { %5870 = vst [vmem:[#allocation18_spill] sm:$0xff] %v4867_v17  ;;  %v5877_v57 = vld [vmem:[#allocation70_spill] sm:$0xff]  ;;  %v5879_v51 = vld [vmem:[#allocation76_spill] sm:$0xff]  ;;  %v5880_v32 = vld [vmem:[#allocation77_spill] sm:$0xff]  ;;  %v1763_v12 = vadd.f32 1.0, %v3759_v9 }
 0x19a   :  { %v4883_v6 = vmul.f32 %v5877_v57, %v5876_v59  ;;  %v4886_v3 = vmul.f32 -1.442695, %v5879_v51  ;;  %v4889_v50 = vmul.f32 -1.442695, %v5880_v32  ;;  %5881 = vst [vmem:[#allocation70_spill] sm:$0xff] %v4891_v8  ;;  %v5882_v63 = vld [vmem:[#allocation78_spill] sm:$0xff]  ;;  %v3761_v59 = vpop.eup %3760 }
 0x19b   :  { %v4894_v4 = vmul.f32 -1.442695, %v5882_v63  ;;  %v5883_v10 = vld [vmem:[#allocation79_spill] sm:$0xff]  ;;  %v4900_v57 = vmul.f32 -1.442695, %v4604_v56  ;;  %v5884_v51 = vld [vmem:[#allocation81_spill] sm:$0xff]  ;;  %v3763_v8 = vpop.eup %3762  ;;  %3784 = vrcp.f32 %v1763_v12 }
 0x19c   :  { %5878 = vst [vmem:[#allocation20_spill] sm:$0xff] %v4883_v6  ;;  %v4897_v60 = vmul.f32 -1.442695, %v5883_v10  ;;  %v4903_v6 = vmul.f32 -1.442695, %v5884_v51  ;;  %v5885_v32 = vld [vmem:[#allocation82_spill] sm:$0xff]  ;;  %v3765_v56 = vpop.eup %3764 }
 0x19d   :  { %v4906_v1 = vmul.f32 -1.442695, %v5885_v32  ;;  %v1765_v15 = vadd.f32 1.0, %v3761_v59  ;;  %v5886_v63 = vld [vmem:[#allocation83_spill] sm:$0xff]  ;;  %v5887_v10 = vld [vmem:[#allocation84_spill] sm:$0xff]  ;;  %v1764_v17 = vadd.f32 1.0, %v3763_v8  ;;  %v3767_v51 = vpop.eup %3766 }
 0x19e   :  { %v4909_v52 = vmul.f32 -1.442695, %v5886_v63  ;;  %v4912_v30 = vmul.f32 -1.442695, %v5887_v10  ;;  %v4915_v42 = vmul.f32 -1.442695, %v4614_v36  ;;  %v3769_v36 = vpop.eup %3768 }
 0x19f   :  { %v4918_v9 = vmul.f32 -1.442695, %v4616_v21  ;;  %v4920_v32 = vpop.f32.mrb[60].mxu0  ;;  %v5890_v59 = vld [vmem:[#allocation21_spill] sm:$0xff]  ;;  %v5891_v11 = vld [vmem:[#allocation71_spill] sm:$0xff]  ;;  %3786 = vrcp.f32 %v1765_v15  ;;  %v1766_v63 = vadd.f32 1.0, %v3765_v56  ;;  %v3771_v56 = vpop.eup %3770 }
 0x1a0   :  { %5889 = vst [vmem:[#allocation131_spill] sm:$0xff] %v4920_v32  ;;  %v4924_v38 = vmul.f32 %v5891_v11, %v5890_v59  ;;  %v4927_v10 = vmul.f32 -1.442695, %v4619_v20  ;;  %v4929_v12 = vpop.f32.mrb[60].mxu1  ;;  %v4931_v8 = vpop.f32.mrb[61].mxu0  ;;  %v5895_v27 = vld [vmem:[#allocation22_spill] sm:$0xff]  ;;  %3788 = vrcp.f32 %v1764_v17 }
 0x1a1   :  { %5888 = vst [vmem:[#allocation130_spill] sm:$0xff] %v4918_v9  ;;  %5893 = vst [vmem:[#allocation71_spill] sm:$0xff] %v4929_v12  ;;  %v5896_v21 = vld [vmem:[#allocation88_spill] sm:$0xff]  ;;  %v5898_v32 = vld [vmem:[#allocation23_spill] sm:$0xff]  ;;  %v1767_v59 = vadd.f32 1.0, %v3767_v51  ;;  %v4941_v15 = vpop.f32.mrb[61].mxu1  ;;  %3790 = vrcp.f32 %v1766_v63 }
 0x1a2   :  { %5892 = vst [vmem:[#allocation21_spill] sm:$0xff] %v4927_v10  ;;  %5894 = vst [vmem:[#allocation132_spill] sm:$0xff] %v4931_v8  ;;  %v4935_v9 = vmul.f32 %v5896_v21, %v5895_v27  ;;  %v5899_v0 = vld [vmem:[#allocation89_spill] sm:$0xff]  ;;  %v5902_v11 = vld [vmem:[#allocation24_spill] sm:$0xff]  ;;  %v1769_v8 = vadd.f32 1.0, %v3769_v36  ;;  %v4950_v21 = vpop.f32.mrb[62].mxu0 }
 0x1a3   :  { %v4939_v25 = vmul.f32 %v5899_v0, %v5898_v32  ;;  %5901 = vst [vmem:[#allocation23_spill] sm:$0xff] %v4941_v15  ;;  %v4945_v20 = vmul.f32 %v4627_v14, %v5902_v11  ;;  %v5904_v12 = vld [vmem:[#allocation90_spill] sm:$0xff]  ;;  %5906 = vst [vmem:[#allocation133_spill] sm:$0xff] %v4950_v21  ;;  %v4952_v27 = vpop.f32.mrb[62].mxu1  ;;  %v3773_v0 = vpop.eup %3772  ;;  %v5908_v32 = vld [vmem:[#allocation25_spill] sm:$0xff]  ;;  %3792 = vrcp.f32 %v1767_v59  ;;  %v1768_v51 = vadd.f32 1.0, %v3771_v56 }
 0x1a4   :  { %5897 = vst [vmem:[#allocation22_spill] sm:$0xff] %v4935_v9  ;;  %v4948_v10 = vmul.f32 -1.442695, %v5904_v12  ;;  %5907 = vst [vmem:[#allocation134_spill] sm:$0xff] %v4952_v27  ;;  %v4956_v17 = vmul.f32 %v4632_v46, %v5908_v32  ;;  %v5910_v15 = vld [vmem:[#allocation91_spill] sm:$0xff]  ;;  %v4961_v36 = vpop.f32.mrb[63].mxu0  ;;  %v3775_v11 = vpop.eup %3774  ;;  %3794 = vrcp.f32 %v1769_v8 }
 0x1a5   :  { %5900 = vst [vmem:[#allocation88_spill] sm:$0xff] %v4939_v25  ;;  %5903 = vst [vmem:[#allocation89_spill] sm:$0xff] %v4945_v20  ;;  %v4959_v25 = vmul.f32 -1.442695, %v5910_v15  ;;  %v3546_v14 = vld [vmem:[#allocation4 + $0x78] sm:$0xff]   ;;  %v5913_v12 = vld [vmem:[#allocation26_spill] sm:$0xff]  ;;  %v3777_v32 = vpop.eup %3776  ;;  %3796 = vrcp.f32 %v1768_v51 }
 0x1a6   :  { %5905 = vst [vmem:[#allocation24_spill] sm:$0xff] %v4948_v10  ;;  %5909 = vst [vmem:[#allocation25_spill] sm:$0xff] %v4956_v17  ;;  %v3547_v63 = vld [vmem:[#allocation4 + $0xf8] sm:$0xff]   ;;  %v4965_v21 = vmul.f32 %v4639_v29, %v5913_v12  ;;  %v1770_v27 = vadd.f32 1.0, %v3773_v0  ;;  %v5914_v10 = vld [vmem:[#allocation92_spill] sm:$0xff]  ;;  %v4970_v56 = vpop.f32.mrb[63].mxu1  ;;  %3285 = vmatprep.subr.bf16.mxu0 %v3546_v14  ;;  %v3779_v29 = vpop.eup %3778 }
 0x1a7   :  { %5911 = vst [vmem:[#allocation135_spill] sm:$0xff] %v4959_v25  ;;  %5912 = vst [vmem:[#allocation136_spill] sm:$0xff] %v4961_v36  ;;  %v4968_v20 = vmul.f32 -1.442695, %v5914_v10  ;;  %v3548_v46 = vld [vmem:[#allocation4 + $0x38] sm:$0xff]   ;;  %v1771_v15 = vadd.f32 1.0, %v3775_v11  ;;  %3397 = vmatprep.subr.bf16.mxu1 %v3547_v63  ;;  %v3781_v51 = vpop.eup %3780 }
 0x1a8   :  { %v3549_v59 = vld [vmem:[#allocation4 + $0xb8] sm:$0xff]   ;;  %5915 = vst [vmem:[#allocation26_spill] sm:$0xff] %v4970_v56  ;;  %v5916_v25 = vld [vmem:[#allocation93_spill] sm:$0xff]  ;;  %v5917_v36 = vld [vmem:[#allocation94_spill] sm:$0xff]  ;;  %3798 = vrcp.f32 %v1770_v27  ;;  %v1773_v10 = vadd.f32 1.0, %v3777_v32  ;;  %3286 = vmatpush3.bf16.msra.mxu0 %v3548_v46  ;;  %v1772_v14 = vadd.f32 1.0, %v3779_v29 }
 0x1a9   :  { %v4973_v17 = vmul.f32 -1.442695, %v5916_v25  ;;  %v4976_v9 = vmul.f32 -1.442695, %v5917_v36  ;;  %v5918_v12 = vld [vmem:[#allocation27_spill] sm:$0xff]  ;;  %3398 = vmatpush3.bf16.msra.mxu1 %v3549_v59  ;;  %v5920_v11 = vld [vmem:[#allocation28_spill] sm:$0xff]  ;;  %3800 = vrcp.f32 %v1771_v15 }
 0x1aa   :  { %v5919_v8 = vld [vmem:[#allocation95_spill] sm:$0xff]  ;;  %v4983_v56 = vmul.f32 -1.442695, %v4649_v24  ;;  %v4987_v25 = vmul.f32 %v4653_v40, %v5920_v11  ;;  %v4990_v63 = vmul.f32 -1.442695, %v4651_v61  ;;  %v975_v36 = vpop.f32.mrb[64].mxu0  ;;  %3802 = vrcp.f32 %v1773_v10 }
 0x1ab   :  { %v4980_v0 = vmul.f32 %v5919_v8, %v5918_v12  ;;  %v3783_v12 = vpop.eup %3782  ;;  %v1774_v27 = vadd.f32 1.0, %v3781_v51  ;;  %v4993_v32 = vmul.f32 -1.442695, %v4656_v2  ;;  %v2223_v46 = vmul.f32 %v4707_v13, %v975_v36  ;;  %v1168_v59 = vpop.f32.mrb[64].mxu1  ;;  %v5923_v10 = vld [vmem:[#allocation29_spill] sm:$0xff]  ;;  %v5924_v51 = vld [vmem:[#allocation99_spill] sm:$0xff] }
 0x1ac   :  { %5921 = vst [vmem:[#allocation27_spill] sm:$0xff] %v4990_v63  ;;  %v977_v8 = vpop.f32.mrb[65].mxu0  ;;  %v4996_v24 = vpop.eup %3784  ;;  %3804 = vrcp.f32 %v1772_v14  ;;  %v1775_v40 = vadd.f32 1.0, %v3783_v12  ;;  %v2225_v15 = vmul.f32 %v4713_v22, %v1168_v59  ;;  %v5004_v2 = vmul.f32 %v5924_v51, %v5923_v10  ;;  %v5925_v22 = vld [vmem:[#allocation30_spill] sm:$0xff] }
 0x1ad   :  { %5922 = vst [vmem:[#allocation95_spill] sm:$0xff] %v4996_v24  ;;  %v2224_v29 = vmul.f32 %v4717_v26, %v977_v8  ;;  %v1170_v11 = vpop.f32.mrb[65].mxu1  ;;  %v979_v61 = vpop.f32.mrb[66].mxu0  ;;  %3806 = vrcp.f32 %v1774_v27  ;;  %v5012_v26 = vmul.f32 %v4661_v55, %v5925_v22  ;;  %v5926_v27 = vld [vmem:[#allocation31_spill] sm:$0xff]  ;;  %v5927_v55 = vld [vmem:[#allocation32_spill] sm:$0xff] }
 0x1ae   :  { %v5000_v63 = vpop.eup %3786  ;;  %v2226_v13 = vmul.f32 %v4721_v31, %v1170_v11  ;;  %v2227_v36 = vmul.f32 %v4728_v33, %v979_v61  ;;  %v1172_v24 = vpop.f32.mrb[66].mxu1  ;;  %3808 = vrcp.f32 %v1775_v40  ;;  %v5020_v31 = vmul.f32 %v4664_v23, %v5926_v27  ;;  %v5928_v40 = vld [vmem:[#allocation100_spill] sm:$0xff]  ;;  %v5930_v23 = vld [vmem:[#allocation102_spill] sm:$0xff] }
 0x1af   :  { %v981_v14 = vpop.f32.mrb[67].mxu0  ;;  %v5008_v12 = vpop.eup %3788  ;;  %v2229_v59 = vmul.f32 %v4737_v37, %v1172_v24  ;;  %3810 = vpow2.f32 %v4857_v47  ;;  %v5028_v22 = vmul.f32 %v5928_v40, %v5927_v55  ;;  %v5931_v47 = vld [vmem:[#allocation101_spill] sm:$0xff] }
 0x1b0   :  { %v2228_v8 = vmul.f32 %v4741_v5, %v981_v14  ;;  %v1174_v10 = vpop.f32.mrb[67].mxu1  ;;  %v5016_v51 = vpop.eup %3790  ;;  %v2351_v61 = vpack.c.bf16 %v2227_v36, %v2223_v46  ;;  %3812 = vpow2.f32 %v4870_v62  ;;  %v5929_v14 = vld [vmem:[#allocation33_spill] sm:$0xff]  ;;  %v5934_v62 = vld [vmem:[#allocation103_spill] sm:$0xff] }
 0x1b1   :  { %v2230_v33 = vmul.f32 %v4752_v58, %v1174_v10  ;;  %v5024_v11 = vpop.eup %3792  ;;  %v2353_v24 = vpack.c.bf16 %v2229_v59, %v2225_v15  ;;  %v5035_v27 = vmul.f32 %v5930_v23, %v5929_v14  ;;  %3814 = vpow2.f32 %v4873_v43  ;;  %v5932_v10 = vld [vmem:[#allocation34_spill] sm:$0xff]  ;;  %v5933_v55 = vld [vmem:[#allocation105_spill] sm:$0xff]  ;;  %v5937_v14 = vld [vmem:[#allocation107_spill] sm:$0xff] }
 0x1b2   :  { %v2352_v37 = vpack.c.bf16 %v2228_v8, %v2224_v29  ;;  %v5031_v5 = vpop.eup %3794  ;;  %v5039_v58 = vmul.f32 -1.442695, %v5931_v47  ;;  %v5045_v40 = vmul.f32 %v5933_v55, %v5932_v10  ;;  %3816 = vpow2.f32 %v4886_v3  ;;  %v5935_v29 = vld [vmem:[#allocation104_spill] sm:$0xff]  ;;  %v985_v8 = vpop.f32.mrb[68].mxu0 }
 0x1b3   :  { %v2354_v46 = vpack.c.bf16 %v2230_v33, %v2226_v13  ;;  %v5041_v36 = vpop.eup %3796  ;;  %v5049_v15 = vmul.f32 -1.442695, %v5934_v62  ;;  %v5052_v59 = vmul.f32 -1.442695, %v5935_v29  ;;  %3818 = vpow2.f32 %v4889_v50  ;;  %v5936_v13 = vld [vmem:[#allocation106_spill] sm:$0xff]  ;;  %v1178_v10 = vpop.f32.mrb[68].mxu1 }
 0x1b4   :  { %2703 = vmatprep.mubr.bf16.mxu0 %v2352_v37  ;;  %v5054_v43 = vpop.eup %3798  ;;  %v5058_v33 = vmul.f32 -1.442695, %v5936_v13  ;;  %v5061_v23 = vmul.f32 -1.442695, %v5937_v14  ;;  %v2231_v3 = vmul.f32 %v4756_v41, %v985_v8  ;;  %v987_v55 = vpop.f32.mrb[69].mxu0  ;;  %3820 = vpow2.f32 %v4894_v4  ;;  %v5939_v37 = vld [vmem:[#allocation108_spill] sm:$0xff] }
 0x1b5   :  { %2864 = vmatprep.mubr.bf16.mxu1 %v2354_v46  ;;  %2704 = vmatmul.mubr.bf16.vlgmr.msra.gmra.mrb[128].mxu0 %v2351_v61  ;;  %v5064_v29 = vpop.eup %3800  ;;  %v5068_v62 = vmul.f32 -1.442695, %v5939_v37  ;;  %v2233_v50 = vmul.f32 %v4767_v54, %v1178_v10  ;;  %v2232_v13 = vmul.f32 %v4771_v44, %v987_v55  ;;  %v1180_v47 = vpop.f32.mrb[69].mxu1  ;;  %3822 = vpow2.f32 %v4897_v60  ;;  %v5941_v41 = vld [vmem:[#allocation109_spill] sm:$0xff]  ;;  %v5942_v54 = vld [vmem:[#allocation110_spill] sm:$0xff] }
 0x1b6   :  { %5938 = vst [vmem:[#allocation28_spill] sm:$0xff] %v5061_v23  ;;  %2865 = vmatmul.mubr.bf16.vlgmr.msra.gmra.mrb[128].mxu1 %v2353_v24  ;;  %v989_v14 = vpop.f32.mrb[70].mxu0  ;;  %v5072_v23 = vpop.eup %3802  ;;  %v5076_v61 = vmul.f32 -1.442695, %v5941_v41  ;;  %v2234_v46 = vmul.f32 %v4780_v19, %v1180_v47  ;;  %3824 = vpow2.f32 %v4900_v57  ;;  %v5084_v44 = vmul.f32 -1.442695, %v5942_v54 }
 0x1b7   :  { %5940 = vst [vmem:[#allocation29_spill] sm:$0xff] %v5068_v62  ;;  %v2235_v4 = vmul.f32 %v4784_v18, %v989_v14  ;;  %v1182_v8 = vpop.f32.mrb[70].mxu1  ;;  %v991_v37 = vpop.f32.mrb[71].mxu0  ;;  %3826 = vpow2.f32 %v4903_v6  ;;  %v5092_v18 = vmul.f32 -1.442695, %v4691_v45  ;;  %v5943_v57 = vld [vmem:[#allocation112_spill] sm:$0xff] }
 0x1b8   :  { %v5080_v62 = vpop.eup %3804  ;;  %v2237_v24 = vmul.f32 %v4795_v34, %v1182_v8  ;;  %v2236_v60 = vmul.f32 %v4799_v35, %v991_v37  ;;  %v1184_v10 = vpop.f32.mrb[71].mxu1  ;;  %3828 = vpow2.f32 %v4906_v1  ;;  %v5099_v54 = vmul.f32 -1.442695, %v5943_v57  ;;  %v5944_v8 = vld [vmem:[#allocation113_spill] sm:$0xff] }
 0x1b9   :  { %v5088_v55 = vpop.eup %3806  ;;  %v2355_v19 = vpack.c.bf16 %v2235_v4, %v2231_v3  ;;  %v2238_v47 = vmul.f32 %v4806_v48, %v1184_v10  ;;  %3830 = vpow2.f32 %v4909_v52  ;;  %v5103_v6 = vmul.f32 -1.442695, %v5944_v8  ;;  %v5950_v8 = vld [vmem:[#allocation54_spill] sm:$0xff] }
 0x1ba   :  { %v5095_v14 = vpop.eup %3808  ;;  %v2357_v34 = vpack.c.bf16 %v2237_v24, %v2233_v50  ;;  %v2356_v35 = vpack.c.bf16 %v2236_v60, %v2232_v13  ;;  %v5106_v45 = vmul.f32 -1.442695, %v4697_v28  ;;  %3832 = vpow2.f32 %v4912_v30  ;;  %v995_v13 = vpop.f32.mrb[72].mxu0  ;;  %v5948_v60 = vld [vmem:[#allocation117_spill] sm:$0xff] }
 0x1bb   :  { %v3811_v37 = vpop.eup %3810  ;;  %v2358_v3 = vpack.c.bf16 %v2238_v47, %v2234_v46  ;;  %v5110_v1 = vmul.f32 -1.442695, %v4699_v39  ;;  %v5113_v50 = vmul.f32 -1.442695, %v4701_v16  ;;  %3834 = vpow2.f32 %v4915_v42  ;;  %v1188_v47 = vpop.f32.mrb[72].mxu1 }
 0x1bc   :  { %5945 = vst [vmem:[#allocation99_spill] sm:$0xff] %v5106_v45  ;;  %v3813_v48 = vpop.eup %3812  ;;  %v1777_v4 = vadd.f32 1.0, %v3811_v37  ;;  %2711 = vmatprep.mubr.bf16.mxu0 %v2356_v35  ;;  %v5117_v10 = vmul.f32 -1.442695, %v5948_v60  ;;  %v2239_v46 = vmul.f32 %v4810_v7, %v995_v13  ;;  %v997_v30 = vpop.f32.mrb[73].mxu0  ;;  %v2241_v16 = vmul.f32 %v4817_v53, %v1188_v47  ;;  %v5951_v7 = vld [vmem:[#allocation12_spill] sm:$0xff] }
 0x1bd   :  { %5946 = vst [vmem:[#allocation30_spill] sm:$0xff] %v5110_v1  ;;  %5947 = vst [vmem:[#allocation31_spill] sm:$0xff] %v5113_v50  ;;  %v3815_v52 = vpop.eup %3814  ;;  %v1776_v24 = vadd.f32 1.0, %v3813_v48  ;;  %2872 = vmatprep.mubr.bf16.mxu1 %v2358_v3  ;;  %2712 = vmatmul.mubr.bf16.gmra.mrb[132].mxu0 %v2355_v19  ;;  %v2240_v35 = vmul.f32 %v4821_v49, %v997_v30  ;;  %v1190_v28 = vpop.f32.mrb[73].mxu1  ;;  %v5953_v53 = vld [vmem:[#allocation61_spill] sm:$0xff] }
 0x1be   :  { %5949 = vst [vmem:[#allocation32_spill] sm:$0xff] %v5117_v10  ;;  %v3817_v37 = vpop.eup %3816  ;;  %3836 = vrcp.f32 %v1777_v4  ;;  %v1778_v39 = vadd.f32 1.0, %v3815_v52  ;;  %2873 = vmatmul.mubr.bf16.gmra.mrb[132].mxu1 %v2357_v34  ;;  %v999_v48 = vpop.f32.mrb[74].mxu0  ;;  %v2242_v57 = vmul.f32 %v5950_v8, %v1190_v28  ;;  %v5952_v52 = vld [vmem:[#allocation56_spill] sm:$0xff] }
 0x1bf   :  { %v3819_v42 = vpop.eup %3818  ;;  %3838 = vrcp.f32 %v1776_v24  ;;  %v1779_v60 = vadd.f32 1.0, %v3817_v37  ;;  %v2243_v13 = vmul.f32 %v5951_v7, %v999_v48  ;;  %v1192_v3 = vpop.f32.mrb[74].mxu1  ;;  %v5954_v24 = vld [vmem:[#allocation18_spill] sm:$0xff] }
 0x1c0   :  { %v1001_v41 = vpop.f32.mrb[75].mxu0  ;;  %v3821_v19 = vpop.eup %3820  ;;  %3840 = vrcp.f32 %v1778_v39  ;;  %v1781_v4 = vadd.f32 1.0, %v3819_v42  ;;  %v2245_v10 = vmul.f32 %v5952_v52, %v1192_v3  ;;  %v5955_v42 = vld [vmem:[#allocation118_spill] sm:$0xff]  ;;  %v5957_v52 = vld [vmem:[#allocation35_spill] sm:$0xff] }
 0x1c1   :  { %v2244_v47 = vmul.f32 %v5953_v53, %v1001_v41  ;;  %v1194_v49 = vpop.f32.mrb[75].mxu1  ;;  %v3823_v30 = vpop.eup %3822  ;;  %3842 = vrcp.f32 %v1779_v60  ;;  %v1780_v34 = vadd.f32 1.0, %v3821_v19  ;;  %v2359_v50 = vpack.c.bf16 %v2243_v13, %v2239_v46  ;;  %v5958_v53 = vld [vmem:[#allocation119_spill] sm:$0xff]  ;;  %v5959_v13 = vld [vmem:[#allocation120_spill] sm:$0xff] }
 0x1c2   :  { %v2246_v37 = vmul.f32 %v5954_v24, %v1194_v49  ;;  %v3825_v1 = vpop.eup %3824  ;;  %3844 = vrcp.f32 %v1781_v4  ;;  %v1782_v28 = vadd.f32 1.0, %v3823_v30  ;;  %v2361_v8 = vpack.c.bf16 %v2245_v10, %v2241_v16  ;;  %v1005_v4 = vpop.f32.mrb[76].mxu0  ;;  %v5961_v10 = vld [vmem:[#allocation38_spill] sm:$0xff] }
 0x1c3   :  { %v2360_v48 = vpack.c.bf16 %v2244_v47, %v2240_v35  ;;  %v3827_v7 = vpop.eup %3826  ;;  %3846 = vrcp.f32 %v1780_v34  ;;  %v1783_v39 = vadd.f32 1.0, %v3825_v1  ;;  %v5128_v45 = vmul.f32 -1.442695, %v5955_v42  ;;  %v5962_v35 = vld [vmem:[#allocation121_spill] sm:$0xff]  ;;  %v1198_v30 = vpop.f32.mrb[76].mxu1  ;;  %v5986_v42 = vld [vmem:[#allocation24_spill] sm:$0xff] }
 0x1c4   :  { %v2362_v3 = vpack.c.bf16 %v2246_v37, %v2242_v57  ;;  %v3829_v41 = vpop.eup %3828  ;;  %v5132_v60 = vmul.f32 %v5958_v53, %v5957_v52  ;;  %3848 = vrcp.f32 %v1782_v28  ;;  %v1785_v46 = vadd.f32 1.0, %v3827_v7  ;;  %v5963_v57 = vld [vmem:[#allocation20_spill] sm:$0xff]  ;;  %v1007_v34 = vpop.f32.mrb[77].mxu0  ;;  %v5964_v7 = vld [vmem:[#allocation22_spill] sm:$0xff] }
 0x1c5   :  { %5956 = vst [vmem:[#allocation100_spill] sm:$0xff] %v5128_v45  ;;  %v5135_v19 = vmul.f32 -1.442695, %v5959_v13  ;;  %2719 = vmatprep.mubr.bf16.mxu0 %v2360_v48  ;;  %v3831_v16 = vpop.eup %3830  ;;  %v5139_v1 = vmul.f32 %v5962_v35, %v5961_v10  ;;  %3850 = vrcp.f32 %v1783_v39  ;;  %v1784_v47 = vadd.f32 1.0, %v3829_v41  ;;  %v1200_v52 = vpop.f32.mrb[77].mxu1  ;;  %v5965_v41 = vld [vmem:[#allocation88_spill] sm:$0xff] }
 0x1c6   :  { %v2247_v49 = vmul.f32 %v5963_v57, %v1005_v4  ;;  %2880 = vmatprep.mubr.bf16.mxu1 %v2362_v3  ;;  %2720 = vmatmul.mubr.bf16.gmra.mrb[136].mxu0 %v2359_v50  ;;  %v3833_v24 = vpop.eup %3832  ;;  %3852 = vrcp.f32 %v1785_v46  ;;  %v1786_v37 = vadd.f32 1.0, %v3831_v16  ;;  %v2249_v28 = vmul.f32 %v4924_v38, %v1198_v30  ;;  %v1009_v53 = vpop.f32.mrb[78].mxu0  ;;  %v5966_v4 = vld [vmem:[#allocation89_spill] sm:$0xff] }
 0x1c7   :  { %5960 = vst [vmem:[#allocation33_spill] sm:$0xff] %v5135_v19  ;;  %v2248_v48 = vmul.f32 %v5964_v7, %v1007_v34  ;;  %2881 = vmatmul.mubr.bf16.gmra.mrb[136].mxu1 %v2361_v8  ;;  %v3835_v10 = vpop.eup %3834  ;;  %3854 = vrcp.f32 %v1784_v47  ;;  %v1787_v39 = vadd.f32 1.0, %v3833_v24  ;;  %v2250_v35 = vmul.f32 %v5965_v41, %v1200_v52  ;;  %v1202_v3 = vpop.f32.mrb[78].mxu1  ;;  %v5967_v16 = vld [vmem:[#allocation25_spill] sm:$0xff]  ;;  %v5968_v47 = vld [vmem:[#allocation122_spill] sm:$0xff]  ;;  %v5970_v41 = vld [vmem:[#allocation123_spill] sm:$0xff] }
 0x1c8   :  { %v2251_v57 = vmul.f32 %v5966_v4, %v1009_v53  ;;  %v1011_v13 = vpop.f32.mrb[79].mxu0  ;;  %v5146_v50 = vpop.eup %3836  ;;  %3856 = vrcp.f32 %v1786_v37  ;;  %v1789_v46 = vadd.f32 1.0, %v3835_v10  ;;  %v2253_v38 = vmul.f32 %v5967_v16, %v1202_v3  ;;  %v6001_v19 = vld [vmem:[#allocation13_spill] sm:$0xff] }
 0x1c9   :  { %v2252_v30 = vmul.f32 %v4965_v21, %v1011_v13  ;;  %v1204_v34 = vpop.f32.mrb[79].mxu1  ;;  %v5150_v8 = vpop.eup %3838  ;;  %3858 = vrcp.f32 %v1787_v39  ;;  %v5153_v24 = vmul.f32 -1.442695, %v5968_v47  ;;  %v5159_v37 = vmul.f32 -1.442695, %v5970_v41  ;;  %v5972_v21 = vld [vmem:[#allocation39_spill] sm:$0xff] }
 0x1ca   :  { %v2363_v7 = vpack.c.bf16 %v2251_v57, %v2247_v49  ;;  %v2254_v52 = vmul.f32 %v4980_v0, %v1204_v34  ;;  %v5156_v53 = vpop.eup %3840  ;;  %3860 = vrcp.f32 %v1789_v46  ;;  %v2365_v10 = vpack.c.bf16 %v2253_v38, %v2249_v28  ;;  %v5973_v13 = vld [vmem:[#allocation124_spill] sm:$0xff]  ;;  %v5974_v39 = vld [vmem:[#allocation130_spill] sm:$0xff]  ;;  %v5975_v47 = vld [vmem:[#allocation125_spill] sm:$0xff] }
 0x1cb   :  { %5969 = vst [vmem:[#allocation102_spill] sm:$0xff] %v5153_v24  ;;  %5971 = vst [vmem:[#allocation34_spill] sm:$0xff] %v5159_v37  ;;  %v2364_v4 = vpack.c.bf16 %v2252_v30, %v2248_v48  ;;  %v5161_v3 = vpop.eup %3842  ;;  %v5165_v16 = vmul.f32 %v5973_v13, %v5972_v21  ;;  %3862 = vpow2.f32 %v5974_v39  ;;  %v5169_v49 = vmul.f32 -1.442695, %v5975_v47  ;;  %v5977_v46 = vld [vmem:[#allocation40_spill] sm:$0xff]  ;;  %v5978_v34 = vld [vmem:[#allocation127_spill] sm:$0xff] }
 0x1cc   :  { %v2366_v0 = vpack.c.bf16 %v2254_v52, %v2250_v35  ;;  %v5171_v57 = vpop.eup %3844  ;;  %v5175_v41 = vmul.f32 %v5978_v34, %v5977_v46  ;;  %v5979_v28 = vld [vmem:[#allocation21_spill] sm:$0xff]  ;;  %v5980_v48 = vld [vmem:[#allocation126_spill] sm:$0xff]  ;;  %v5982_v30 = vld [vmem:[#allocation128_spill] sm:$0xff]  ;;  %v1015_v13 = vpop.f32.mrb[80].mxu0 }
 0x1cd   :  { %5976 = vst [vmem:[#allocation105_spill] sm:$0xff] %v5169_v49  ;;  %3864 = vpow2.f32 %v5979_v28  ;;  %v5179_v38 = vmul.f32 -1.442695, %v5980_v48  ;;  %v5182_v21 = vmul.f32 -1.442695, %v5982_v30  ;;  %2727 = vmatprep.mubr.bf16.mxu0 %v2364_v4  ;;  %v5184_v39 = vpop.eup %3846  ;;  %v5984_v47 = vld [vmem:[#allocation41_spill] sm:$0xff]  ;;  %v2255_v28 = vmul.f32 %v4987_v25, %v1015_v13 }
 0x1ce   :  { %v5985_v35 = vld [vmem:[#allocation129_spill] sm:$0xff]  ;;  %3866 = vpow2.f32 %v5986_v42  ;;  %v5987_v46 = vld [vmem:[#allocation36_spill] sm:$0xff]  ;;  %v1208_v48 = vpop.f32.mrb[80].mxu1  ;;  %2888 = vmatprep.mubr.bf16.mxu1 %v2366_v0  ;;  %2728 = vmatmul.mubr.bf16.gmra.mrb[140].mxu0 %v2363_v7  ;;  %v5195_v30 = vpop.eup %3848  ;;  %v5989_v4 = vld [vmem:[#allocation135_spill] sm:$0xff] }
 0x1cf   :  { %5981 = vst [vmem:[#allocation54_spill] sm:$0xff] %v5179_v38  ;;  %5983 = vst [vmem:[#allocation12_spill] sm:$0xff] %v5182_v21  ;;  %v5188_v52 = vmul.f32 %v5985_v35, %v5984_v47  ;;  %v5192_v34 = vmul.f32 -1.442695, %v5987_v46  ;;  %v1017_v38 = vpop.f32.mrb[81].mxu0  ;;  %3868 = vpow2.f32 %v5989_v4  ;;  %v5990_v21 = vld [vmem:[#allocation8_spill] sm:$0xff]  ;;  %v2257_v47 = vmul.f32 %v5004_v2, %v1208_v48  ;;  %2889 = vmatmul.mubr.bf16.gmra.mrb[140].mxu1 %v2365_v10 }
 0x1d0   :  { %v5199_v49 = vmul.f32 -1.442695, %v5990_v21  ;;  %v2256_v42 = vmul.f32 %v5012_v26, %v1017_v38  ;;  %v1210_v35 = vpop.f32.mrb[81].mxu1  ;;  %v1019_v46 = vpop.f32.mrb[82].mxu0  ;;  %v5992_v25 = vld [vmem:[#allocation42_spill] sm:$0xff]  ;;  %v5993_v0 = vld [vmem:[#allocation37_spill] sm:$0xff]  ;;  %3870 = vpow2.f32 %v4968_v20 }
 0x1d1   :  { %5988 = vst [vmem:[#allocation56_spill] sm:$0xff] %v5192_v34  ;;  %v5203_v34 = vpop.eup %3850  ;;  %v2139_v13 = vmul.f32 %v5993_v0, %v5992_v25  ;;  %v2258_v7 = vmul.f32 %v5020_v31, %v1210_v35  ;;  %v2259_v4 = vmul.f32 %v5028_v22, %v1019_v46  ;;  %v1212_v21 = vpop.f32.mrb[82].mxu1  ;;  %v5994_v2 = vld [vmem:[#allocation43_spill] sm:$0xff]  ;;  %v5995_v26 = vld [vmem:[#allocation9_spill] sm:$0xff]  ;;  %3872 = vpow2.f32 %v4973_v17  ;;  %v5996_v20 = vld [vmem:[#allocation44_spill] sm:$0xff] }
 0x1d2   :  { %5991 = vst [vmem:[#allocation61_spill] sm:$0xff] %v5199_v49  ;;  %v1021_v49 = vpop.f32.mrb[83].mxu0  ;;  %v5210_v37 = vpop.eup %3852  ;;  %v2141_v48 = vmul.f32 %v5995_v26, %v5994_v2  ;;  %v2261_v10 = vmul.f32 %v5035_v27, %v1212_v21  ;;  %v5997_v31 = vld [vmem:[#allocation10_spill] sm:$0xff]  ;;  %3874 = vpow2.f32 %v4976_v9  ;;  %v5998_v2 = vld [vmem:[#allocation45_spill] sm:$0xff]  ;;  %v5999_v26 = vld [vmem:[#allocation11_spill] sm:$0xff] }
 0x1d3   :  { %v2260_v38 = vmul.f32 %v5045_v40, %v1021_v49  ;;  %v1214_v25 = vpop.f32.mrb[83].mxu1  ;;  %v5217_v0 = vpop.eup %3854  ;;  %v2140_v35 = vmul.f32 %v5997_v31, %v5996_v20  ;;  %v2367_v22 = vpack.c.bf16 %v2259_v4, %v2255_v28  ;;  %v2142_v17 = vmul.f32 %v5999_v26, %v5998_v2  ;;  %v6000_v21 = vld [vmem:[#allocation46_spill] sm:$0xff]  ;;  %v6002_v20 = vld [vmem:[#allocation27_spill] sm:$0xff]  ;;  %v6012_v26 = vld [vmem:[#allocation48_spill] sm:$0xff] }
 0x1d4   :  { %v2262_v46 = vmul.f32 %v5132_v60, %v1214_v25  ;;  %v5223_v24 = vpop.eup %3856  ;;  %3876 = vpow2.f32 %v4983_v56  ;;  %v2369_v27 = vpack.c.bf16 %v2261_v10, %v2257_v47  ;;  %v5232_v45 = vmul.f32 %v6001_v19, %v6000_v21  ;;  %v6003_v9 = vld [vmem:[#allocation55_spill] sm:$0xff]  ;;  %v6008_v56 = vld [vmem:[#allocation14_spill] sm:$0xff]  ;;  %v1025_v10 = vpop.f32.mrb[84].mxu0  ;;  %v6013_v21 = vld [vmem:[#allocation17_spill] sm:$0xff] }
 0x1d5   :  { %v2368_v40 = vpack.c.bf16 %v2260_v38, %v2256_v42  ;;  %v5228_v49 = vpop.eup %3858  ;;  %3878 = vpow2.f32 %v6002_v20  ;;  %v5236_v28 = vmul.f32 -1.442695, %v6003_v9  ;;  %v6006_v25 = vld [vmem:[#allocation47_spill] sm:$0xff]  ;;  %v5246_v47 = vmul.f32 -1.442695, %v6008_v56  ;;  %v6010_v42 = vld [vmem:[#allocation58_spill] sm:$0xff] }
 0x1d6   :  { %v2370_v60 = vpack.c.bf16 %v2262_v46, %v2258_v7  ;;  %v5238_v4 = vpop.eup %3860  ;;  %v6007_v31 = vld [vmem:[#allocation15_spill] sm:$0xff]  ;;  %3880 = vpow2.f32 %v4993_v32  ;;  %v5249_v19 = vmul.f32 -1.442695, %v6010_v42  ;;  %v5253_v7 = vmul.f32 %v6013_v21, %v6012_v26  ;;  %v6014_v46 = vld [vmem:[#allocation49_spill] sm:$0xff] }
 0x1d7   :  { %6004 = vst [vmem:[#allocation18_spill] sm:$0xff] %v5236_v28  ;;  %6005 = vst [vmem:[#allocation35_spill] sm:$0xff] %v5238_v4  ;;  %v5242_v2 = vmul.f32 %v6007_v31, %v6006_v25  ;;  %2735 = vmatprep.mubr.bf16.mxu0 %v2368_v40  ;;  %v3863_v38 = vpop.eup %3862  ;;  %v6015_v20 = vld [vmem:[#allocation69_spill] sm:$0xff]  ;;  %3882 = vpow2.f32 %v5039_v58  ;;  %v2263_v32 = vmul.f32 %v5139_v1, %v1025_v10  ;;  %v1218_v25 = vpop.f32.mrb[84].mxu1 }
 0x1d8   :  { %6009 = vst [vmem:[#allocation119_spill] sm:$0xff] %v5246_v47  ;;  %6011 = vst [vmem:[#allocation38_spill] sm:$0xff] %v5249_v19  ;;  %v5257_v9 = vmul.f32 %v6015_v20, %v6014_v46  ;;  %2896 = vmatprep.mubr.bf16.mxu1 %v2370_v60  ;;  %v1027_v31 = vpop.f32.mrb[85].mxu0  ;;  %2736 = vmatmul.mubr.bf16.gmra.mrb[144].mxu0 %v2367_v22  ;;  %v3865_v42 = vpop.eup %3864  ;;  %v1788_v56 = vadd.f32 1.0, %v3863_v38  ;;  %3884 = vpow2.f32 %v5049_v15 }
 0x1d9   :  { %v2265_v40 = vmul.f32 %v5165_v16, %v1218_v25  ;;  %v2264_v26 = vmul.f32 %v5175_v41, %v1027_v31  ;;  %v1220_v21 = vpop.f32.mrb[85].mxu1  ;;  %2897 = vmatmul.mubr.bf16.gmra.mrb[144].mxu1 %v2369_v27  ;;  %v1029_v46 = vpop.f32.mrb[86].mxu0  ;;  %v1790_v19 = vadd.f32 1.0, %v3865_v42  ;;  %3886 = vpow2.f32 %v5052_v59 }
 0x1da   :  { %v3867_v20 = vpop.eup %3866  ;;  %v2266_v58 = vmul.f32 %v5188_v52, %v1220_v21  ;;  %v2267_v1 = vmul.f32 %v2139_v13, %v1029_v46  ;;  %v1222_v60 = vpop.f32.mrb[86].mxu1  ;;  %3888 = vrcp.f32 %v1788_v56  ;;  %v6016_v13 = vld [vmem:[#allocation50_spill] sm:$0xff]  ;;  %v6017_v21 = vld [vmem:[#allocation95_spill] sm:$0xff] }
 0x1db   :  { %v1031_v22 = vpop.f32.mrb[87].mxu0  ;;  %v3869_v10 = vpop.eup %3868  ;;  %v1791_v38 = vadd.f32 1.0, %v3867_v20  ;;  %v2269_v15 = vmul.f32 %v2141_v48, %v1222_v60  ;;  %3890 = vrcp.f32 %v1790_v19  ;;  %v2147_v46 = vmul.f32 %v6017_v21, %v6016_v13  ;;  %v6019_v19 = vld [vmem:[#allocation52_spill] sm:$0xff] }
 0x1dc   :  { %v2268_v47 = vmul.f32 %v2140_v35, %v1031_v22  ;;  %v1224_v16 = vpop.f32.mrb[87].mxu1  ;;  %v3871_v25 = vpop.eup %3870  ;;  %v1793_v41 = vadd.f32 1.0, %v3869_v10  ;;  %v2371_v27 = vpack.c.bf16 %v2267_v1, %v2263_v32  ;;  %v6018_v35 = vld [vmem:[#allocation51_spill] sm:$0xff]  ;;  %v2148_v32 = vmul.f32 %v5008_v12, %v6019_v19 }
 0x1dd   :  { %v2270_v31 = vmul.f32 %v2142_v17, %v1224_v16  ;;  %v3873_v28 = vpop.eup %3872  ;;  %3892 = vrcp.f32 %v1791_v38  ;;  %v1792_v42 = vadd.f32 1.0, %v3871_v25  ;;  %v2373_v59 = vpack.c.bf16 %v2269_v15, %v2265_v40  ;;  %v1035_v1 = vpop.f32.mrb[88].mxu0 }
 0x1de   :  { %v2372_v4 = vpack.c.bf16 %v2268_v47, %v2264_v26  ;;  %v3875_v52 = vpop.eup %3874  ;;  %3894 = vrcp.f32 %v1793_v41  ;;  %v1794_v56 = vadd.f32 1.0, %v3873_v28  ;;  %v2149_v60 = vmul.f32 %v5000_v63, %v6018_v35  ;;  %v6020_v47 = vld [vmem:[#allocation53_spill] sm:$0xff]  ;;  %v1037_v10 = vpop.f32.mrb[89].mxu0 }
 0x1df   :  { %v2374_v20 = vpack.c.bf16 %v2270_v31, %v2266_v58  ;;  %v3877_v48 = vpop.eup %3876  ;;  %3896 = vrcp.f32 %v1792_v42  ;;  %v1795_v17 = vadd.f32 1.0, %v3875_v52  ;;  %v2150_v26 = vmul.f32 %v5016_v51, %v6020_v47  ;;  %v1228_v58 = vpop.f32.mrb[88].mxu1 }
 0x1e0   :  { %2743 = vmatprep.mubr.bf16.mxu0 %v2372_v4  ;;  %v3879_v40 = vpop.eup %3878  ;;  %3898 = vrcp.f32 %v1794_v56  ;;  %v1797_v22 = vadd.f32 1.0, %v3877_v48  ;;  %v2271_v28 = vmul.f32 %v5232_v45, %v1035_v1  ;;  %v2273_v12 = vmul.f32 %v5242_v2, %v1228_v58  ;;  %v1230_v4 = vpop.f32.mrb[89].mxu1 }
 0x1e1   :  { %2904 = vmatprep.mubr.bf16.mxu1 %v2374_v20  ;;  %2744 = vmatmul.mubr.bf16.gmra.mrb[148].mxu0 %v2371_v27  ;;  %v3881_v63 = vpop.eup %3880  ;;  %3900 = vrcp.f32 %v1795_v17  ;;  %v1796_v38 = vadd.f32 1.0, %v3879_v40  ;;  %v2272_v15 = vmul.f32 %v5253_v7, %v1037_v10  ;;  %v1039_v16 = vpop.f32.mrb[90].mxu0  ;;  %v2274_v41 = vmul.f32 %v5257_v9, %v1230_v4  ;;  %v6021_v17 = vld [vmem:[#allocation57_spill] sm:$0xff]  ;;  %v6022_v40 = vld [vmem:[#allocation59_spill] sm:$0xff] }
 0x1e2   :  { %2905 = vmatmul.mubr.bf16.gmra.mrb[148].mxu1 %v2373_v59  ;;  %v3883_v25 = vpop.eup %3882  ;;  %3902 = vrcp.f32 %v1797_v22  ;;  %v1798_v51 = vadd.f32 1.0, %v3881_v63  ;;  %v2275_v45 = vmul.f32 %v2147_v46, %v1039_v16  ;;  %v1232_v31 = vpop.f32.mrb[90].mxu1  ;;  %v2151_v1 = vmul.f32 %v5024_v11, %v6021_v17  ;;  %v6023_v22 = vld [vmem:[#allocation60_spill] sm:$0xff]  ;;  %v6025_v10 = vld [vmem:[#allocation63_spill] sm:$0xff]  ;;  %v6033_v17 = vld [vmem:[#allocation74_spill] sm:$0xff] }
 0x1e3   :  { %v1041_v42 = vpop.f32.mrb[91].mxu0  ;;  %v3885_v52 = vpop.eup %3884  ;;  %3904 = vrcp.f32 %v1796_v38  ;;  %v1799_v27 = vadd.f32 1.0, %v3883_v25  ;;  %v2277_v13 = vmul.f32 %v2149_v60, %v1232_v31  ;;  %v2153_v60 = vmul.f32 %v5031_v5, %v6022_v40 }
 0x1e4   :  { %v2276_v21 = vmul.f32 %v2148_v32, %v1041_v42  ;;  %v1234_v56 = vpop.f32.mrb[91].mxu1  ;;  %v3887_v2 = vpop.eup %3886  ;;  %3906 = vrcp.f32 %v1798_v51  ;;  %v1801_v7 = vadd.f32 1.0, %v3885_v52  ;;  %v2375_v20 = vpack.c.bf16 %v2275_v45, %v2271_v28  ;;  %v6024_v28 = vld [vmem:[#allocation62_spill] sm:$0xff] }
 0x1e5   :  { %v2278_v59 = vmul.f32 %v2150_v26, %v1234_v56  ;;  %v5278_v48 = vpop.eup %3888  ;;  %3908 = vrcp.f32 %v1799_v27  ;;  %v1800_v35 = vadd.f32 1.0, %v3887_v2  ;;  %v2377_v19 = vpack.c.bf16 %v2277_v13, %v2273_v12  ;;  %v1045_v38 = vpop.f32.mrb[92].mxu0  ;;  %v6026_v12 = vld [vmem:[#allocation65_spill] sm:$0xff] }
 0x1e6   :  { %v2376_v9 = vpack.c.bf16 %v2276_v21, %v2272_v15  ;;  %v5280_v46 = vpop.eup %3890  ;;  %3910 = vrcp.f32 %v1801_v7  ;;  %v2152_v26 = vmul.f32 %v5041_v36, %v6023_v22  ;;  %v2154_v58 = vmul.f32 %v5054_v43, %v6024_v28  ;;  %v6027_v15 = vld [vmem:[#allocation66_spill] sm:$0xff]  ;;  %v1238_v16 = vpop.f32.mrb[92].mxu1  ;;  %v6031_v27 = vld [vmem:[#allocation29_spill] sm:$0xff]  ;;  %v6035_v28 = vld [vmem:[#allocation76_spill] sm:$0xff] }
 0x1e7   :  { %v2378_v32 = vpack.c.bf16 %v2278_v59, %v2274_v41  ;;  %v5286_v47 = vpop.eup %3892  ;;  %v2155_v63 = vmul.f32 %v5064_v29, %v6025_v10  ;;  %3912 = vrcp.f32 %v1800_v35  ;;  %v2157_v5 = vmul.f32 %v5072_v23, %v6026_v12  ;;  %v1047_v43 = vpop.f32.mrb[93].mxu0  ;;  %v6028_v29 = vld [vmem:[#allocation67_spill] sm:$0xff]  ;;  %v6029_v41 = vld [vmem:[#allocation28_spill] sm:$0xff]  ;;  %v6036_v10 = vld [vmem:[#allocation77_spill] sm:$0xff] }
 0x1e8   :  { %2751 = vmatprep.mubr.bf16.mxu0 %v2376_v9  ;;  %v5294_v11 = vpop.eup %3894  ;;  %v2156_v4 = vmul.f32 %v5080_v62, %v6027_v15  ;;  %3914 = vpow2.f32 %v5058_v33  ;;  %v2279_v36 = vmul.f32 %v2151_v1, %v1045_v38  ;;  %v2158_v51 = vmul.f32 %v5088_v55, %v6028_v29  ;;  %v1240_v23 = vpop.f32.mrb[93].mxu1  ;;  %v6030_v33 = vld [vmem:[#allocation72_spill] sm:$0xff]  ;;  %v6032_v55 = vld [vmem:[#allocation73_spill] sm:$0xff]  ;;  %v6037_v38 = vld [vmem:[#allocation78_spill] sm:$0xff] }
 0x1e9   :  { %2912 = vmatprep.mubr.bf16.mxu1 %v2378_v32  ;;  %2752 = vmatmul.mubr.bf16.gmra.mrb[152].mxu0 %v2375_v20  ;;  %v5301_v25 = vpop.eup %3896  ;;  %3916 = vpow2.f32 %v6029_v41  ;;  %v2281_v45 = vmul.f32 %v2153_v60, %v1238_v16  ;;  %v2280_v31 = vmul.f32 %v2152_v26, %v1047_v43  ;;  %v1049_v42 = vpop.f32.mrb[94].mxu0  ;;  %v2159_v52 = vmul.f32 %v5095_v14, %v6030_v33  ;;  %v6034_v32 = vld [vmem:[#allocation75_spill] sm:$0xff]  ;;  %v6044_v41 = vld [vmem:[#allocation30_spill] sm:$0xff] }
 0x1ea   :  { %2913 = vmatmul.mubr.bf16.gmra.mrb[152].mxu1 %v2377_v19  ;;  %v5306_v62 = vpop.eup %3898  ;;  %3918 = vpow2.f32 %v6031_v27  ;;  %v2282_v13 = vmul.f32 %v2154_v58, %v1240_v23  ;;  %v2283_v21 = vmul.f32 %v2155_v63, %v1049_v42  ;;  %v1242_v56 = vpop.f32.mrb[94].mxu1  ;;  %v2161_v20 = vmul.f32 %v5146_v50, %v6032_v55  ;;  %v6038_v12 = vld [vmem:[#allocation79_spill] sm:$0xff]  ;;  %v6045_v42 = vld [vmem:[#allocation84_spill] sm:$0xff] }
 0x1eb   :  { %v1051_v2 = vpop.f32.mrb[95].mxu0  ;;  %v5311_v7 = vpop.eup %3900  ;;  %3920 = vpow2.f32 %v5076_v61  ;;  %v2285_v59 = vmul.f32 %v2157_v5, %v1242_v56  ;;  %v2160_v14 = vmul.f32 %v5150_v8, %v6033_v17  ;;  %v2162_v22 = vmul.f32 %v5156_v53, %v6034_v32  ;;  %v6039_v5 = vld [vmem:[#allocation80_spill] sm:$0xff]  ;;  %v6043_v29 = vld [vmem:[#allocation83_spill] sm:$0xff] }
 0x1ec   :  { %v2284_v35 = vmul.f32 %v2156_v4, %v1051_v2  ;;  %v1244_v19 = vpop.f32.mrb[95].mxu1  ;;  %v5316_v9 = vpop.eup %3902  ;;  %3922 = vpow2.f32 %v5084_v44  ;;  %v2379_v1 = vpack.c.bf16 %v2283_v21, %v2279_v36  ;;  %v2163_v58 = vmul.f32 %v5161_v3, %v6035_v28  ;;  %v6041_v36 = vld [vmem:[#allocation82_spill] sm:$0xff]  ;;  %v6049_v28 = vld [vmem:[#allocation85_spill] sm:$0xff] }
 0x1ed   :  { %v2286_v40 = vmul.f32 %v2158_v51, %v1244_v19  ;;  %v5321_v60 = vpop.eup %3904  ;;  %3924 = vpow2.f32 %v5092_v18  ;;  %v2381_v61 = vpack.c.bf16 %v2285_v59, %v2281_v45  ;;  %v2165_v8 = vmul.f32 %v5171_v57, %v6036_v10  ;;  %v1055_v3 = vpop.f32.mrb[96].mxu0  ;;  %v6040_v57 = vld [vmem:[#allocation81_spill] sm:$0xff] }
 0x1ee   :  { %v2380_v50 = vpack.c.bf16 %v2284_v35, %v2280_v31  ;;  %v5326_v26 = vpop.eup %3906  ;;  %3926 = vpow2.f32 %v5099_v54  ;;  %v2164_v53 = vmul.f32 %v5184_v39, %v6037_v38  ;;  %v2166_v18 = vmul.f32 %v5195_v30, %v6038_v12  ;;  %v6042_v39 = vld [vmem:[#allocation99_spill] sm:$0xff]  ;;  %v1248_v43 = vpop.f32.mrb[96].mxu1 }
 0x1ef   :  { %v2382_v44 = vpack.c.bf16 %v2286_v40, %v2282_v13  ;;  %v5333_v63 = vpop.eup %3908  ;;  %v2167_v15 = vmul.f32 %v5203_v34, %v6039_v5  ;;  %3928 = vpow2.f32 %v5103_v6  ;;  %v5346_v54 = vmul.f32 %v5210_v37, %v6040_v57  ;;  %v1057_v34 = vpop.f32.mrb[97].mxu0  ;;  %v6052_v5 = vld [vmem:[#allocation87_spill] sm:$0xff] }
 0x1f0   :  { %2759 = vmatprep.mubr.bf16.mxu0 %v2380_v50  ;;  %v5342_v4 = vpop.eup %3910  ;;  %v5350_v16 = vmul.f32 %v5217_v0, %v6041_v36  ;;  %3930 = vpow2.f32 %v6042_v39  ;;  %v2287_v30 = vmul.f32 %v2159_v52, %v1055_v3  ;;  %v2170_v51 = vmul.f32 %v5223_v24, %v6043_v29  ;;  %v1250_v31 = vpop.f32.mrb[97].mxu1  ;;  %v6046_v52 = vld [vmem:[#allocation31_spill] sm:$0xff]  ;;  %v6047_v24 = vld [vmem:[#allocation32_spill] sm:$0xff]  ;;  %v6053_v39 = vld [vmem:[#allocation90_spill] sm:$0xff] }
 0x1f1   :  { %2920 = vmatprep.mubr.bf16.mxu1 %v2382_v44  ;;  %2760 = vmatmul.mubr.bf16.gmra.mrb[156].mxu0 %v2379_v1  ;;  %v5353_v6 = vpop.eup %3912  ;;  %3932 = vpow2.f32 %v6044_v41  ;;  %v2289_v37 = vmul.f32 %v2161_v20, %v1248_v43  ;;  %v2288_v45 = vmul.f32 %v2160_v14, %v1057_v34  ;;  %v1059_v0 = vpop.f32.mrb[98].mxu0  ;;  %v2171_v33 = vmul.f32 %v5228_v49, %v6045_v42  ;;  %v6048_v14 = vld [vmem:[#allocation100_spill] sm:$0xff] }
 0x1f2   :  { %2921 = vmatmul.mubr.bf16.gmra.mrb[156].mxu1 %v2381_v61  ;;  %v3915_v23 = vpop.eup %3914  ;;  %3934 = vpow2.f32 %v6046_v52  ;;  %v2290_v27 = vmul.f32 %v2162_v22, %v1250_v31  ;;  %v2291_v13 = vmul.f32 %v2163_v58, %v1059_v0  ;;  %v1252_v21 = vpop.f32.mrb[98].mxu1  ;;  %v6050_v58 = vld [vmem:[#allocation35_spill] sm:$0xff]  ;;  %v2174_v3 = vmul.f32 %v5280_v46, %v6052_v5 }
 0x1f3   :  { %v1061_v56 = vpop.f32.mrb[99].mxu0  ;;  %v3917_v2 = vpop.eup %3916  ;;  %v1802_v55 = vadd.f32 1.0, %v3915_v23  ;;  %3936 = vpow2.f32 %v6047_v24  ;;  %v2293_v59 = vmul.f32 %v2165_v8, %v1252_v21  ;;  %v2173_v10 = vmul.f32 %v6050_v58, %v6049_v28 }
 0x1f4   :  { %v2292_v20 = vmul.f32 %v2164_v53, %v1061_v56  ;;  %v1254_v35 = vpop.f32.mrb[99].mxu1  ;;  %v3919_v19 = vpop.eup %3918  ;;  %v1803_v17 = vadd.f32 1.0, %v3917_v2  ;;  %3938 = vpow2.f32 %v6048_v14  ;;  %v2383_v1 = vpack.c.bf16 %v2291_v13, %v2287_v30  ;;  %v6051_v53 = vld [vmem:[#allocation86_spill] sm:$0xff] }
 0x1f5   :  { %v2294_v40 = vmul.f32 %v2166_v18, %v1254_v35  ;;  %v3921_v49 = vpop.eup %3920  ;;  %3940 = vrcp.f32 %v1802_v55  ;;  %v1805_v32 = vadd.f32 1.0, %v3919_v19  ;;  %v2385_v22 = vpack.c.bf16 %v2293_v59, %v2289_v37  ;;  %v1065_v57 = vpop.f32.mrb[100].mxu0 }
 0x1f6   :  { %v2384_v61 = vpack.c.bf16 %v2292_v20, %v2288_v45  ;;  %v3923_v50 = vpop.eup %3922  ;;  %3942 = vrcp.f32 %v1803_v17  ;;  %v1804_v44 = vadd.f32 1.0, %v3921_v49  ;;  %v2172_v12 = vmul.f32 %v5278_v48, %v6051_v53  ;;  %v1258_v29 = vpop.f32.mrb[100].mxu1 }
 0x1f7   :  { %v2386_v8 = vpack.c.bf16 %v2294_v40, %v2290_v27  ;;  %v3925_v38 = vpop.eup %3924  ;;  %3944 = vrcp.f32 %v1805_v32  ;;  %v1806_v18 = vadd.f32 1.0, %v3923_v50  ;;  %v2175_v30 = vmul.f32 %v5286_v47, %v6053_v39  ;;  %v1067_v41 = vpop.f32.mrb[101].mxu0  ;;  %v6055_v32 = vld [vmem:[#allocation92_spill] sm:$0xff] }
 0x1f8   :  { %2767 = vmatprep.mubr.bf16.mxu0 %v2384_v61  ;;  %v3927_v36 = vpop.eup %3926  ;;  %3946 = vrcp.f32 %v1804_v44  ;;  %v1807_v43 = vadd.f32 1.0, %v3925_v38  ;;  %v2295_v34 = vmul.f32 %v2167_v15, %v1065_v57  ;;  %v2297_v46 = vmul.f32 %v5346_v54, %v1258_v29  ;;  %v1260_v31 = vpop.f32.mrb[101].mxu1  ;;  %v6056_v61 = vld [vmem:[#allocation93_spill] sm:$0xff]  ;;  %v6057_v44 = vld [vmem:[#allocation94_spill] sm:$0xff]  ;;  %v6058_v38 = vld [vmem:[#allocation96_spill] sm:$0xff] }
 0x1f9   :  { %2928 = vmatprep.mubr.bf16.mxu1 %v2386_v8  ;;  %2768 = vmatmul.mubr.bf16.gmra.mrb[160].mxu0 %v2383_v1  ;;  %v3929_v37 = vpop.eup %3928  ;;  %3948 = vrcp.f32 %v1806_v18  ;;  %v1809_v48 = vadd.f32 1.0, %v3927_v36  ;;  %v2296_v45 = vmul.f32 %v5350_v16, %v1067_v41  ;;  %v1069_v0 = vpop.f32.mrb[102].mxu0  ;;  %v2298_v42 = vmul.f32 %v2170_v51, %v1260_v31 }
 0x1fa   :  { %2929 = vmatmul.mubr.bf16.gmra.mrb[160].mxu1 %v2385_v22  ;;  %v3931_v23 = vpop.eup %3930  ;;  %3950 = vrcp.f32 %v1807_v43  ;;  %v1808_v47 = vadd.f32 1.0, %v3929_v37  ;;  %v2299_v52 = vmul.f32 %v2171_v33, %v1069_v0  ;;  %v1262_v15 = vpop.f32.mrb[102].mxu1  ;;  %v6054_v33 = vld [vmem:[#allocation91_spill] sm:$0xff]  ;;  %v2176_v22 = vmul.f32 %v5301_v25, %v6055_v32  ;;  %v6060_v43 = vld [vmem:[#allocation98_spill] sm:$0xff] }
 0x1fb   :  { %v1071_v27 = vpop.f32.mrb[103].mxu0  ;;  %v3933_v13 = vpop.eup %3932  ;;  %3952 = vrcp.f32 %v1809_v48  ;;  %v1810_v21 = vadd.f32 1.0, %v3931_v23  ;;  %v2301_v56 = vmul.f32 %v2173_v10, %v1262_v15  ;;  %v2177_v14 = vmul.f32 %v5294_v11, %v6054_v33  ;;  %v6071_v33 = vld [vmem:[#allocation106_spill] sm:$0xff] }
 0x1fc   :  { %v2300_v2 = vmul.f32 %v2172_v12, %v1071_v27  ;;  %v1264_v55 = vpop.f32.mrb[103].mxu1  ;;  %v3935_v24 = vpop.eup %3934  ;;  %3954 = vrcp.f32 %v1808_v47  ;;  %v1811_v54 = vadd.f32 1.0, %v3933_v13  ;;  %v2387_v16 = vpack.c.bf16 %v2299_v52, %v2295_v34  ;;  %v6061_v34 = vld [vmem:[#allocation33_spill] sm:$0xff]  ;;  %v6065_v52 = vld [vmem:[#allocation64_spill] sm:$0xff] }
 0x1fd   :  { %v2302_v59 = vmul.f32 %v2174_v3, %v1264_v55  ;;  %v3937_v20 = vpop.eup %3936  ;;  %3956 = vrcp.f32 %v1810_v21  ;;  %v1813_v35 = vadd.f32 1.0, %v3935_v24  ;;  %v2389_v19 = vpack.c.bf16 %v2301_v56, %v2297_v46  ;;  %v1075_v58 = vpop.f32.mrb[104].mxu0  ;;  %v6059_v3 = vld [vmem:[#allocation97_spill] sm:$0xff]  ;;  %v6062_v46 = vld [vmem:[#allocation102_spill] sm:$0xff] }
 0x1fe   :  { %v2388_v17 = vpack.c.bf16 %v2300_v2, %v2296_v45  ;;  %v3939_v51 = vpop.eup %3938  ;;  %3958 = vrcp.f32 %v1811_v54  ;;  %v1812_v1 = vadd.f32 1.0, %v3937_v20  ;;  %v2178_v50 = vmul.f32 %v5306_v62, %v6056_v61  ;;  %v1268_v12 = vpop.f32.mrb[104].mxu1  ;;  %v6066_v21 = vld [vmem:[#allocation101_spill] sm:$0xff]  ;;  %v6069_v20 = vld [vmem:[#allocation104_spill] sm:$0xff] }
 0x1ff   :  { %v2390_v40 = vpack.c.bf16 %v2302_v59, %v2298_v42  ;;  %v3941_v49 = vpop.eup %3940  ;;  %3960 = vrcp.f32 %v1813_v35  ;;  %v1814_v28 = vadd.f32 1.0, %v3939_v51  ;;  %v2179_v8 = vmul.f32 %v5311_v7, %v6057_v44  ;;  %v1077_v5 = vpop.f32.mrb[105].mxu0  ;;  %v6064_v42 = vld [vmem:[#allocation34_spill] sm:$0xff]  ;;  %v6067_v2 = vld [vmem:[#allocation105_spill] sm:$0xff] }
 0x200   :  { %2775 = vmatprep.mubr.bf16.mxu0 %v2388_v17  ;;  %v3943_v10 = vpop.eup %3942  ;;  %v2181_v11 = vmul.f32 %v5316_v9, %v6058_v38  ;;  %3962 = vrcp.f32 %v1812_v1  ;;  %v2303_v53 = vmul.f32 %v2175_v30, %v1075_v58  ;;  %v2180_v62 = vmul.f32 %v5321_v60, %v6059_v3  ;;  %v1270_v36 = vpop.f32.mrb[105].mxu1  ;;  %v6063_v60 = vld [vmem:[#allocation16_spill] sm:$0xff]  ;;  %v6072_v1 = vld [vmem:[#allocation107_spill] sm:$0xff]  ;;  %v6076_v58 = vld [vmem:[#allocation110_spill] sm:$0xff] }
 0x201   :  { %2936 = vmatprep.mubr.bf16.mxu1 %v2390_v40  ;;  %2776 = vmatmul.mubr.bf16.gmra.mrb[164].mxu0 %v2387_v16  ;;  %v3945_v25 = vpop.eup %3944  ;;  %3964 = vrcp.f32 %v1814_v28  ;;  %v2305_v18 = vmul.f32 %v2177_v14, %v1268_v12  ;;  %v2304_v57 = vmul.f32 %v2176_v22, %v1077_v5  ;;  %v1079_v39 = vpop.f32.mrb[106].mxu0  ;;  %v2182_v9 = vmul.f32 %v5326_v26, %v6060_v43  ;;  %v6068_v16 = vld [vmem:[#allocation103_spill] sm:$0xff]  ;;  %v6074_v22 = vld [vmem:[#allocation12_spill] sm:$0xff]  ;;  %v6075_v28 = vld [vmem:[#allocation109_spill] sm:$0xff] }
 0x202   :  { %2937 = vmatmul.mubr.bf16.gmra.mrb[164].mxu1 %v2389_v19  ;;  %v3947_v7 = vpop.eup %3946  ;;  %3966 = vpow2.f32 %v6061_v34  ;;  %v2306_v30 = vmul.f32 %v2178_v50, %v1270_v36  ;;  %v2307_v29 = vmul.f32 %v2179_v8, %v1079_v39  ;;  %v1272_v41 = vpop.f32.mrb[106].mxu1  ;;  %v3226_v45 = vmul.f32 -1.442695, %v6063_v60  ;;  %v6070_v19 = vld [vmem:[#allocation54_spill] sm:$0xff]  ;;  %v6079_v12 = vld [vmem:[#allocation61_spill] sm:$0xff] }
 0x203   :  { %v1081_v37 = vpop.f32.mrb[107].mxu0  ;;  %v3949_v48 = vpop.eup %3948  ;;  %3968 = vpow2.f32 %v6062_v46  ;;  %v2309_v31 = vmul.f32 %v2181_v11, %v1272_v41  ;;  %v3227_v15 = vmul.f32 -1.442695, %v6065_v52  ;;  %v2183_v56 = vmul.f32 %v5333_v63, %v6066_v21  ;;  %v6073_v63 = vld [vmem:[#allocation108_spill] sm:$0xff]  ;;  %v6081_v39 = vld [vmem:[#allocation18_spill] sm:$0xff] }
 0x204   :  { %v2308_v0 = vmul.f32 %v2180_v62, %v1081_v37  ;;  %v1274_v23 = vpop.f32.mrb[107].mxu1  ;;  %v3951_v47 = vpop.eup %3950  ;;  %3970 = vpow2.f32 %v6064_v42  ;;  %v2391_v26 = vpack.c.bf16 %v2307_v29, %v2303_v53  ;;  %v2185_v59 = vmul.f32 %v5342_v4, %v6068_v16  ;;  %v6082_v29 = vld [vmem:[#allocation113_spill] sm:$0xff]  ;;  %v6083_v37 = vld [vmem:[#allocation119_spill] sm:$0xff]  ;;  %v6085_v42 = vld [vmem:[#allocation38_spill] sm:$0xff] }
 0x205   :  { %v2310_v27 = vmul.f32 %v2182_v9, %v1274_v23  ;;  %v3953_v13 = vpop.eup %3952  ;;  %3972 = vpow2.f32 %v6067_v2  ;;  %v2393_v55 = vpack.c.bf16 %v2309_v31, %v2305_v18  ;;  %v2184_v35 = vmul.f32 %v5353_v6, %v6069_v20  ;;  %v1085_v61 = vpop.f32.mrb[108].mxu0  ;;  %v6077_v6 = vld [vmem:[#allocation56_spill] sm:$0xff]  ;;  %v6084_v23 = vld [vmem:[#allocation114_spill] sm:$0xff] }
 0x206   :  { %v2392_v24 = vpack.c.bf16 %v2308_v0, %v2304_v57  ;;  %v3955_v54 = vpop.eup %3954  ;;  %3974 = vpow2.f32 %v6070_v19  ;;  %v2186_v14 = vmul.f32 %v3941_v49, %v6071_v33  ;;  %v2187_v40 = vmul.f32 %v3943_v10, %v6072_v1  ;;  %v1278_v38 = vpop.f32.mrb[108].mxu1  ;;  %v6078_v10 = vld [vmem:[#allocation111_spill] sm:$0xff]  ;;  %v6080_v57 = vld [vmem:[#allocation112_spill] sm:$0xff] }
 0x207   :  { %v2394_v17 = vpack.c.bf16 %v2310_v27, %v2306_v30  ;;  %v3957_v51 = vpop.eup %3956  ;;  %v2189_v32 = vmul.f32 %v3945_v25, %v6073_v63  ;;  %3976 = vpow2.f32 %v6074_v22  ;;  %v2188_v4 = vmul.f32 %v3947_v7, %v6075_v28  ;;  %v1087_v11 = vpop.f32.mrb[109].mxu0 }
 0x208   :  { %2783 = vmatprep.mubr.bf16.mxu0 %v2392_v24  ;;  %v3959_v50 = vpop.eup %3958  ;;  %v2190_v44 = vmul.f32 %v3949_v48, %v6076_v58  ;;  %3978 = vpow2.f32 %v6077_v6  ;;  %v2311_v8 = vmul.f32 %v2183_v56, %v1085_v61  ;;  %v2191_v53 = vmul.f32 %v3951_v47, %v6078_v10  ;;  %v1280_v3 = vpop.f32.mrb[109].mxu1  ;;  %v6086_v24 = vld [vmem:[#allocation115_spill] sm:$0xff] }
 0x209   :  { %2944 = vmatprep.mubr.bf16.mxu1 %v2394_v17  ;;  %2784 = vmatmul.mubr.bf16.gmra.mrb[168].mxu0 %v2391_v26  ;;  %v3961_v49 = vpop.eup %3960  ;;  %3980 = vpow2.f32 %v6079_v12  ;;  %v2313_v5 = vmul.f32 %v2185_v59, %v1278_v38  ;;  %v2312_v25 = vmul.f32 %v2184_v35, %v1087_v11  ;;  %v1089_v62 = vpop.f32.mrb[110].mxu0  ;;  %v2193_v36 = vmul.f32 %v3953_v13, %v6080_v57  ;;  %v6087_v35 = vld [vmem:[#allocation116_spill] sm:$0xff]  ;;  %v6088_v17 = vld [vmem:[#allocation117_spill] sm:$0xff] }
 0x20a   :  { %2945 = vmatmul.mubr.bf16.gmra.mrb[168].mxu1 %v2393_v55  ;;  %v3963_v18 = vpop.eup %3962  ;;  %3982 = vpow2.f32 %v6081_v39  ;;  %v2314_v7 = vmul.f32 %v2186_v14, %v1280_v3  ;;  %v2315_v43 = vmul.f32 %v2187_v40, %v1089_v62  ;;  %v1282_v9 = vpop.f32.mrb[110].mxu1  ;;  %v2192_v41 = vmul.f32 %v3955_v54, %v6082_v29  ;;  %v6089_v40 = vld [vmem:[#allocation118_spill] sm:$0xff] }
 0x20b   :  { %v1091_v34 = vpop.f32.mrb[111].mxu0  ;;  %v3965_v30 = vpop.eup %3964  ;;  %3984 = vpow2.f32 %v6083_v37  ;;  %v2317_v48 = vmul.f32 %v2189_v32, %v1282_v9  ;;  %v2194_v47 = vmul.f32 %v3957_v51, %v6084_v23  ;;  %v2195_v54 = vmul.f32 %v3959_v50, %v6086_v24  ;;  %v6092_v24 = vld [vmem:[#allocation120_spill] sm:$0xff] }
 0x20c   :  { %v2316_v46 = vmul.f32 %v2188_v4, %v1091_v34  ;;  %v1284_v31 = vpop.f32.mrb[111].mxu1  ;;  %v3967_v0 = vpop.eup %3966  ;;  %3986 = vpow2.f32 %v6085_v42  ;;  %v2395_v26 = vpack.c.bf16 %v2315_v43, %v2311_v8  ;;  %v2197_v19 = vmul.f32 %v3961_v49, %v6087_v35 }
 0x20d   :  { %v2318_v27 = vmul.f32 %v2190_v44, %v1284_v31  ;;  %v3969_v13 = vpop.eup %3968  ;;  %v1815_v21 = vadd.f32 1.0, %v3967_v0  ;;  %3988 = vpow2.f32 %v3226_v45  ;;  %v2397_v56 = vpack.c.bf16 %v2317_v48, %v2313_v5  ;;  %v1095_v14 = vpop.f32.mrb[112].mxu0  ;;  %v6090_v0 = vld [vmem:[#allocation68_spill] sm:$0xff] }
 0x20e   :  { %v2396_v2 = vpack.c.bf16 %v2316_v46, %v2312_v25  ;;  %v3971_v55 = vpop.eup %3970  ;;  %v1817_v16 = vadd.f32 1.0, %v3969_v13  ;;  %3990 = vpow2.f32 %v3227_v15  ;;  %v2196_v51 = vmul.f32 %v3963_v18, %v6088_v17  ;;  %v1288_v22 = vpop.f32.mrb[112].mxu1  ;;  %v6091_v13 = vld [vmem:[#allocation19_spill] sm:$0xff]  ;;  %v6094_v17 = vld [vmem:[#allocation122_spill] sm:$0xff] }
 0x20f   :  { %v2398_v59 = vpack.c.bf16 %v2318_v27, %v2314_v7  ;;  %v3973_v20 = vpop.eup %3972  ;;  %3992 = vrcp.f32 %v1815_v21  ;;  %v1816_v33 = vadd.f32 1.0, %v3971_v55  ;;  %v2198_v45 = vmul.f32 %v3965_v30, %v6089_v40  ;;  %v1097_v61 = vpop.f32.mrb[113].mxu0 }
 0x210   :  { %2791 = vmatprep.mubr.bf16.mxu0 %v2396_v2  ;;  %v3975_v1 = vpop.eup %3974  ;;  %3994 = vrcp.f32 %v1817_v16  ;;  %v1818_v63 = vadd.f32 1.0, %v3973_v20  ;;  %v2319_v32 = vmul.f32 %v2191_v53, %v1095_v14  ;;  %v2321_v28 = vmul.f32 %v2193_v36, %v1288_v22  ;;  %v1290_v58 = vpop.f32.mrb[113].mxu1  ;;  %v6093_v16 = vld [vmem:[#allocation70_spill] sm:$0xff] }
 0x211   :  { %2952 = vmatprep.mubr.bf16.mxu1 %v2398_v59  ;;  %2792 = vmatmul.mubr.bf16.gmra.mrb[172].mxu0 %v2395_v26  ;;  %v3977_v15 = vpop.eup %3976  ;;  %3996 = vrcp.f32 %v1816_v33  ;;  %v1819_v50 = vadd.f32 1.0, %v3975_v1  ;;  %v2320_v4 = vmul.f32 %v2192_v41, %v1097_v61  ;;  %v1099_v44 = vpop.f32.mrb[114].mxu0  ;;  %v2322_v38 = vmul.f32 %v2194_v47, %v1290_v58  ;;  %v6095_v33 = vld [vmem:[#allocation131_spill] sm:$0xff]  ;;  %v6098_v61 = vld [vmem:[#allocation132_spill] sm:$0xff] }
 0x212   :  { %2953 = vmatmul.mubr.bf16.gmra.mrb[172].mxu1 %v2397_v56  ;;  %v3979_v6 = vpop.eup %3978  ;;  %3998 = vrcp.f32 %v1818_v63  ;;  %v1821_v8 = vadd.f32 1.0, %v3977_v15  ;;  %v2323_v11 = vmul.f32 %v2195_v54, %v1099_v44  ;;  %v1292_v49 = vpop.f32.mrb[114].mxu1  ;;  %v3229_v23 = vmul.f32 -1.442695, %v6090_v0  ;;  %v6096_v1 = vld [vmem:[#allocation71_spill] sm:$0xff] }
 0x213   :  { %v1101_v10 = vpop.f32.mrb[115].mxu0  ;;  %v3981_v53 = vpop.eup %3980  ;;  %4000 = vrcp.f32 %v1819_v50  ;;  %v1820_v12 = vadd.f32 1.0, %v3979_v6  ;;  %v2325_v5 = vmul.f32 %v2197_v19, %v1292_v49  ;;  %v3228_v21 = vmul.f32 -1.442695, %v6091_v13  ;;  %v6100_v44 = vld [vmem:[#allocation23_spill] sm:$0xff] }
 0x214   :  { %v2324_v25 = vmul.f32 %v2196_v51, %v1101_v10  ;;  %v1294_v3 = vpop.f32.mrb[115].mxu1  ;;  %v3983_v62 = vpop.eup %3982  ;;  %4002 = vrcp.f32 %v1821_v8  ;;  %v1822_v18 = vadd.f32 1.0, %v3981_v53  ;;  %v2399_v57 = vpack.c.bf16 %v2323_v11, %v2319_v32  ;;  %v6097_v32 = vld [vmem:[#allocation123_spill] sm:$0xff]  ;;  %v6101_v11 = vld [vmem:[#allocation126_spill] sm:$0xff]  ;;  %v6102_v10 = vld [vmem:[#allocation133_spill] sm:$0xff] }
 0x215   :  { %v2326_v36 = vmul.f32 %v2198_v45, %v1294_v3  ;;  %v3985_v39 = vpop.eup %3984  ;;  %4004 = vrcp.f32 %v1820_v12  ;;  %v1823_v7 = vadd.f32 1.0, %v3983_v62  ;;  %v2401_v43 = vpack.c.bf16 %v2325_v5, %v2321_v28  ;;  %v1105_v48 = vpop.f32.mrb[116].mxu0  ;;  %v6104_v62 = vld [vmem:[#allocation134_spill] sm:$0xff] }
 0x216   :  { %v2400_v9 = vpack.c.bf16 %v2324_v25, %v2320_v4  ;;  %v3987_v34 = vpop.eup %3986  ;;  %4006 = vrcp.f32 %v1822_v18  ;;  %v1825_v30 = vadd.f32 1.0, %v3985_v39  ;;  %v1298_v47 = vpop.f32.mrb[116].mxu1  ;;  %v3230_v59 = vmul.f32 -1.442695, %v6093_v16  ;;  %v6099_v4 = vld [vmem:[#allocation125_spill] sm:$0xff]  ;;  %v6103_v25 = vld [vmem:[#allocation128_spill] sm:$0xff] }
 0x217   :  { %v2402_v29 = vpack.c.bf16 %v2326_v36, %v2322_v38  ;;  %v3989_v41 = vpop.eup %3988  ;;  %4008 = vrcp.f32 %v1823_v7  ;;  %v1824_v37 = vadd.f32 1.0, %v3987_v34  ;;  %v1107_v42 = vpop.f32.mrb[117].mxu0  ;;  %v3231_v14 = vmul.f32 -1.442695, %v6095_v33  ;;  %v6105_v7 = vld [vmem:[#allocation36_spill] sm:$0xff] }
 0x218   :  { %2799 = vmatprep.mubr.bf16.mxu0 %v2400_v9  ;;  %v3991_v46 = vpop.eup %3990  ;;  %4010 = vrcp.f32 %v1825_v30  ;;  %v1826_v31 = vadd.f32 1.0, %v3989_v41  ;;  %v1300_v56 = vpop.f32.mrb[117].mxu1  ;;  %v3233_v40 = vmul.f32 -1.442695, %v6096_v1  ;;  %v3232_v15 = vmul.f32 -1.442695, %v6098_v61 }
 0x219   :  { %2960 = vmatprep.mubr.bf16.mxu1 %v2402_v29  ;;  %2800 = vmatmul.mubr.bf16.gmra.mrb[176].mxu0 %v2399_v57  ;;  %v3993_v26 = vpop.eup %3992  ;;  %4012 = vrcp.f32 %v1824_v37  ;;  %v1827_v27 = vadd.f32 1.0, %v3991_v46  ;;  %v1109_v2 = vpop.f32.mrb[118].mxu0  ;;  %v3234_v6 = vmul.f32 -1.442695, %v6100_v44  ;;  %v3235_v53 = vmul.f32 -1.442695, %v6102_v10 }
 0x21a   :  { %2961 = vmatmul.mubr.bf16.gmra.mrb[176].mxu1 %v2401_v43  ;;  %v3995_v55 = vpop.eup %3994  ;;  %v2199_v54 = vmul.f32 %v3993_v26, %v6092_v24  ;;  %4014 = vrcp.f32 %v1826_v31  ;;  %v1302_v20 = vpop.f32.mrb[118].mxu1  ;;  %v3237_v18 = vmul.f32 -1.442695, %v6104_v62  ;;  %v6106_v9 = vld [vmem:[#allocation136_spill] sm:$0xff]  ;;  %v6108_v31 = vld [vmem:[#allocation26_spill] sm:$0xff] }
 0x21b   :  { %v1111_v35 = vpop.f32.mrb[119].mxu0  ;;  %v3997_v19 = vpop.eup %3996  ;;  %v2201_v51 = vmul.f32 %v3995_v55, %v6094_v17  ;;  %4016 = vrcp.f32 %v1827_v27  ;;  %v3236_v34 = vmul.f32 -1.442695, %v6106_v9 }
 0x21c   :  { %v1304_v45 = vpop.f32.mrb[119].mxu1  ;;  %v3999_v63 = vpop.eup %3998  ;;  %v2200_v22 = vmul.f32 %v3997_v19, %v6097_v32  ;;  %4018 = vpow2.f32 %v3229_v23  ;;  %v5428_v50 = vmul.f32 %v2199_v54, %v1105_v48  ;;  %v6107_v48 = vld [vmem:[#allocation8_spill] sm:$0xff]  ;;  %v3238_v23 = vmul.f32 -1.442695, %v6108_v31  ;;  %v6110_v19 = vld [vmem:[#allocation14_spill] sm:$0xff] }
 0x21d   :  { %v4001_v28 = vpop.eup %4000  ;;  %v2202_v58 = vmul.f32 %v3999_v63, %v6099_v4  ;;  %4020 = vpow2.f32 %v3228_v21  ;;  %v2329_v8 = vmul.f32 %v2201_v51, %v1298_v47  ;;  %v1115_v36 = vpop.f32.mrb[120].mxu0  ;;  %v6109_v21 = vld [vmem:[#allocation55_spill] sm:$0xff]  ;;  %v6111_v63 = vld [vmem:[#allocation58_spill] sm:$0xff] }
 0x21e   :  { %v4003_v38 = vpop.eup %4002  ;;  %v2203_v49 = vmul.f32 %v4001_v28, %v6101_v11  ;;  %4022 = vpow2.f32 %v3230_v59  ;;  %v2328_v12 = vmul.f32 %v2200_v22, %v1107_v42  ;;  %v1308_v29 = vpop.f32.mrb[120].mxu1 }
 0x21f   :  { %v4005_v5 = vpop.eup %4004  ;;  %v2205_v3 = vmul.f32 %v4003_v38, %v6103_v25  ;;  %4024 = vpow2.f32 %v3231_v14  ;;  %v2330_v57 = vmul.f32 %v2202_v58, %v1300_v56  ;;  %v1117_v41 = vpop.f32.mrb[121].mxu0 }
 0x220   :  { %v4007_v39 = vpop.eup %4006  ;;  %v2204_v43 = vmul.f32 %v4005_v5, %v6105_v7  ;;  %4026 = vpow2.f32 %v3233_v40  ;;  %v2331_v30 = vmul.f32 %v2203_v49, %v1109_v2  ;;  %v1310_v42 = vpop.f32.mrb[121].mxu1 }
 0x221   :  { %v4009_v37 = vpop.eup %4008  ;;  %v2206_v46 = vmul.f32 %v4007_v39, %v6107_v48  ;;  %4028 = vpow2.f32 %v3232_v15  ;;  %v2333_v47 = vmul.f32 %v2205_v3, %v1302_v20  ;;  %v1119_v26 = vpop.f32.mrb[122].mxu0 }
 0x222   :  { %v4011_v27 = vpop.eup %4010  ;;  %v2207_v56 = vmul.f32 %v4009_v37, %v6109_v21  ;;  %4030 = vpow2.f32 %v3234_v6  ;;  %v2403_v55 = vpack.c.bf16 %v2331_v30, %v5428_v50  ;;  %v2332_v24 = vmul.f32 %v2204_v43, %v1111_v35  ;;  %v5442_v54 = vpop.f32.mrb[122].mxu1 }
 0x223   :  { %v5444_v2 = vpop.f32.mrb[123].mxu0  ;;  %v4013_v59 = vpop.eup %4012  ;;  %v2209_v17 = vmul.f32 %v4011_v27, %v6110_v19  ;;  %4032 = vpow2.f32 %v3235_v53  ;;  %v2405_v51 = vpack.c.bf16 %v2333_v47, %v2329_v8  ;;  %v2334_v14 = vmul.f32 %v2206_v46, %v1304_v45 }
 0x224   :  { %v5447_v20 = vpop.f32.mrb[123].mxu1  ;;  %v4015_v40 = vpop.eup %4014  ;;  %v2208_v32 = vmul.f32 %v4013_v59, %v6111_v63  ;;  %4034 = vpow2.f32 %v3237_v18  ;;  %v2404_v22 = vpack.c.bf16 %v2332_v24, %v2328_v12  ;;  %v5450_v15 = vmul.f32 %v2207_v56, %v1115_v36 }
 0x225   :  { %v4017_v35 = vpop.eup %4016  ;;  %v2210_v50 = vmul.f32 %v4015_v40, %v6063_v60  ;;  %4036 = vpow2.f32 %v3236_v34  ;;  %v2406_v28 = vpack.c.bf16 %v2334_v14, %v2330_v57  ;;  %v5453_v4 = vmul.f32 %v2209_v17, %v1308_v29  ;;  %v1125_v49 = vpop.f32.mrb[124].mxu0 }
 0x226   :  { %v4019_v58 = vpop.eup %4018  ;;  %v2211_v6 = vmul.f32 %v4017_v35, %v6065_v52  ;;  %4038 = vpow2.f32 %v3238_v23  ;;  %2807 = vmatprep.mubr.bf16.mxu0 %v2404_v22  ;;  %v5456_v45 = vmul.f32 %v2208_v32, %v1117_v41  ;;  %v1318_v5 = vpop.f32.mrb[124].mxu1 }
 0x227   :  { %v4021_v8 = vpop.eup %4020  ;;  %v1829_v38 = vadd.f32 1.0, %v4019_v58  ;;  %2968 = vmatprep.mubr.bf16.mxu1 %v2406_v28  ;;  %v5458_v11 = vmul.f32 %v2210_v50, %v1310_v42  ;;  %2808 = vmatmul.mubr.bf16.gmra.mrb[180].mxu0 %v2403_v55  ;;  %v1127_v25 = vpop.f32.mrb[125].mxu0 }
 0x228   :  { %v4023_v53 = vpop.eup %4022  ;;  %v1828_v60 = vadd.f32 1.0, %v4021_v8  ;;  %2969 = vmatmul.mubr.bf16.gmra.mrb[180].mxu1 %v2405_v51  ;;  %v5460_v12 = vmul.f32 %v2211_v6, %v1119_v26  ;;  %v1320_v18 = vpop.f32.mrb[125].mxu1 }
 0x229   :  { %v4025_v3 = vpop.eup %4024  ;;  %4040 = vrcp.f32 %v1829_v38  ;;  %v1830_v52 = vadd.f32 1.0, %v4023_v53  ;;  %v5462_v57 = vpop.f32.mrb[126].mxu0 }
 0x22a   :  { %v4027_v36 = vpop.eup %4026  ;;  %4042 = vrcp.f32 %v1828_v60  ;;  %v1831_v39 = vadd.f32 1.0, %v4025_v3  ;;  %v2407_v7 = vpack.c.bf16 %v5460_v12, %v5450_v15  ;;  %v1322_v43 = vpop.f32.mrb[126].mxu1 }
 0x22b   :  { %v5466_v34 = vpop.f32.mrb[127].mxu0  ;;  %v4029_v30 = vpop.eup %4028  ;;  %4044 = vrcp.f32 %v1830_v52  ;;  %v1833_v29 = vadd.f32 1.0, %v4027_v36 }
 0x22c   :  { %v1324_v41 = vpop.f32.mrb[127].mxu1  ;;  %v4031_v37 = vpop.eup %4030  ;;  %4046 = vrcp.f32 %v1831_v39  ;;  %v1832_v48 = vadd.f32 1.0, %v4029_v30 }
 0x22d   :  { %v4033_v46 = vpop.eup %4032  ;;  %4048 = vrcp.f32 %v1833_v29  ;;  %v1834_v23 = vadd.f32 1.0, %v4031_v37 }
 0x22e   :  { %v4035_v47 = vpop.eup %4034  ;;  %4050 = vrcp.f32 %v1832_v48  ;;  %v1835_v42 = vadd.f32 1.0, %v4033_v46 }
 0x22f   :  { %v4037_v26 = vpop.eup %4036  ;;  %4052 = vrcp.f32 %v1834_v23  ;;  %v1837_v27 = vadd.f32 1.0, %v4035_v47 }
 0x230   :  { %v4039_v21 = vpop.eup %4038  ;;  %4054 = vrcp.f32 %v1835_v42  ;;  %v1836_v56 = vadd.f32 1.0, %v4037_v26 }
 0x231   :  { %4056 = vrcp.f32 %v1837_v27  ;;  %v1838_v55 = vadd.f32 1.0, %v4039_v21 }
 0x232   :  { %4058 = vrcp.f32 %v1836_v56 }
 0x233   :  { %v4041_v24 = vpop.eup %4040  ;;  %4060 = vrcp.f32 %v1838_v55 }
 0x234   :  { %v4043_v59 = vpop.eup %4042  ;;  %v2213_v19 = vmul.f32 %v4041_v24, %v6090_v0 }
 0x235   :  { %v4045_v17 = vpop.eup %4044  ;;  %v2212_v51 = vmul.f32 %v4043_v59, %v6091_v13 }
 0x236   :  { %v4047_v14 = vpop.eup %4046  ;;  %v2214_v40 = vmul.f32 %v4045_v17, %v6093_v16  ;;  %v2341_v63 = vmul.f32 %v2213_v19, %v5442_v54 }
 0x237   :  { %v4049_v32 = vpop.eup %4048  ;;  %v2215_v22 = vmul.f32 %v4047_v14, %v6095_v33  ;;  %v2340_v15 = vmul.f32 %v2212_v51, %v5444_v2 }
 0x238   :  { %v4051_v35 = vpop.eup %4050  ;;  %v2217_v50 = vmul.f32 %v4049_v32, %v6096_v1  ;;  %v2409_v28 = vpack.c.bf16 %v2341_v63, %v5453_v4  ;;  %v2342_v0 = vmul.f32 %v2214_v40, %v5447_v20 }
 0x239   :  { %v4053_v58 = vpop.eup %4052  ;;  %v2216_v13 = vmul.f32 %v4051_v35, %v6098_v61  ;;  %v2408_v6 = vpack.c.bf16 %v2340_v15, %v5456_v45  ;;  %v2343_v16 = vmul.f32 %v2215_v22, %v1125_v49 }
 0x23a   :  { %v4055_v8 = vpop.eup %4054  ;;  %v2218_v54 = vmul.f32 %v4053_v58, %v6100_v44  ;;  %v2410_v33 = vpack.c.bf16 %v2342_v0, %v5458_v11  ;;  %v2345_v38 = vmul.f32 %v2217_v50, %v1318_v5 }
 0x23b   :  { %v4057_v2 = vpop.eup %4056  ;;  %v2219_v53 = vmul.f32 %v4055_v8, %v6102_v10  ;;  %2815 = vmatprep.mubr.bf16.mxu0 %v2408_v6  ;;  %v2344_v1 = vmul.f32 %v2216_v13, %v1127_v25 }
 0x23c   :  { %v4059_v4 = vpop.eup %4058  ;;  %v2221_v20 = vmul.f32 %v4057_v2, %v6104_v62  ;;  %2976 = vmatprep.mubr.bf16.mxu1 %v2410_v33  ;;  %v2346_v60 = vmul.f32 %v2218_v54, %v1320_v18  ;;  %2816 = vmatmul.mubr.bf16.gmra.mrb[184].mxu0 %v2407_v7 }
 0x23d   :  { %v4061_v61 = vpop.eup %4060  ;;  %v2220_v45 = vmul.f32 %v4059_v4, %v6106_v9  ;;  %2977 = vmatmul.mubr.bf16.gmra.mrb[184].mxu1 %v2409_v28  ;;  %v2347_v44 = vmul.f32 %v2219_v53, %v5462_v57 }
 0x23e   :  { %v2222_v11 = vmul.f32 %v4061_v61, %v6108_v31  ;;  %v2349_v49 = vmul.f32 %v2221_v20, %v1322_v43 }
 0x23f   :  { %v2411_v12 = vpack.c.bf16 %v2347_v44, %v2343_v16  ;;  %v2348_v10 = vmul.f32 %v2220_v45, %v5466_v34 }
 0x240   :  { %v2413_v5 = vpack.c.bf16 %v2349_v49, %v2345_v38  ;;  %v2350_v25 = vmul.f32 %v2222_v11, %v1324_v41 }
 0x241   :  { %v2412_v3 = vpack.c.bf16 %v2348_v10, %v2344_v1 }
 0x242   :  { %v2414_v52 = vpack.c.bf16 %v2350_v25, %v2346_v60 }
 0x243   :  { %2823 = vmatprep.mubr.bf16.mxu0 %v2412_v3 }
 0x244   :  { %2984 = vmatprep.mubr.bf16.mxu1 %v2414_v52  ;;  %2824 = vmatmul.mubr.bf16.gmra.mrb[188].mxu0 %v2411_v12 }
 0x245   :  { %2985 = vmatmul.mubr.bf16.gmra.mrb[188].mxu1 %v2413_v5 }
 0x288   :  { %v3287_v62 = vpop.f32.mrb[128].mxu0 }
 0x289   :  { %v3399_v18 = vpop.f32.mrb[128].mxu1  ;;  %v3288_v9 = vpop.f32.mrb[129].mxu0 }
 0x28a   :  { %v3289_v36 = vadd.f32 %v3288_v9, %v3287_v62  ;;  %v3400_v39 = vpop.f32.mrb[129].mxu1  ;;  %v3290_v57 = vpop.f32.mrb[130].mxu0 }
 0x28b   :  { %v3401_v7 = vadd.f32 %v3400_v39, %v3399_v18  ;;  %v3402_v31 = vpop.f32.mrb[130].mxu1  ;;  %v3291_v43 = vpop.f32.mrb[131].mxu0 }
 0x28c   :  { %v3292_v30 = vadd.f32 %v3291_v43, %v3290_v57  ;;  %v3403_v29 = vpop.f32.mrb[131].mxu1 }
 0x28d   :  { %v2867_v34 = vadd.f32 %v3401_v7, %v3289_v36  ;;  %v3404_v37 = vadd.f32 %v3403_v29, %v3402_v31 }
 0x28f   :  { %2993 = vst [vmem:[%s5586_s3] sm:$0xff] %v2867_v34  ;;  %v2870_v41 = vadd.f32 %v3404_v37, %v3292_v30 }
 0x290   :  { %v3293_v48 = vpop.f32.mrb[132].mxu0 }
 0x291   :  { %2994 = vst [vmem:[%s5586_s3 + $0x8] sm:$0xff] %v2870_v41  ;;  %v3405_v46 = vpop.f32.mrb[132].mxu1  ;;  %v3294_v23 = vpop.f32.mrb[133].mxu0 }
 0x292   :  { %v3295_v47 = vadd.f32 %v3294_v23, %v3293_v48  ;;  %v3406_v42 = vpop.f32.mrb[133].mxu1  ;;  %v3296_v26 = vpop.f32.mrb[134].mxu0 }
 0x293   :  { %v3407_v27 = vadd.f32 %v3406_v42, %v3405_v46  ;;  %v3408_v21 = vpop.f32.mrb[134].mxu1  ;;  %v3297_v56 = vpop.f32.mrb[135].mxu0 }
 0x294   :  { %v3298_v55 = vadd.f32 %v3297_v56, %v3296_v26  ;;  %v3409_v24 = vpop.f32.mrb[135].mxu1 }
 0x295   :  { %v2875_v59 = vadd.f32 %v3407_v27, %v3295_v47  ;;  %v3410_v19 = vadd.f32 %v3409_v24, %v3408_v21 }
 0x297   :  { %2995 = vst [vmem:[%s5586_s3 + $0x10] sm:$0xff] %v2875_v59  ;;  %v2878_v17 = vadd.f32 %v3410_v19, %v3298_v55 }
 0x299   :  { %v3299_v51 = vpop.f32.mrb[136].mxu0  ;;  %2996 = vst [vmem:[%s5586_s3 + $0x18] sm:$0xff] %v2878_v17 }
 0x29a   :  { %v3411_v14 = vpop.f32.mrb[136].mxu1  ;;  %v3300_v40 = vpop.f32.mrb[137].mxu0 }
 0x29b   :  { %v3301_v63 = vadd.f32 %v3300_v40, %v3299_v51  ;;  %v3412_v32 = vpop.f32.mrb[137].mxu1  ;;  %v3302_v22 = vpop.f32.mrb[138].mxu0 }
 0x29c   :  { %v3413_v15 = vadd.f32 %v3412_v32, %v3411_v14  ;;  %v3414_v35 = vpop.f32.mrb[138].mxu1  ;;  %v3303_v50 = vpop.f32.mrb[139].mxu0 }
 0x29d   :  { %v3304_v28 = vadd.f32 %v3303_v50, %v3302_v22  ;;  %v3415_v0 = vpop.f32.mrb[139].mxu1 }
 0x29e   :  { %v2883_v58 = vadd.f32 %v3413_v15, %v3301_v63  ;;  %v3416_v13 = vadd.f32 %v3415_v0, %v3414_v35 }
 0x2a0   :  { %2997 = vst [vmem:[%s5586_s3 + $0x20] sm:$0xff] %v2883_v58  ;;  %v2886_v6 = vadd.f32 %v3416_v13, %v3304_v28 }
 0x2a1   :  { %v3305_v16 = vpop.f32.mrb[140].mxu0 }
 0x2a2   :  { %2998 = vst [vmem:[%s5586_s3 + $0x28] sm:$0xff] %v2886_v6  ;;  %v3417_v8 = vpop.f32.mrb[140].mxu1  ;;  %v3306_v54 = vpop.f32.mrb[141].mxu0 }
 0x2a3   :  { %v3307_v33 = vadd.f32 %v3306_v54, %v3305_v16  ;;  %v3418_v38 = vpop.f32.mrb[141].mxu1  ;;  %v3308_v2 = vpop.f32.mrb[142].mxu0 }
 0x2a4   :  { %v3419_v53 = vadd.f32 %v3418_v38, %v3417_v8  ;;  %v3420_v1 = vpop.f32.mrb[142].mxu1  ;;  %v3309_v4 = vpop.f32.mrb[143].mxu0 }
 0x2a5   :  { %v3310_v20 = vadd.f32 %v3309_v4, %v3308_v2  ;;  %v3421_v60 = vpop.f32.mrb[143].mxu1 }
 0x2a6   :  { %v2891_v61 = vadd.f32 %v3419_v53, %v3307_v33  ;;  %v3422_v45 = vadd.f32 %v3421_v60, %v3420_v1 }
 0x2a8   :  { %2999 = vst [vmem:[%s5586_s3 + $0x30] sm:$0xff] %v2891_v61  ;;  %v2894_v44 = vadd.f32 %v3422_v45, %v3310_v20 }
 0x2aa   :  { %3000 = vst [vmem:[%s5586_s3 + $0x38] sm:$0xff] %v2894_v44 }
 0x2ab   :  { %v3311_v11 = vpop.f32.mrb[144].mxu0 }
 0x2ac   :  { %v3423_v49 = vpop.f32.mrb[144].mxu1  ;;  %v3312_v12 = vpop.f32.mrb[145].mxu0 }
 0x2ad   :  { %v3313_v10 = vadd.f32 %v3312_v12, %v3311_v11  ;;  %v3424_v5 = vpop.f32.mrb[145].mxu1  ;;  %v3314_v25 = vpop.f32.mrb[146].mxu0 }
 0x2ae   :  { %v3425_v3 = vadd.f32 %v3424_v5, %v3423_v49  ;;  %v3426_v52 = vpop.f32.mrb[146].mxu1  ;;  %v3315_v62 = vpop.f32.mrb[147].mxu0 }
 0x2af   :  { %v3316_v18 = vadd.f32 %v3315_v62, %v3314_v25  ;;  %v3427_v9 = vpop.f32.mrb[147].mxu1 }
 0x2b0   :  { %v2899_v36 = vadd.f32 %v3425_v3, %v3313_v10  ;;  %v3428_v39 = vadd.f32 %v3427_v9, %v3426_v52 }
 0x2b2   :  { %3001 = vst [vmem:[%s5586_s3 + $0x40] sm:$0xff] %v2899_v36  ;;  %v2902_v57 = vadd.f32 %v3428_v39, %v3316_v18 }
 0x2b4   :  { %v3317_v7 = vpop.f32.mrb[148].mxu0  ;;  %3002 = vst [vmem:[%s5586_s3 + $0x48] sm:$0xff] %v2902_v57 }
 0x2b5   :  { %v3429_v31 = vpop.f32.mrb[148].mxu1  ;;  %v3318_v43 = vpop.f32.mrb[149].mxu0 }
 0x2b6   :  { %v3319_v30 = vadd.f32 %v3318_v43, %v3317_v7  ;;  %v3430_v29 = vpop.f32.mrb[149].mxu1  ;;  %v3320_v34 = vpop.f32.mrb[150].mxu0 }
 0x2b7   :  { %v3431_v37 = vadd.f32 %v3430_v29, %v3429_v31  ;;  %v3432_v41 = vpop.f32.mrb[150].mxu1  ;;  %v3321_v48 = vpop.f32.mrb[151].mxu0 }
 0x2b8   :  { %v3322_v46 = vadd.f32 %v3321_v48, %v3320_v34  ;;  %v3433_v23 = vpop.f32.mrb[151].mxu1 }
 0x2b9   :  { %v2907_v47 = vadd.f32 %v3431_v37, %v3319_v30  ;;  %v3434_v42 = vadd.f32 %v3433_v23, %v3432_v41 }
 0x2bb   :  { %3003 = vst [vmem:[%s5586_s3 + $0x50] sm:$0xff] %v2907_v47  ;;  %v2910_v26 = vadd.f32 %v3434_v42, %v3322_v46 }
 0x2bc   :  { %v3323_v27 = vpop.f32.mrb[152].mxu0 }
 0x2bd   :  { %3004 = vst [vmem:[%s5586_s3 + $0x58] sm:$0xff] %v2910_v26  ;;  %v3435_v21 = vpop.f32.mrb[152].mxu1  ;;  %v3324_v56 = vpop.f32.mrb[153].mxu0 }
 0x2be   :  { %v3325_v55 = vadd.f32 %v3324_v56, %v3323_v27  ;;  %v3436_v24 = vpop.f32.mrb[153].mxu1  ;;  %v3326_v59 = vpop.f32.mrb[154].mxu0 }
 0x2bf   :  { %v3437_v19 = vadd.f32 %v3436_v24, %v3435_v21  ;;  %v3438_v17 = vpop.f32.mrb[154].mxu1  ;;  %v3327_v51 = vpop.f32.mrb[155].mxu0 }
 0x2c0   :  { %v3328_v14 = vadd.f32 %v3327_v51, %v3326_v59  ;;  %v3439_v40 = vpop.f32.mrb[155].mxu1 }
 0x2c1   :  { %v2915_v63 = vadd.f32 %v3437_v19, %v3325_v55  ;;  %v3440_v32 = vadd.f32 %v3439_v40, %v3438_v17 }
 0x2c3   :  { %3005 = vst [vmem:[%s5586_s3 + $0x60] sm:$0xff] %v2915_v63  ;;  %v2918_v22 = vadd.f32 %v3440_v32, %v3328_v14 }
 0x2c4   :  { %v3329_v15 = vpop.f32.mrb[156].mxu0 }
 0x2c5   :  { %3006 = vst [vmem:[%s5586_s3 + $0x68] sm:$0xff] %v2918_v22  ;;  %v3441_v35 = vpop.f32.mrb[156].mxu1  ;;  %v3330_v50 = vpop.f32.mrb[157].mxu0 }
 0x2c6   :  { %v3331_v28 = vadd.f32 %v3330_v50, %v3329_v15  ;;  %v3442_v0 = vpop.f32.mrb[157].mxu1  ;;  %v3332_v58 = vpop.f32.mrb[158].mxu0 }
 0x2c7   :  { %v3443_v13 = vadd.f32 %v3442_v0, %v3441_v35  ;;  %v3444_v6 = vpop.f32.mrb[158].mxu1  ;;  %v3333_v16 = vpop.f32.mrb[159].mxu0 }
 0x2c8   :  { %v3334_v8 = vadd.f32 %v3333_v16, %v3332_v58  ;;  %v3445_v54 = vpop.f32.mrb[159].mxu1 }
 0x2c9   :  { %v2923_v33 = vadd.f32 %v3443_v13, %v3331_v28  ;;  %v3446_v38 = vadd.f32 %v3445_v54, %v3444_v6 }
 0x2cb   :  { %3007 = vst [vmem:[%s5586_s3 + $0x70] sm:$0xff] %v2923_v33  ;;  %v2926_v2 = vadd.f32 %v3446_v38, %v3334_v8 }
 0x2cc   :  { %v3335_v53 = vpop.f32.mrb[160].mxu0 }
 0x2cd   :  { %3008 = vst [vmem:[%s5586_s3 + $0x78] sm:$0xff] %v2926_v2  ;;  %v3447_v1 = vpop.f32.mrb[160].mxu1  ;;  %v3336_v4 = vpop.f32.mrb[161].mxu0 }
 0x2ce   :  { %v3337_v20 = vadd.f32 %v3336_v4, %v3335_v53  ;;  %v3448_v60 = vpop.f32.mrb[161].mxu1  ;;  %v3338_v61 = vpop.f32.mrb[162].mxu0 }
 0x2cf   :  { %v3449_v45 = vadd.f32 %v3448_v60, %v3447_v1  ;;  %v3450_v44 = vpop.f32.mrb[162].mxu1  ;;  %v3339_v11 = vpop.f32.mrb[163].mxu0 }
 0x2d0   :  { %v3340_v49 = vadd.f32 %v3339_v11, %v3338_v61  ;;  %v3451_v12 = vpop.f32.mrb[163].mxu1 }
 0x2d1   :  { %v2931_v10 = vadd.f32 %v3449_v45, %v3337_v20  ;;  %v3452_v5 = vadd.f32 %v3451_v12, %v3450_v44 }
 0x2d3   :  { %3009 = vst [vmem:[%s5586_s3 + $0x80] sm:$0xff] %v2931_v10  ;;  %v2934_v25 = vadd.f32 %v3452_v5, %v3340_v49 }
 0x2d4   :  { %v3341_v3 = vpop.f32.mrb[164].mxu0 }
 0x2d5   :  { %3010 = vst [vmem:[%s5586_s3 + $0x88] sm:$0xff] %v2934_v25  ;;  %v3453_v52 = vpop.f32.mrb[164].mxu1  ;;  %v3342_v62 = vpop.f32.mrb[165].mxu0 }
 0x2d6   :  { %v3343_v18 = vadd.f32 %v3342_v62, %v3341_v3  ;;  %v3454_v9 = vpop.f32.mrb[165].mxu1  ;;  %v3344_v36 = vpop.f32.mrb[166].mxu0 }
 0x2d7   :  { %v3455_v39 = vadd.f32 %v3454_v9, %v3453_v52  ;;  %v3456_v57 = vpop.f32.mrb[166].mxu1  ;;  %v3345_v7 = vpop.f32.mrb[167].mxu0 }
 0x2d8   :  { %v3346_v31 = vadd.f32 %v3345_v7, %v3344_v36  ;;  %v3457_v43 = vpop.f32.mrb[167].mxu1 }
 0x2d9   :  { %v2939_v30 = vadd.f32 %v3455_v39, %v3343_v18  ;;  %v3458_v29 = vadd.f32 %v3457_v43, %v3456_v57 }
 0x2db   :  { %3011 = vst [vmem:[%s5586_s3 + $0x90] sm:$0xff] %v2939_v30  ;;  %v2942_v34 = vadd.f32 %v3458_v29, %v3346_v31 }
 0x2dc   :  { %v3347_v37 = vpop.f32.mrb[168].mxu0 }
 0x2dd   :  { %3012 = vst [vmem:[%s5586_s3 + $0x98] sm:$0xff] %v2942_v34  ;;  %v3459_v41 = vpop.f32.mrb[168].mxu1  ;;  %v3348_v48 = vpop.f32.mrb[169].mxu0 }
 0x2de   :  { %v3349_v46 = vadd.f32 %v3348_v48, %v3347_v37  ;;  %v3460_v23 = vpop.f32.mrb[169].mxu1  ;;  %v3350_v47 = vpop.f32.mrb[170].mxu0 }
 0x2df   :  { %v3461_v42 = vadd.f32 %v3460_v23, %v3459_v41  ;;  %v3462_v26 = vpop.f32.mrb[170].mxu1  ;;  %v3351_v27 = vpop.f32.mrb[171].mxu0 }
 0x2e0   :  { %v3352_v21 = vadd.f32 %v3351_v27, %v3350_v47  ;;  %v3463_v56 = vpop.f32.mrb[171].mxu1 }
 0x2e1   :  { %v2947_v55 = vadd.f32 %v3461_v42, %v3349_v46  ;;  %v3464_v24 = vadd.f32 %v3463_v56, %v3462_v26 }
 0x2e3   :  { %3013 = vst [vmem:[%s5586_s3 + $0xa0] sm:$0xff] %v2947_v55  ;;  %v2950_v59 = vadd.f32 %v3464_v24, %v3352_v21 }
 0x2e4   :  { %v3353_v19 = vpop.f32.mrb[172].mxu0 }
 0x2e5   :  { %3014 = vst [vmem:[%s5586_s3 + $0xa8] sm:$0xff] %v2950_v59  ;;  %v3465_v17 = vpop.f32.mrb[172].mxu1  ;;  %v3354_v51 = vpop.f32.mrb[173].mxu0 }
 0x2e6   :  { %v3355_v14 = vadd.f32 %v3354_v51, %v3353_v19  ;;  %v3466_v40 = vpop.f32.mrb[173].mxu1  ;;  %v3356_v63 = vpop.f32.mrb[174].mxu0 }
 0x2e7   :  { %v3467_v32 = vadd.f32 %v3466_v40, %v3465_v17  ;;  %v3468_v22 = vpop.f32.mrb[174].mxu1  ;;  %v3357_v15 = vpop.f32.mrb[175].mxu0 }
 0x2e8   :  { %v3358_v35 = vadd.f32 %v3357_v15, %v3356_v63  ;;  %v3469_v50 = vpop.f32.mrb[175].mxu1 }
 0x2e9   :  { %v2955_v28 = vadd.f32 %v3467_v32, %v3355_v14  ;;  %v3470_v0 = vadd.f32 %v3469_v50, %v3468_v22 }
 0x2eb   :  { %3015 = vst [vmem:[%s5586_s3 + $0xb0] sm:$0xff] %v2955_v28  ;;  %v2958_v58 = vadd.f32 %v3470_v0, %v3358_v35 }
 0x2ec   :  { %v3359_v13 = vpop.f32.mrb[176].mxu0 }
 0x2ed   :  { %3016 = vst [vmem:[%s5586_s3 + $0xb8] sm:$0xff] %v2958_v58  ;;  %v3471_v6 = vpop.f32.mrb[176].mxu1  ;;  %v3360_v16 = vpop.f32.mrb[177].mxu0 }
 0x2ee   :  { %v3361_v8 = vadd.f32 %v3360_v16, %v3359_v13  ;;  %v3472_v54 = vpop.f32.mrb[177].mxu1  ;;  %v3362_v33 = vpop.f32.mrb[178].mxu0 }
 0x2ef   :  { %v3473_v38 = vadd.f32 %v3472_v54, %v3471_v6  ;;  %v3474_v2 = vpop.f32.mrb[178].mxu1  ;;  %v3363_v53 = vpop.f32.mrb[179].mxu0 }
 0x2f0   :  { %v3364_v1 = vadd.f32 %v3363_v53, %v3362_v33  ;;  %v3475_v4 = vpop.f32.mrb[179].mxu1 }
 0x2f1   :  { %v2963_v20 = vadd.f32 %v3473_v38, %v3361_v8  ;;  %v3476_v60 = vadd.f32 %v3475_v4, %v3474_v2 }
 0x2f3   :  { %3017 = vst [vmem:[%s5586_s3 + $0xc0] sm:$0xff] %v2963_v20  ;;  %v2966_v61 = vadd.f32 %v3476_v60, %v3364_v1 }
 0x2f5   :  { %3018 = vst [vmem:[%s5586_s3 + $0xc8] sm:$0xff] %v2966_v61 }
 0x2fa   :  { %v3365_v45 = vpop.f32.mrb[180].mxu0 }
 0x2fb   :  { %v3477_v44 = vpop.f32.mrb[180].mxu1  ;;  %v3366_v11 = vpop.f32.mrb[181].mxu0 }
 0x2fc   :  { %v3367_v49 = vadd.f32 %v3366_v11, %v3365_v45  ;;  %v3478_v12 = vpop.f32.mrb[181].mxu1  ;;  %v3368_v10 = vpop.f32.mrb[182].mxu0 }
 0x2fd   :  { %v3479_v5 = vadd.f32 %v3478_v12, %v3477_v44  ;;  %v3480_v25 = vpop.f32.mrb[182].mxu1  ;;  %v3369_v3 = vpop.f32.mrb[183].mxu0 }
 0x2fe   :  { %v3370_v52 = vadd.f32 %v3369_v3, %v3368_v10  ;;  %v3481_v62 = vpop.f32.mrb[183].mxu1 }
 0x2ff   :  { %v2971_v18 = vadd.f32 %v3479_v5, %v3367_v49  ;;  %v3482_v9 = vadd.f32 %v3481_v62, %v3480_v25 }
 0x301   :  { %3019 = vst [vmem:[%s5586_s3 + $0xd0] sm:$0xff] %v2971_v18  ;;  %v2974_v36 = vadd.f32 %v3482_v9, %v3370_v52 }
 0x303   :  { %3020 = vst [vmem:[%s5586_s3 + $0xd8] sm:$0xff] %v2974_v36 }
 0x30f   :  { %v3371_v39 = vpop.f32.mrb[184].mxu0 }
 0x310   :  { %v3483_v57 = vpop.f32.mrb[184].mxu1  ;;  %v3372_v7 = vpop.f32.mrb[185].mxu0 }
 0x311   :  { %v3373_v31 = vadd.f32 %v3372_v7, %v3371_v39  ;;  %v3484_v43 = vpop.f32.mrb[185].mxu1  ;;  %v3374_v30 = vpop.f32.mrb[186].mxu0 }
 0x312   :  { %v3485_v29 = vadd.f32 %v3484_v43, %v3483_v57  ;;  %v3486_v34 = vpop.f32.mrb[186].mxu1  ;;  %v3375_v37 = vpop.f32.mrb[187].mxu0 }
 0x313   :  { %v3376_v41 = vadd.f32 %v3375_v37, %v3374_v30  ;;  %v3487_v48 = vpop.f32.mrb[187].mxu1 }
 0x314   :  { %v2979_v46 = vadd.f32 %v3485_v29, %v3373_v31  ;;  %v3488_v23 = vadd.f32 %v3487_v48, %v3486_v34 }
 0x316   :  { %3021 = vst [vmem:[%s5586_s3 + $0xe0] sm:$0xff] %v2979_v46  ;;  %v2982_v47 = vadd.f32 %v3488_v23, %v3376_v41 }
 0x317   :  { %v3377_v42 = vpop.f32.mrb[188].mxu0 }
 0x318   :  { %3022 = vst [vmem:[%s5586_s3 + $0xe8] sm:$0xff] %v2982_v47  ;;  %v3489_v26 = vpop.f32.mrb[188].mxu1  ;;  %v3378_v27 = vpop.f32.mrb[189].mxu0 }
 0x319   :  { %v3379_v21 = vadd.f32 %v3378_v27, %v3377_v42  ;;  %v3490_v56 = vpop.f32.mrb[189].mxu1  ;;  %v3380_v55 = vpop.f32.mrb[190].mxu0 }
 0x31a   :  { %v3491_v24 = vadd.f32 %v3490_v56, %v3489_v26  ;;  %v3492_v59 = vpop.f32.mrb[190].mxu1  ;;  %v3381_v19 = vpop.f32.mrb[191].mxu0 }
 0x31b   :  { %v3382_v17 = vadd.f32 %v3381_v19, %v3380_v55  ;;  %v3493_v51 = vpop.f32.mrb[191].mxu1 }
 0x31c   :  { %v2987_v14 = vadd.f32 %v3491_v24, %v3379_v21  ;;  %v3494_v40 = vadd.f32 %v3493_v51, %v3492_v59 }
 0x31e   :  { %3023 = vst [vmem:[%s5586_s3 + $0xf0] sm:$0xff] %v2987_v14  ;;  %v2990_v63 = vadd.f32 %v3494_v40, %v3382_v17 }
 0x320   :  { %3024 = vst [vmem:[%s5586_s3 + $0xf8] sm:$0xff] %v2990_v63 }
 0x321   :  { %3029 = vsyncpa [#allocation3], 1 }
 0x322   :  { %3030 = vsyncpa [#allocation5], 1 }

</bundles_post_ra>
